<compile_context>
chip_gen: v5e
topology: v5e:2x2
jax: 0.10.0
libtpu: 0.0.40
codegen_flags: <defaults>
</compile_context>

<pallas_src>
import functools

import numpy as np
import jax
import jax.numpy as jnp
from jax import lax
from jax.experimental import pallas as pl
from jax.experimental.pallas import tpu as pltpu

_K = 5            # conv kernel size
_C = 12           # conv channel width
_W1 = 16          # conv1 output spatial width/height
_W2 = 8           # conv2..4 output spatial width/height
_NCLS = 100       # logits
_NPAD = 128       # lane-padded logits width


def _act(x, kind):
    if kind == "relu":
        return jnp.maximum(x, 0.0)
    if kind == "tanh":
        return jnp.tanh(x)
    # sigmoid (module default and fallback): reciprocal goes to the EUP slot.
    return pl.reciprocal(1.0 + jnp.exp(-x), approx=True)


# --------------------------- fused Pallas kernel ---------------------------

def _lenet_kernel(xrp_ref, w1_ref, b1_ref, w2_ref, b2_ref, w3_ref, b3_ref,
                  w4_ref, b4_ref, wfc_ref, bfc_ref,
                  out_ref,
                  g1_ref, g2_ref, g3_ref,
                  *, batch, activation):
    f32, bf16 = jnp.float32, jnp.bfloat16
    B = batch

    # Zero the padded activation grids; the untouched border rows/lanes are
    # exactly the conv "same" (pad=2) zero padding read by the taps below.
    g1_ref[...] = jnp.zeros(g1_ref.shape, g1_ref.dtype)
    g2_ref[...] = jnp.zeros(g2_ref.shape, g2_ref.dtype)
    g3_ref[...] = jnp.zeros(g3_ref.shape, g3_ref.dtype)

    # ---- conv1 (3->12, stride 2): 2 output-row parities x 5 kh taps --------
    # LHS rows = (b, m) with output row oh1 = 2*m + p; lanes = padded input
    # (w, ci) flattened (36*3 = 108).  w1_ref[kh] folds kw taps + column
    # stride 2 into a (108, 16*12) matrix.
    for p in range(2):
        acc = jnp.zeros((B * 8, _W1 * _C), f32)
        for kh in range(_K):
            row = 2 * p + kh                      # padded input row offset
            r, s = row % 4, row // 4              # mod-4 phase grid + offset
            lhs = xrp_ref[r, :, s:s + 8, :].reshape(B * 8, 36 * 3).astype(bf16)
            acc = acc + jnp.dot(lhs, w1_ref[kh], preferred_element_type=f32)
        a1 = _act(acc + b1_ref[...], activation)                 # (B*8, 192)
        # parity-p rows of conv1's 16x16 output -> conv2 row-parity grid
        g1_ref[p, :, 1:9, 24:24 + _W1 * _C] = a1.reshape(B, 8, _W1 * _C)

    # ---- conv2 (12->12, stride 2): 5 kh taps on the parity grids -----------
    acc = jnp.zeros((B * 8, _W2 * _C), f32)
    for kh in range(_K):
        par, off = kh % 2, kh // 2
        lhs = g1_ref[par, :, off:off + 8, :].reshape(B * 8, 20 * _C).astype(bf16)
        acc = acc + jnp.dot(lhs, w2_ref[kh], preferred_element_type=f32)
    a2 = _act(acc + b2_ref[...], activation)                     # (B*8, 96)
    g2_ref[:, 2:10, 24:24 + _W2 * _C] = a2.reshape(B, 8, _W2 * _C)

    # ---- conv3 (stride 1) ---------------------------------------------------
    acc = jnp.zeros((B * 8, _W2 * _C), f32)
    for kh in range(_K):
        lhs = g2_ref[:, kh:kh + 8, :].reshape(B * 8, 12 * _C).astype(bf16)
        acc = acc + jnp.dot(lhs, w3_ref[kh], preferred_element_type=f32)
    a3 = _act(acc + b3_ref[...], activation)
    g3_ref[:, 2:10, 24:24 + _W2 * _C] = a3.reshape(B, 8, _W2 * _C)

    # ---- conv4 (stride 1) ---------------------------------------------------
    acc = jnp.zeros((B * 8, _W2 * _C), f32)
    for kh in range(_K):
        lhs = g3_ref[:, kh:kh + 8, :].reshape(B * 8, 12 * _C).astype(bf16)
        acc = acc + jnp.dot(lhs, w4_ref[kh], preferred_element_type=f32)
    a4 = _act(acc + b4_ref[...], activation)                     # (B*8, 96)

    # ---- fc: 8 accumulated dots (one per output row), lane-dense output ----
    # wfc already encodes PyTorch's NCHW view(B,-1) ordering and 100->128 pad.
    a4r = a4.reshape(B, 8, _W2 * _C)
    accf = jnp.zeros((B, _NPAD), f32)
    for oh in range(8):
        accf = accf + jnp.dot(a4r[:, oh, :].astype(bf16), wfc_ref[oh],
                              preferred_element_type=f32)
    out_ref[...] = accf + bfc_ref[...]


# ------------------------------ host-side prep ------------------------------

def init_params(key):
    """Deterministic synthetic parameters with the LeNet(DLG) shapes."""
    ks = jax.random.split(key, 10)

    def conv_w(k, cout, cin):
        return 0.1 * jax.random.normal(k, (cout, cin, _K, _K), jnp.float32)

    return {
        "w1": conv_w(ks[0], _C, 3),
        "b1": 0.1 * jax.random.normal(ks[1], (_C,), jnp.float32),
        "w2": conv_w(ks[2], _C, _C),
        "b2": 0.1 * jax.random.normal(ks[3], (_C,), jnp.float32),
        "w3": conv_w(ks[4], _C, _C),
        "b3": 0.1 * jax.random.normal(ks[5], (_C,), jnp.float32),
        "w4": conv_w(ks[6], _C, _C),
        "b4": 0.1 * jax.random.normal(ks[7], (_C,), jnp.float32),
        "fc_w": 0.05 * jax.random.normal(ks[8], (100, 768), jnp.float32),
        "fc_b": 0.05 * jax.random.normal(ks[9], (100,), jnp.float32),
    }


def _conv_rhs(w, out_w, in_w_pad, stride):
    """Fold kw taps + column stride into a per-kh (in_w_pad*Cin, out_w*Cout) RHS.

    rhs[kh, wp*Cin + ci, ow*Cout + co] = w[co, ci, kh, kw] with wp = stride*ow + kw.
    """
    w = np.asarray(w, np.float32)                       # (Cout, Cin, 5, 5)
    cout, cin = w.shape[0], w.shape[1]
    rhs = np.zeros((_K, in_w_pad * cin, out_w * cout), np.float32)
    for kh in range(_K):
        for ow in range(out_w):
            for kw in range(_K):
                wp = stride * ow + kw
                rhs[kh, wp * cin:(wp + 1) * cin, ow * cout:(ow + 1) * cout] = \
                    w[:, :, kh, kw].T
    return rhs


def prepare_params(params):
    """One-time conversion of PyTorch-layout params to the kernel layout."""
    bf16, f32 = jnp.bfloat16, jnp.float32

    def bias(b, out_w):
        return jnp.asarray(np.tile(np.asarray(b, np.float32), out_w)[None, :], f32)

    # fc: fold NCHW view(B,-1) ordering (f = co*64 + oh*8 + ow) into
    # wfc[oh, ow*12 + co, o]; pad output lanes 100 -> 128.
    fc_w = np.asarray(params["fc_w"], np.float32)       # (100, 768)
    wfc = np.zeros((8, _W2 * _C, _NPAD), np.float32)
    for oh in range(8):
        for ow in range(8):
            for co in range(_C):
                wfc[oh, ow * _C + co, :_NCLS] = fc_w[:, co * 64 + oh * 8 + ow]
    bfc = np.zeros((1, _NPAD), np.float32)
    bfc[0, :_NCLS] = np.asarray(params["fc_b"], np.float32)

    return {
        "w1": jnp.asarray(_conv_rhs(params["w1"], _W1, 36, 2), bf16),
        "b1": bias(params["b1"], _W1),
        "w2": jnp.asarray(_conv_rhs(params["w2"], _W2, 20, 2), bf16),
        "b2": bias(params["b2"], _W2),
        "w3": jnp.asarray(_conv_rhs(params["w3"], _W2, 12, 1), bf16),
        "b3": bias(params["b3"], _W2),
        "w4": jnp.asarray(_conv_rhs(params["w4"], _W2, 12, 1), bf16),
        "b4": bias(params["b4"], _W2),
        "wfc": jnp.asarray(wfc, bf16),
        "bfc": jnp.asarray(bfc, f32),
    }


def _prep_input(x_nchw):
    """NCHW -> padded NHWC with (w, c) on lanes, split by input row mod 4."""
    B = x_nchw.shape[0]
    x = jnp.transpose(x_nchw, (0, 2, 3, 1)).astype(jnp.float32)   # (B,32,32,3)
    xp = jnp.pad(x, ((0, 0), (2, 2), (2, 2), (0, 0)))             # (B,36,36,3)
    xf = xp.reshape(B, 36, 36 * 3)
    return jnp.stack([xf[:, r::4, :] for r in range(4)], axis=0)  # (4,B,9,108)


def lenet_forward(prepped, x_nchw, activation="sigmoid"):
    """Fused forward pass matching LeNet.forward (default sigmoid)."""
    B, cin, H, W = x_nchw.shape
    assert (cin, H, W) == (3, 32, 32), "LeNet(DLG) fc expects 3x32x32 inputs"
    xrp = _prep_input(x_nchw)

    kern = functools.partial(_lenet_kernel, batch=B, activation=activation)
    vmem = pl.BlockSpec(memory_space=pltpu.MemorySpace.VMEM)
    out_padded = pl.pallas_call(
        kern,
        out_shape=jax.ShapeDtypeStruct((B, _NPAD), jnp.float32),
        in_specs=[vmem] * 11,
        out_specs=vmem,
        scratch_shapes=[
            # conv2 input, split into 2 row-parity grids, 1-row/2-col zero ring
            pltpu.VMEM((2, B, 10, 20 * _C), jnp.float32),
            # conv3 / conv4 inputs, spatially padded by 2 on each side
            pltpu.VMEM((B, 12, 12 * _C), jnp.float32),
            pltpu.VMEM((B, 12, 12 * _C), jnp.float32),
        ],
    )(xrp, prepped["w1"], prepped["b1"], prepped["w2"], prepped["b2"],
      prepped["w3"], prepped["b3"], prepped["w4"], prepped["b4"],
      prepped["wfc"], prepped["bfc"])
    return out_padded[:, :_NCLS]


# ----------------------------- pure-JAX reference ---------------------------

def _reference_forward(params, x_nchw, activation="sigmoid"):
    def act(v):
        if activation == "relu":
            return jnp.maximum(v, 0.0)
        if activation == "tanh":
            return jnp.tanh(v)
        return jax.nn.sigmoid(v)

    y = x_nchw
    for w, b, s in ((params["w1"], params["b1"], 2),
                    (params["w2"], params["b2"], 2),
                    (params["w3"], params["b3"], 1),
                    (params["w4"], params["b4"], 1)):
        y = lax.conv_general_dilated(
            y, w, window_strides=(s, s), padding=((2, 2), (2, 2)),
            dimension_numbers=("NCHW", "OIHW", "NCHW"),
            precision=lax.Precision.HIGHEST)
        y = act(y + b[None, :, None, None])
    y = y.reshape(y.shape[0], -1)                       # NCHW flatten -> 768
    return y @ params["fc_w"].T + params["fc_b"]


if __name__ == "__main__":
    key = jax.random.PRNGKey(0)
    pkey, xkey = jax.random.split(key)
    params = init_params(pkey)
    prepped = prepare_params(params)
    # fc in_features = 768 = 12 * 8 * 8  =>  input must be (B, 3, 32, 32)
    x = jax.random.normal(xkey, (2, 3, 32, 32), jnp.float32)

    fwd = jax.jit(lenet_forward, static_argnames=("activation",))
    out = jax.block_until_ready(fwd(prepped, x))

    assert out.shape == (2, 100), out.shape
    assert bool(jnp.all(jnp.isfinite(out)))

    ref = _reference_forward(params, x)
    err = float(jnp.max(jnp.abs(out - ref)))
    assert err < 1e-1, f"max |kernel - reference| = {err}"
    print("KERNEL_OK")
</pallas_src>

<mosaic_0001>
module attributes {stable_mosaic.version = 11 : i64} {
  func.func @_lenet_kernel(%arg0: memref<4x2x9x108xf32, #tpu.memory_space<vmem>>, %arg1: memref<5x108x192xbf16, #tpu.memory_space<vmem>>, %arg2: memref<1x192xf32, #tpu.memory_space<vmem>>, %arg3: memref<5x240x96xbf16, #tpu.memory_space<vmem>>, %arg4: memref<1x96xf32, #tpu.memory_space<vmem>>, %arg5: memref<5x144x96xbf16, #tpu.memory_space<vmem>>, %arg6: memref<1x96xf32, #tpu.memory_space<vmem>>, %arg7: memref<5x144x96xbf16, #tpu.memory_space<vmem>>, %arg8: memref<1x96xf32, #tpu.memory_space<vmem>>, %arg9: memref<8x96x128xbf16, #tpu.memory_space<vmem>>, %arg10: memref<1x128xf32, #tpu.memory_space<vmem>>, %arg11: memref<2x128xf32, #tpu.memory_space<vmem>>, %arg12: memref<2x2x10x240xf32, #tpu.memory_space<vmem>>, %arg13: memref<2x12x144xf32, #tpu.memory_space<vmem>>, %arg14: memref<2x12x144xf32, #tpu.memory_space<vmem>>) attributes {dimension_semantics = [], scalar_prefetch = 0 : i64, scratch_operands = 3 : i64, tpu.core_type = #tpu.core_type<tc>} {
    %cst = arith.constant 0.000000e+00 : f32
    %0 = vector.broadcast %cst : f32 to vector<2x2x10x240xf32>
    %c0 = arith.constant 0 : index
    %c0_0 = arith.constant 0 : index
    %c0_1 = arith.constant 0 : index
    %c0_2 = arith.constant 0 : index
    %1 = vector.load %arg12[%c0, %c0_0, %c0_1, %c0_2] : memref<2x2x10x240xf32, #tpu.memory_space<vmem>>, vector<2x2x10x240xf32>
    tpu.vector_store %arg12[%c0, %c0_0, %c0_1, %c0_2], %0 {strides = array<i32>} : memref<2x2x10x240xf32, #tpu.memory_space<vmem>>, vector<2x2x10x240xf32>,
    %cst_3 = arith.constant 0.000000e+00 : f32
    %2 = vector.broadcast %cst_3 : f32 to vector<2x12x144xf32>
    %c0_4 = arith.constant 0 : index
    %c0_5 = arith.constant 0 : index
    %c0_6 = arith.constant 0 : index
    %3 = vector.load %arg13[%c0_4, %c0_5, %c0_6] : memref<2x12x144xf32, #tpu.memory_space<vmem>>, vector<2x12x144xf32>
    tpu.vector_store %arg13[%c0_4, %c0_5, %c0_6], %2 {strides = array<i32>} : memref<2x12x144xf32, #tpu.memory_space<vmem>>, vector<2x12x144xf32>,
    %cst_7 = arith.constant 0.000000e+00 : f32
    %4 = vector.broadcast %cst_7 : f32 to vector<2x12x144xf32>
    %c0_8 = arith.constant 0 : index
    %c0_9 = arith.constant 0 : index
    %c0_10 = arith.constant 0 : index
    %5 = vector.load %arg14[%c0_8, %c0_9, %c0_10] : memref<2x12x144xf32, #tpu.memory_space<vmem>>, vector<2x12x144xf32>
    tpu.vector_store %arg14[%c0_8, %c0_9, %c0_10], %4 {strides = array<i32>} : memref<2x12x144xf32, #tpu.memory_space<vmem>>, vector<2x12x144xf32>,
    %cst_11 = arith.constant 0.000000e+00 : f32
    %6 = vector.broadcast %cst_11 : f32 to vector<16x192xf32>
    %c0_12 = arith.constant 0 : index
    %c0_13 = arith.constant 0 : index
    %c0_14 = arith.constant 0 : index
    %c0_15 = arith.constant 0 : index
    %7 = vector.load %arg0[%c0_12, %c0_13, %c0_14, %c0_15] : memref<4x2x9x108xf32, #tpu.memory_space<vmem>>, vector<1x2x8x108xf32>
    %8 = vector.shape_cast %7 : vector<1x2x8x108xf32> to vector<2x8x108xf32>
    %9 = vector.shape_cast %8 : vector<2x8x108xf32> to vector<16x108xf32>
    %10 = arith.truncf %9 : vector<16x108xf32> to vector<16x108xbf16>
    %c0_16 = arith.constant 0 : index
    %c0_17 = arith.constant 0 : index
    %c0_18 = arith.constant 0 : index
    %11 = vector.load %arg1[%c0_16, %c0_17, %c0_18] : memref<5x108x192xbf16, #tpu.memory_space<vmem>>, vector<1x108x192xbf16>
    %12 = vector.shape_cast %11 : vector<1x108x192xbf16> to vector<108x192xbf16>
    %cst_19 = arith.constant dense<0.000000e+00> : vector<16x192xf32>
    %13 = tpu.matmul %10, %12, %cst_19 {dimension_numbers = #tpu.dot_dimension_numbers<[1], [0], [0], [1], [0, 0, 1, 1], [], []>} : vector<16x108xbf16>, vector<108x192xbf16>, vector<16x192xf32> -> vector<16x192xf32>
    %14 = arith.addf %6, %13 : vector<16x192xf32>
    %c1 = arith.constant 1 : index
    %c0_20 = arith.constant 0 : index
    %c0_21 = arith.constant 0 : index
    %c0_22 = arith.constant 0 : index
    %15 = vector.load %arg0[%c1, %c0_20, %c0_21, %c0_22] : memref<4x2x9x108xf32, #tpu.memory_space<vmem>>, vector<1x2x8x108xf32>
    %16 = vector.shape_cast %15 : vector<1x2x8x108xf32> to vector<2x8x108xf32>
    %17 = vector.shape_cast %16 : vector<2x8x108xf32> to vector<16x108xf32>
    %18 = arith.truncf %17 : vector<16x108xf32> to vector<16x108xbf16>
    %c1_23 = arith.constant 1 : index
    %c0_24 = arith.constant 0 : index
    %c0_25 = arith.constant 0 : index
    %19 = vector.load %arg1[%c1_23, %c0_24, %c0_25] : memref<5x108x192xbf16, #tpu.memory_space<vmem>>, vector<1x108x192xbf16>
    %20 = vector.shape_cast %19 : vector<1x108x192xbf16> to vector<108x192xbf16>
    %cst_26 = arith.constant dense<0.000000e+00> : vector<16x192xf32>
    %21 = tpu.matmul %18, %20, %cst_26 {dimension_numbers = #tpu.dot_dimension_numbers<[1], [0], [0], [1], [0, 0, 1, 1], [], []>} : vector<16x108xbf16>, vector<108x192xbf16>, vector<16x192xf32> -> vector<16x192xf32>
    %22 = arith.addf %14, %21 : vector<16x192xf32>
    %c2 = arith.constant 2 : index
    %c0_27 = arith.constant 0 : index
    %c0_28 = arith.constant 0 : index
    %c0_29 = arith.constant 0 : index
    %23 = vector.load %arg0[%c2, %c0_27, %c0_28, %c0_29] : memref<4x2x9x108xf32, #tpu.memory_space<vmem>>, vector<1x2x8x108xf32>
    %24 = vector.shape_cast %23 : vector<1x2x8x108xf32> to vector<2x8x108xf32>
    %25 = vector.shape_cast %24 : vector<2x8x108xf32> to vector<16x108xf32>
    %26 = arith.truncf %25 : vector<16x108xf32> to vector<16x108xbf16>
    %c2_30 = arith.constant 2 : index
    %c0_31 = arith.constant 0 : index
    %c0_32 = arith.constant 0 : index
    %27 = vector.load %arg1[%c2_30, %c0_31, %c0_32] : memref<5x108x192xbf16, #tpu.memory_space<vmem>>, vector<1x108x192xbf16>
    %28 = vector.shape_cast %27 : vector<1x108x192xbf16> to vector<108x192xbf16>
    %cst_33 = arith.constant dense<0.000000e+00> : vector<16x192xf32>
    %29 = tpu.matmul %26, %28, %cst_33 {dimension_numbers = #tpu.dot_dimension_numbers<[1], [0], [0], [1], [0, 0, 1, 1], [], []>} : vector<16x108xbf16>, vector<108x192xbf16>, vector<16x192xf32> -> vector<16x192xf32>
    %30 = arith.addf %22, %29 : vector<16x192xf32>
    %c3 = arith.constant 3 : index
    %c0_34 = arith.constant 0 : index
    %c0_35 = arith.constant 0 : index
    %c0_36 = arith.constant 0 : index
    %31 = vector.load %arg0[%c3, %c0_34, %c0_35, %c0_36] : memref<4x2x9x108xf32, #tpu.memory_space<vmem>>, vector<1x2x8x108xf32>
    %32 = vector.shape_cast %31 : vector<1x2x8x108xf32> to vector<2x8x108xf32>
    %33 = vector.shape_cast %32 : vector<2x8x108xf32> to vector<16x108xf32>
    %34 = arith.truncf %33 : vector<16x108xf32> to vector<16x108xbf16>
    %c3_37 = arith.constant 3 : index
    %c0_38 = arith.constant 0 : index
    %c0_39 = arith.constant 0 : index
    %35 = vector.load %arg1[%c3_37, %c0_38, %c0_39] : memref<5x108x192xbf16, #tpu.memory_space<vmem>>, vector<1x108x192xbf16>
    %36 = vector.shape_cast %35 : vector<1x108x192xbf16> to vector<108x192xbf16>
    %cst_40 = arith.constant dense<0.000000e+00> : vector<16x192xf32>
    %37 = tpu.matmul %34, %36, %cst_40 {dimension_numbers = #tpu.dot_dimension_numbers<[1], [0], [0], [1], [0, 0, 1, 1], [], []>} : vector<16x108xbf16>, vector<108x192xbf16>, vector<16x192xf32> -> vector<16x192xf32>
    %38 = arith.addf %30, %37 : vector<16x192xf32>
    %c0_41 = arith.constant 0 : index
    %c0_42 = arith.constant 0 : index
    %c1_43 = arith.constant 1 : index
    %c0_44 = arith.constant 0 : index
    %39 = vector.load %arg0[%c0_41, %c0_42, %c1_43, %c0_44] : memref<4x2x9x108xf32, #tpu.memory_space<vmem>>, vector<1x2x8x108xf32>
    %40 = vector.shape_cast %39 : vector<1x2x8x108xf32> to vector<2x8x108xf32>
    %41 = vector.shape_cast %40 : vector<2x8x108xf32> to vector<16x108xf32>
    %42 = arith.truncf %41 : vector<16x108xf32> to vector<16x108xbf16>
    %c4 = arith.constant 4 : index
    %c0_45 = arith.constant 0 : index
    %c0_46 = arith.constant 0 : index
    %43 = vector.load %arg1[%c4, %c0_45, %c0_46] : memref<5x108x192xbf16, #tpu.memory_space<vmem>>, vector<1x108x192xbf16>
    %44 = vector.shape_cast %43 : vector<1x108x192xbf16> to vector<108x192xbf16>
    %cst_47 = arith.constant dense<0.000000e+00> : vector<16x192xf32>
    %45 = tpu.matmul %42, %44, %cst_47 {dimension_numbers = #tpu.dot_dimension_numbers<[1], [0], [0], [1], [0, 0, 1, 1], [], []>} : vector<16x108xbf16>, vector<108x192xbf16>, vector<16x192xf32> -> vector<16x192xf32>
    %46 = arith.addf %38, %45 : vector<16x192xf32>
    %c0_48 = arith.constant 0 : index
    %c0_49 = arith.constant 0 : index
    %47 = vector.load %arg2[%c0_48, %c0_49] : memref<1x192xf32, #tpu.memory_space<vmem>>, vector<1x192xf32>
    %48 = vector.broadcast %47 : vector<1x192xf32> to vector<16x192xf32>
    %49 = arith.addf %46, %48 : vector<16x192xf32>
    %cst_50 = arith.constant 0.000000e+00 : f32
    %50 = vector.broadcast %cst_50 : f32 to vector<16x192xf32>
    %51 = arith.subf %50, %49 : vector<16x192xf32>
    %52 = math.exp %51 : vector<16x192xf32>
    %cst_51 = arith.constant 1.000000e+00 : f32
    %53 = vector.broadcast %cst_51 : f32 to vector<16x192xf32>
    %54 = arith.addf %53, %52 : vector<16x192xf32>
    %55 = tpu.reciprocal %54 {approx = true} : vector<16x192xf32> -> vector<16x192xf32>
    %56 = vector.shape_cast %55 : vector<16x192xf32> to vector<2x8x192xf32>
    %c0_52 = arith.constant 0 : index
    %c0_53 = arith.constant 0 : index
    %c1_54 = arith.constant 1 : index
    %c24 = arith.constant 24 : index
    %57 = vector.load %arg12[%c0_52, %c0_53, %c1_54, %c24] : memref<2x2x10x240xf32, #tpu.memory_space<vmem>>, vector<1x2x8x192xf32>
    %58 = vector.shape_cast %57 : vector<1x2x8x192xf32> to vector<2x8x192xf32>
    %59 = vector.shape_cast %56 : vector<2x8x192xf32> to vector<1x2x8x192xf32>
    tpu.vector_store %arg12[%c0_52, %c0_53, %c1_54, %c24], %59 {strides = array<i32>} : memref<2x2x10x240xf32, #tpu.memory_space<vmem>>, vector<1x2x8x192xf32>,
    %cst_55 = arith.constant 0.000000e+00 : f32
    %60 = vector.broadcast %cst_55 : f32 to vector<16x192xf32>
    %c2_56 = arith.constant 2 : index
    %c0_57 = arith.constant 0 : index
    %c0_58 = arith.constant 0 : index
    %c0_59 = arith.constant 0 : index
    %61 = vector.load %arg0[%c2_56, %c0_57, %c0_58, %c0_59] : memref<4x2x9x108xf32, #tpu.memory_space<vmem>>, vector<1x2x8x108xf32>
    %62 = vector.shape_cast %61 : vector<1x2x8x108xf32> to vector<2x8x108xf32>
    %63 = vector.shape_cast %62 : vector<2x8x108xf32> to vector<16x108xf32>
    %64 = arith.truncf %63 : vector<16x108xf32> to vector<16x108xbf16>
    %c0_60 = arith.constant 0 : index
    %c0_61 = arith.constant 0 : index
    %c0_62 = arith.constant 0 : index
    %65 = vector.load %arg1[%c0_60, %c0_61, %c0_62] : memref<5x108x192xbf16, #tpu.memory_space<vmem>>, vector<1x108x192xbf16>
    %66 = vector.shape_cast %65 : vector<1x108x192xbf16> to vector<108x192xbf16>
    %cst_63 = arith.constant dense<0.000000e+00> : vector<16x192xf32>
    %67 = tpu.matmul %64, %66, %cst_63 {dimension_numbers = #tpu.dot_dimension_numbers<[1], [0], [0], [1], [0, 0, 1, 1], [], []>} : vector<16x108xbf16>, vector<108x192xbf16>, vector<16x192xf32> -> vector<16x192xf32>
    %68 = arith.addf %60, %67 : vector<16x192xf32>
    %c3_64 = arith.constant 3 : index
    %c0_65 = arith.constant 0 : index
    %c0_66 = arith.constant 0 : index
    %c0_67 = arith.constant 0 : index
    %69 = vector.load %arg0[%c3_64, %c0_65, %c0_66, %c0_67] : memref<4x2x9x108xf32, #tpu.memory_space<vmem>>, vector<1x2x8x108xf32>
    %70 = vector.shape_cast %69 : vector<1x2x8x108xf32> to vector<2x8x108xf32>
    %71 = vector.shape_cast %70 : vector<2x8x108xf32> to vector<16x108xf32>
    %72 = arith.truncf %71 : vector<16x108xf32> to vector<16x108xbf16>
    %c1_68 = arith.constant 1 : index
    %c0_69 = arith.constant 0 : index
    %c0_70 = arith.constant 0 : index
    %73 = vector.load %arg1[%c1_68, %c0_69, %c0_70] : memref<5x108x192xbf16, #tpu.memory_space<vmem>>, vector<1x108x192xbf16>
    %74 = vector.shape_cast %73 : vector<1x108x192xbf16> to vector<108x192xbf16>
    %cst_71 = arith.constant dense<0.000000e+00> : vector<16x192xf32>
    %75 = tpu.matmul %72, %74, %cst_71 {dimension_numbers = #tpu.dot_dimension_numbers<[1], [0], [0], [1], [0, 0, 1, 1], [], []>} : vector<16x108xbf16>, vector<108x192xbf16>, vector<16x192xf32> -> vector<16x192xf32>
    %76 = arith.addf %68, %75 : vector<16x192xf32>
    %c0_72 = arith.constant 0 : index
    %c0_73 = arith.constant 0 : index
    %c1_74 = arith.constant 1 : index
    %c0_75 = arith.constant 0 : index
    %77 = vector.load %arg0[%c0_72, %c0_73, %c1_74, %c0_75] : memref<4x2x9x108xf32, #tpu.memory_space<vmem>>, vector<1x2x8x108xf32>
    %78 = vector.shape_cast %77 : vector<1x2x8x108xf32> to vector<2x8x108xf32>
    %79 = vector.shape_cast %78 : vector<2x8x108xf32> to vector<16x108xf32>
    %80 = arith.truncf %79 : vector<16x108xf32> to vector<16x108xbf16>
    %c2_76 = arith.constant 2 : index
    %c0_77 = arith.constant 0 : index
    %c0_78 = arith.constant 0 : index
    %81 = vector.load %arg1[%c2_76, %c0_77, %c0_78] : memref<5x108x192xbf16, #tpu.memory_space<vmem>>, vector<1x108x192xbf16>
    %82 = vector.shape_cast %81 : vector<1x108x192xbf16> to vector<108x192xbf16>
    %cst_79 = arith.constant dense<0.000000e+00> : vector<16x192xf32>
    %83 = tpu.matmul %80, %82, %cst_79 {dimension_numbers = #tpu.dot_dimension_numbers<[1], [0], [0], [1], [0, 0, 1, 1], [], []>} : vector<16x108xbf16>, vector<108x192xbf16>, vector<16x192xf32> -> vector<16x192xf32>
    %84 = arith.addf %76, %83 : vector<16x192xf32>
    %c1_80 = arith.constant 1 : index
    %c0_81 = arith.constant 0 : index
    %c1_82 = arith.constant 1 : index
    %c0_83 = arith.constant 0 : index
    %85 = vector.load %arg0[%c1_80, %c0_81, %c1_82, %c0_83] : memref<4x2x9x108xf32, #tpu.memory_space<vmem>>, vector<1x2x8x108xf32>
    %86 = vector.shape_cast %85 : vector<1x2x8x108xf32> to vector<2x8x108xf32>
    %87 = vector.shape_cast %86 : vector<2x8x108xf32> to vector<16x108xf32>
    %88 = arith.truncf %87 : vector<16x108xf32> to vector<16x108xbf16>
    %c3_84 = arith.constant 3 : index
    %c0_85 = arith.constant 0 : index
    %c0_86 = arith.constant 0 : index
    %89 = vector.load %arg1[%c3_84, %c0_85, %c0_86] : memref<5x108x192xbf16, #tpu.memory_space<vmem>>, vector<1x108x192xbf16>
    %90 = vector.shape_cast %89 : vector<1x108x192xbf16> to vector<108x192xbf16>
    %cst_87 = arith.constant dense<0.000000e+00> : vector<16x192xf32>
    %91 = tpu.matmul %88, %90, %cst_87 {dimension_numbers = #tpu.dot_dimension_numbers<[1], [0], [0], [1], [0, 0, 1, 1], [], []>} : vector<16x108xbf16>, vector<108x192xbf16>, vector<16x192xf32> -> vector<16x192xf32>
    %92 = arith.addf %84, %91 : vector<16x192xf32>
    %c2_88 = arith.constant 2 : index
    %c0_89 = arith.constant 0 : index
    %c1_90 = arith.constant 1 : index
    %c0_91 = arith.constant 0 : index
    %93 = vector.load %arg0[%c2_88, %c0_89, %c1_90, %c0_91] : memref<4x2x9x108xf32, #tpu.memory_space<vmem>>, vector<1x2x8x108xf32>
    %94 = vector.shape_cast %93 : vector<1x2x8x108xf32> to vector<2x8x108xf32>
    %95 = vector.shape_cast %94 : vector<2x8x108xf32> to vector<16x108xf32>
    %96 = arith.truncf %95 : vector<16x108xf32> to vector<16x108xbf16>
    %c4_92 = arith.constant 4 : index
    %c0_93 = arith.constant 0 : index
    %c0_94 = arith.constant 0 : index
    %97 = vector.load %arg1[%c4_92, %c0_93, %c0_94] : memref<5x108x192xbf16, #tpu.memory_space<vmem>>, vector<1x108x192xbf16>
    %98 = vector.shape_cast %97 : vector<1x108x192xbf16> to vector<108x192xbf16>
    %cst_95 = arith.constant dense<0.000000e+00> : vector<16x192xf32>
    %99 = tpu.matmul %96, %98, %cst_95 {dimension_numbers = #tpu.dot_dimension_numbers<[1], [0], [0], [1], [0, 0, 1, 1], [], []>} : vector<16x108xbf16>, vector<108x192xbf16>, vector<16x192xf32> -> vector<16x192xf32>
    %100 = arith.addf %92, %99 : vector<16x192xf32>
    %c0_96 = arith.constant 0 : index
    %c0_97 = arith.constant 0 : index
    %101 = vector.load %arg2[%c0_96, %c0_97] : memref<1x192xf32, #tpu.memory_space<vmem>>, vector<1x192xf32>
    %102 = vector.broadcast %101 : vector<1x192xf32> to vector<16x192xf32>
    %103 = arith.addf %100, %102 : vector<16x192xf32>
    %cst_98 = arith.constant 0.000000e+00 : f32
    %104 = vector.broadcast %cst_98 : f32 to vector<16x192xf32>
    %105 = arith.subf %104, %103 : vector<16x192xf32>
    %106 = math.exp %105 : vector<16x192xf32>
    %cst_99 = arith.constant 1.000000e+00 : f32
    %107 = vector.broadcast %cst_99 : f32 to vector<16x192xf32>
    %108 = arith.addf %107, %106 : vector<16x192xf32>
    %109 = tpu.reciprocal %108 {approx = true} : vector<16x192xf32> -> vector<16x192xf32>
    %110 = vector.shape_cast %109 : vector<16x192xf32> to vector<2x8x192xf32>
    %c1_100 = arith.constant 1 : index
    %c0_101 = arith.constant 0 : index
    %c1_102 = arith.constant 1 : index
    %c24_103 = arith.constant 24 : index
    %111 = vector.load %arg12[%c1_100, %c0_101, %c1_102, %c24_103] : memref<2x2x10x240xf32, #tpu.memory_space<vmem>>, vector<1x2x8x192xf32>
    %112 = vector.shape_cast %111 : vector<1x2x8x192xf32> to vector<2x8x192xf32>
    %113 = vector.shape_cast %110 : vector<2x8x192xf32> to vector<1x2x8x192xf32>
    tpu.vector_store %arg12[%c1_100, %c0_101, %c1_102, %c24_103], %113 {strides = array<i32>} : memref<2x2x10x240xf32, #tpu.memory_space<vmem>>, vector<1x2x8x192xf32>,
    %cst_104 = arith.constant 0.000000e+00 : f32
    %114 = vector.broadcast %cst_104 : f32 to vector<16x96xf32>
    %c0_105 = arith.constant 0 : index
    %c0_106 = arith.constant 0 : index
    %c0_107 = arith.constant 0 : index
    %c0_108 = arith.constant 0 : index
    %115 = vector.load %arg12[%c0_105, %c0_106, %c0_107, %c0_108] : memref<2x2x10x240xf32, #tpu.memory_space<vmem>>, vector<1x2x8x240xf32>
    %116 = vector.shape_cast %115 : vector<1x2x8x240xf32> to vector<2x8x240xf32>
    %117 = vector.shape_cast %116 : vector<2x8x240xf32> to vector<16x240xf32>
    %118 = arith.truncf %117 : vector<16x240xf32> to vector<16x240xbf16>
    %c0_109 = arith.constant 0 : index
    %c0_110 = arith.constant 0 : index
    %c0_111 = arith.constant 0 : index
    %119 = vector.load %arg3[%c0_109, %c0_110, %c0_111] : memref<5x240x96xbf16, #tpu.memory_space<vmem>>, vector<1x240x96xbf16>
    %120 = vector.shape_cast %119 : vector<1x240x96xbf16> to vector<240x96xbf16>
    %cst_112 = arith.constant dense<0.000000e+00> : vector<16x96xf32>
    %121 = tpu.matmul %118, %120, %cst_112 {dimension_numbers = #tpu.dot_dimension_numbers<[1], [0], [0], [1], [0, 0, 1, 1], [], []>} : vector<16x240xbf16>, vector<240x96xbf16>, vector<16x96xf32> -> vector<16x96xf32>
    %122 = arith.addf %114, %121 : vector<16x96xf32>
    %c1_113 = arith.constant 1 : index
    %c0_114 = arith.constant 0 : index
    %c0_115 = arith.constant 0 : index
    %c0_116 = arith.constant 0 : index
    %123 = vector.load %arg12[%c1_113, %c0_114, %c0_115, %c0_116] : memref<2x2x10x240xf32, #tpu.memory_space<vmem>>, vector<1x2x8x240xf32>
    %124 = vector.shape_cast %123 : vector<1x2x8x240xf32> to vector<2x8x240xf32>
    %125 = vector.shape_cast %124 : vector<2x8x240xf32> to vector<16x240xf32>
    %126 = arith.truncf %125 : vector<16x240xf32> to vector<16x240xbf16>
    %c1_117 = arith.constant 1 : index
    %c0_118 = arith.constant 0 : index
    %c0_119 = arith.constant 0 : index
    %127 = vector.load %arg3[%c1_117, %c0_118, %c0_119] : memref<5x240x96xbf16, #tpu.memory_space<vmem>>, vector<1x240x96xbf16>
    %128 = vector.shape_cast %127 : vector<1x240x96xbf16> to vector<240x96xbf16>
    %cst_120 = arith.constant dense<0.000000e+00> : vector<16x96xf32>
    %129 = tpu.matmul %126, %128, %cst_120 {dimension_numbers = #tpu.dot_dimension_numbers<[1], [0], [0], [1], [0, 0, 1, 1], [], []>} : vector<16x240xbf16>, vector<240x96xbf16>, vector<16x96xf32> -> vector<16x96xf32>
    %130 = arith.addf %122, %129 : vector<16x96xf32>
    %c0_121 = arith.constant 0 : index
    %c0_122 = arith.constant 0 : index
    %c1_123 = arith.constant 1 : index
    %c0_124 = arith.constant 0 : index
    %131 = vector.load %arg12[%c0_121, %c0_122, %c1_123, %c0_124] : memref<2x2x10x240xf32, #tpu.memory_space<vmem>>, vector<1x2x8x240xf32>
    %132 = vector.shape_cast %131 : vector<1x2x8x240xf32> to vector<2x8x240xf32>
    %133 = vector.shape_cast %132 : vector<2x8x240xf32> to vector<16x240xf32>
    %134 = arith.truncf %133 : vector<16x240xf32> to vector<16x240xbf16>
    %c2_125 = arith.constant 2 : index
    %c0_126 = arith.constant 0 : index
    %c0_127 = arith.constant 0 : index
    %135 = vector.load %arg3[%c2_125, %c0_126, %c0_127] : memref<5x240x96xbf16, #tpu.memory_space<vmem>>, vector<1x240x96xbf16>
    %136 = vector.shape_cast %135 : vector<1x240x96xbf16> to vector<240x96xbf16>
    %cst_128 = arith.constant dense<0.000000e+00> : vector<16x96xf32>
    %137 = tpu.matmul %134, %136, %cst_128 {dimension_numbers = #tpu.dot_dimension_numbers<[1], [0], [0], [1], [0, 0, 1, 1], [], []>} : vector<16x240xbf16>, vector<240x96xbf16>, vector<16x96xf32> -> vector<16x96xf32>
    %138 = arith.addf %130, %137 : vector<16x96xf32>
    %c1_129 = arith.constant 1 : index
    %c0_130 = arith.constant 0 : index
    %c1_131 = arith.constant 1 : index
    %c0_132 = arith.constant 0 : index
    %139 = vector.load %arg12[%c1_129, %c0_130, %c1_131, %c0_132] : memref<2x2x10x240xf32, #tpu.memory_space<vmem>>, vector<1x2x8x240xf32>
    %140 = vector.shape_cast %139 : vector<1x2x8x240xf32> to vector<2x8x240xf32>
    %141 = vector.shape_cast %140 : vector<2x8x240xf32> to vector<16x240xf32>
    %142 = arith.truncf %141 : vector<16x240xf32> to vector<16x240xbf16>
    %c3_133 = arith.constant 3 : index
    %c0_134 = arith.constant 0 : index
    %c0_135 = arith.constant 0 : index
    %143 = vector.load %arg3[%c3_133, %c0_134, %c0_135] : memref<5x240x96xbf16, #tpu.memory_space<vmem>>, vector<1x240x96xbf16>
    %144 = vector.shape_cast %143 : vector<1x240x96xbf16> to vector<240x96xbf16>
    %cst_136 = arith.constant dense<0.000000e+00> : vector<16x96xf32>
    %145 = tpu.matmul %142, %144, %cst_136 {dimension_numbers = #tpu.dot_dimension_numbers<[1], [0], [0], [1], [0, 0, 1, 1], [], []>} : vector<16x240xbf16>, vector<240x96xbf16>, vector<16x96xf32> -> vector<16x96xf32>
    %146 = arith.addf %138, %145 : vector<16x96xf32>
    %c0_137 = arith.constant 0 : index
    %c0_138 = arith.constant 0 : index
    %c2_139 = arith.constant 2 : index
    %c0_140 = arith.constant 0 : index
    %147 = vector.load %arg12[%c0_137, %c0_138, %c2_139, %c0_140] : memref<2x2x10x240xf32, #tpu.memory_space<vmem>>, vector<1x2x8x240xf32>
    %148 = vector.shape_cast %147 : vector<1x2x8x240xf32> to vector<2x8x240xf32>
    %149 = vector.shape_cast %148 : vector<2x8x240xf32> to vector<16x240xf32>
    %150 = arith.truncf %149 : vector<16x240xf32> to vector<16x240xbf16>
    %c4_141 = arith.constant 4 : index
    %c0_142 = arith.constant 0 : index
    %c0_143 = arith.constant 0 : index
    %151 = vector.load %arg3[%c4_141, %c0_142, %c0_143] : memref<5x240x96xbf16, #tpu.memory_space<vmem>>, vector<1x240x96xbf16>
    %152 = vector.shape_cast %151 : vector<1x240x96xbf16> to vector<240x96xbf16>
    %cst_144 = arith.constant dense<0.000000e+00> : vector<16x96xf32>
    %153 = tpu.matmul %150, %152, %cst_144 {dimension_numbers = #tpu.dot_dimension_numbers<[1], [0], [0], [1], [0, 0, 1, 1], [], []>} : vector<16x240xbf16>, vector<240x96xbf16>, vector<16x96xf32> -> vector<16x96xf32>
    %154 = arith.addf %146, %153 : vector<16x96xf32>
    %c0_145 = arith.constant 0 : index
    %c0_146 = arith.constant 0 : index
    %155 = vector.load %arg4[%c0_145, %c0_146] : memref<1x96xf32, #tpu.memory_space<vmem>>, vector<1x96xf32>
    %156 = vector.broadcast %155 : vector<1x96xf32> to vector<16x96xf32>
    %157 = arith.addf %154, %156 : vector<16x96xf32>
    %cst_147 = arith.constant 0.000000e+00 : f32
    %158 = vector.broadcast %cst_147 : f32 to vector<16x96xf32>
    %159 = arith.subf %158, %157 : vector<16x96xf32>
    %160 = math.exp %159 : vector<16x96xf32>
    %cst_148 = arith.constant 1.000000e+00 : f32
    %161 = vector.broadcast %cst_148 : f32 to vector<16x96xf32>
    %162 = arith.addf %161, %160 : vector<16x96xf32>
    %163 = tpu.reciprocal %162 {approx = true} : vector<16x96xf32> -> vector<16x96xf32>
    %164 = vector.shape_cast %163 : vector<16x96xf32> to vector<2x8x96xf32>
    %c0_149 = arith.constant 0 : index
    %c2_150 = arith.constant 2 : index
    %c24_151 = arith.constant 24 : index
    %165 = vector.load %arg13[%c0_149, %c2_150, %c24_151] : memref<2x12x144xf32, #tpu.memory_space<vmem>>, vector<2x8x96xf32>
    tpu.vector_store %arg13[%c0_149, %c2_150, %c24_151], %164 {strides = array<i32>} : memref<2x12x144xf32, #tpu.memory_space<vmem>>, vector<2x8x96xf32>,
    %cst_152 = arith.constant 0.000000e+00 : f32
    %166 = vector.broadcast %cst_152 : f32 to vector<16x96xf32>
    %c0_153 = arith.constant 0 : index
    %c0_154 = arith.constant 0 : index
    %c0_155 = arith.constant 0 : index
    %167 = vector.load %arg13[%c0_153, %c0_154, %c0_155] : memref<2x12x144xf32, #tpu.memory_space<vmem>>, vector<2x8x144xf32>
    %168 = vector.shape_cast %167 : vector<2x8x144xf32> to vector<16x144xf32>
    %169 = arith.truncf %168 : vector<16x144xf32> to vector<16x144xbf16>
    %c0_156 = arith.constant 0 : index
    %c0_157 = arith.constant 0 : index
    %c0_158 = arith.constant 0 : index
    %170 = vector.load %arg5[%c0_156, %c0_157, %c0_158] : memref<5x144x96xbf16, #tpu.memory_space<vmem>>, vector<1x144x96xbf16>
    %171 = vector.shape_cast %170 : vector<1x144x96xbf16> to vector<144x96xbf16>
    %cst_159 = arith.constant dense<0.000000e+00> : vector<16x96xf32>
    %172 = tpu.matmul %169, %171, %cst_159 {dimension_numbers = #tpu.dot_dimension_numbers<[1], [0], [0], [1], [0, 0, 1, 1], [], []>} : vector<16x144xbf16>, vector<144x96xbf16>, vector<16x96xf32> -> vector<16x96xf32>
    %173 = arith.addf %166, %172 : vector<16x96xf32>
    %c0_160 = arith.constant 0 : index
    %c1_161 = arith.constant 1 : index
    %c0_162 = arith.constant 0 : index
    %174 = vector.load %arg13[%c0_160, %c1_161, %c0_162] : memref<2x12x144xf32, #tpu.memory_space<vmem>>, vector<2x8x144xf32>
    %175 = vector.shape_cast %174 : vector<2x8x144xf32> to vector<16x144xf32>
    %176 = arith.truncf %175 : vector<16x144xf32> to vector<16x144xbf16>
    %c1_163 = arith.constant 1 : index
    %c0_164 = arith.constant 0 : index
    %c0_165 = arith.constant 0 : index
    %177 = vector.load %arg5[%c1_163, %c0_164, %c0_165] : memref<5x144x96xbf16, #tpu.memory_space<vmem>>, vector<1x144x96xbf16>
    %178 = vector.shape_cast %177 : vector<1x144x96xbf16> to vector<144x96xbf16>
    %cst_166 = arith.constant dense<0.000000e+00> : vector<16x96xf32>
    %179 = tpu.matmul %176, %178, %cst_166 {dimension_numbers = #tpu.dot_dimension_numbers<[1], [0], [0], [1], [0, 0, 1, 1], [], []>} : vector<16x144xbf16>, vector<144x96xbf16>, vector<16x96xf32> -> vector<16x96xf32>
    %180 = arith.addf %173, %179 : vector<16x96xf32>
    %c0_167 = arith.constant 0 : index
    %c2_168 = arith.constant 2 : index
    %c0_169 = arith.constant 0 : index
    %181 = vector.load %arg13[%c0_167, %c2_168, %c0_169] : memref<2x12x144xf32, #tpu.memory_space<vmem>>, vector<2x8x144xf32>
    %182 = vector.shape_cast %181 : vector<2x8x144xf32> to vector<16x144xf32>
    %183 = arith.truncf %182 : vector<16x144xf32> to vector<16x144xbf16>
    %c2_170 = arith.constant 2 : index
    %c0_171 = arith.constant 0 : index
    %c0_172 = arith.constant 0 : index
    %184 = vector.load %arg5[%c2_170, %c0_171, %c0_172] : memref<5x144x96xbf16, #tpu.memory_space<vmem>>, vector<1x144x96xbf16>
    %185 = vector.shape_cast %184 : vector<1x144x96xbf16> to vector<144x96xbf16>
    %cst_173 = arith.constant dense<0.000000e+00> : vector<16x96xf32>
    %186 = tpu.matmul %183, %185, %cst_173 {dimension_numbers = #tpu.dot_dimension_numbers<[1], [0], [0], [1], [0, 0, 1, 1], [], []>} : vector<16x144xbf16>, vector<144x96xbf16>, vector<16x96xf32> -> vector<16x96xf32>
    %187 = arith.addf %180, %186 : vector<16x96xf32>
    %c0_174 = arith.constant 0 : index
    %c3_175 = arith.constant 3 : index
    %c0_176 = arith.constant 0 : index
    %188 = vector.load %arg13[%c0_174, %c3_175, %c0_176] : memref<2x12x144xf32, #tpu.memory_space<vmem>>, vector<2x8x144xf32>
    %189 = vector.shape_cast %188 : vector<2x8x144xf32> to vector<16x144xf32>
    %190 = arith.truncf %189 : vector<16x144xf32> to vector<16x144xbf16>
    %c3_177 = arith.constant 3 : index
    %c0_178 = arith.constant 0 : index
    %c0_179 = arith.constant 0 : index
    %191 = vector.load %arg5[%c3_177, %c0_178, %c0_179] : memref<5x144x96xbf16, #tpu.memory_space<vmem>>, vector<1x144x96xbf16>
    %192 = vector.shape_cast %191 : vector<1x144x96xbf16> to vector<144x96xbf16>
    %cst_180 = arith.constant dense<0.000000e+00> : vector<16x96xf32>
    %193 = tpu.matmul %190, %192, %cst_180 {dimension_numbers = #tpu.dot_dimension_numbers<[1], [0], [0], [1], [0, 0, 1, 1], [], []>} : vector<16x144xbf16>, vector<144x96xbf16>, vector<16x96xf32> -> vector<16x96xf32>
    %194 = arith.addf %187, %193 : vector<16x96xf32>
    %c0_181 = arith.constant 0 : index
    %c4_182 = arith.constant 4 : index
    %c0_183 = arith.constant 0 : index
    %195 = vector.load %arg13[%c0_181, %c4_182, %c0_183] : memref<2x12x144xf32, #tpu.memory_space<vmem>>, vector<2x8x144xf32>
    %196 = vector.shape_cast %195 : vector<2x8x144xf32> to vector<16x144xf32>
    %197 = arith.truncf %196 : vector<16x144xf32> to vector<16x144xbf16>
    %c4_184 = arith.constant 4 : index
    %c0_185 = arith.constant 0 : index
    %c0_186 = arith.constant 0 : index
    %198 = vector.load %arg5[%c4_184, %c0_185, %c0_186] : memref<5x144x96xbf16, #tpu.memory_space<vmem>>, vector<1x144x96xbf16>
    %199 = vector.shape_cast %198 : vector<1x144x96xbf16> to vector<144x96xbf16>
    %cst_187 = arith.constant dense<0.000000e+00> : vector<16x96xf32>
    %200 = tpu.matmul %197, %199, %cst_187 {dimension_numbers = #tpu.dot_dimension_numbers<[1], [0], [0], [1], [0, 0, 1, 1], [], []>} : vector<16x144xbf16>, vector<144x96xbf16>, vector<16x96xf32> -> vector<16x96xf32>
    %201 = arith.addf %194, %200 : vector<16x96xf32>
    %c0_188 = arith.constant 0 : index
    %c0_189 = arith.constant 0 : index
    %202 = vector.load %arg6[%c0_188, %c0_189] : memref<1x96xf32, #tpu.memory_space<vmem>>, vector<1x96xf32>
    %203 = vector.broadcast %202 : vector<1x96xf32> to vector<16x96xf32>
    %204 = arith.addf %201, %203 : vector<16x96xf32>
    %cst_190 = arith.constant 0.000000e+00 : f32
    %205 = vector.broadcast %cst_190 : f32 to vector<16x96xf32>
    %206 = arith.subf %205, %204 : vector<16x96xf32>
    %207 = math.exp %206 : vector<16x96xf32>
    %cst_191 = arith.constant 1.000000e+00 : f32
    %208 = vector.broadcast %cst_191 : f32 to vector<16x96xf32>
    %209 = arith.addf %208, %207 : vector<16x96xf32>
    %210 = tpu.reciprocal %209 {approx = true} : vector<16x96xf32> -> vector<16x96xf32>
    %211 = vector.shape_cast %210 : vector<16x96xf32> to vector<2x8x96xf32>
    %c0_192 = arith.constant 0 : index
    %c2_193 = arith.constant 2 : index
    %c24_194 = arith.constant 24 : index
    %212 = vector.load %arg14[%c0_192, %c2_193, %c24_194] : memref<2x12x144xf32, #tpu.memory_space<vmem>>, vector<2x8x96xf32>
    tpu.vector_store %arg14[%c0_192, %c2_193, %c24_194], %211 {strides = array<i32>} : memref<2x12x144xf32, #tpu.memory_space<vmem>>, vector<2x8x96xf32>,
    %cst_195 = arith.constant 0.000000e+00 : f32
    %213 = vector.broadcast %cst_195 : f32 to vector<16x96xf32>
    %c0_196 = arith.constant 0 : index
    %c0_197 = arith.constant 0 : index
    %c0_198 = arith.constant 0 : index
    %214 = vector.load %arg14[%c0_196, %c0_197, %c0_198] : memref<2x12x144xf32, #tpu.memory_space<vmem>>, vector<2x8x144xf32>
    %215 = vector.shape_cast %214 : vector<2x8x144xf32> to vector<16x144xf32>
    %216 = arith.truncf %215 : vector<16x144xf32> to vector<16x144xbf16>
    %c0_199 = arith.constant 0 : index
    %c0_200 = arith.constant 0 : index
    %c0_201 = arith.constant 0 : index
    %217 = vector.load %arg7[%c0_199, %c0_200, %c0_201] : memref<5x144x96xbf16, #tpu.memory_space<vmem>>, vector<1x144x96xbf16>
    %218 = vector.shape_cast %217 : vector<1x144x96xbf16> to vector<144x96xbf16>
    %cst_202 = arith.constant dense<0.000000e+00> : vector<16x96xf32>
    %219 = tpu.matmul %216, %218, %cst_202 {dimension_numbers = #tpu.dot_dimension_numbers<[1], [0], [0], [1], [0, 0, 1, 1], [], []>} : vector<16x144xbf16>, vector<144x96xbf16>, vector<16x96xf32> -> vector<16x96xf32>
    %220 = arith.addf %213, %219 : vector<16x96xf32>
    %c0_203 = arith.constant 0 : index
    %c1_204 = arith.constant 1 : index
    %c0_205 = arith.constant 0 : index
    %221 = vector.load %arg14[%c0_203, %c1_204, %c0_205] : memref<2x12x144xf32, #tpu.memory_space<vmem>>, vector<2x8x144xf32>
    %222 = vector.shape_cast %221 : vector<2x8x144xf32> to vector<16x144xf32>
    %223 = arith.truncf %222 : vector<16x144xf32> to vector<16x144xbf16>
    %c1_206 = arith.constant 1 : index
    %c0_207 = arith.constant 0 : index
    %c0_208 = arith.constant 0 : index
    %224 = vector.load %arg7[%c1_206, %c0_207, %c0_208] : memref<5x144x96xbf16, #tpu.memory_space<vmem>>, vector<1x144x96xbf16>
    %225 = vector.shape_cast %224 : vector<1x144x96xbf16> to vector<144x96xbf16>
    %cst_209 = arith.constant dense<0.000000e+00> : vector<16x96xf32>
    %226 = tpu.matmul %223, %225, %cst_209 {dimension_numbers = #tpu.dot_dimension_numbers<[1], [0], [0], [1], [0, 0, 1, 1], [], []>} : vector<16x144xbf16>, vector<144x96xbf16>, vector<16x96xf32> -> vector<16x96xf32>
    %227 = arith.addf %220, %226 : vector<16x96xf32>
    %c0_210 = arith.constant 0 : index
    %c2_211 = arith.constant 2 : index
    %c0_212 = arith.constant 0 : index
    %228 = vector.load %arg14[%c0_210, %c2_211, %c0_212] : memref<2x12x144xf32, #tpu.memory_space<vmem>>, vector<2x8x144xf32>
    %229 = vector.shape_cast %228 : vector<2x8x144xf32> to vector<16x144xf32>
    %230 = arith.truncf %229 : vector<16x144xf32> to vector<16x144xbf16>
    %c2_213 = arith.constant 2 : index
    %c0_214 = arith.constant 0 : index
    %c0_215 = arith.constant 0 : index
    %231 = vector.load %arg7[%c2_213, %c0_214, %c0_215] : memref<5x144x96xbf16, #tpu.memory_space<vmem>>, vector<1x144x96xbf16>
    %232 = vector.shape_cast %231 : vector<1x144x96xbf16> to vector<144x96xbf16>
    %cst_216 = arith.constant dense<0.000000e+00> : vector<16x96xf32>
    %233 = tpu.matmul %230, %232, %cst_216 {dimension_numbers = #tpu.dot_dimension_numbers<[1], [0], [0], [1], [0, 0, 1, 1], [], []>} : vector<16x144xbf16>, vector<144x96xbf16>, vector<16x96xf32> -> vector<16x96xf32>
    %234 = arith.addf %227, %233 : vector<16x96xf32>
    %c0_217 = arith.constant 0 : index
    %c3_218 = arith.constant 3 : index
    %c0_219 = arith.constant 0 : index
    %235 = vector.load %arg14[%c0_217, %c3_218, %c0_219] : memref<2x12x144xf32, #tpu.memory_space<vmem>>, vector<2x8x144xf32>
    %236 = vector.shape_cast %235 : vector<2x8x144xf32> to vector<16x144xf32>
    %237 = arith.truncf %236 : vector<16x144xf32> to vector<16x144xbf16>
    %c3_220 = arith.constant 3 : index
    %c0_221 = arith.constant 0 : index
    %c0_222 = arith.constant 0 : index
    %238 = vector.load %arg7[%c3_220, %c0_221, %c0_222] : memref<5x144x96xbf16, #tpu.memory_space<vmem>>, vector<1x144x96xbf16>
    %239 = vector.shape_cast %238 : vector<1x144x96xbf16> to vector<144x96xbf16>
    %cst_223 = arith.constant dense<0.000000e+00> : vector<16x96xf32>
    %240 = tpu.matmul %237, %239, %cst_223 {dimension_numbers = #tpu.dot_dimension_numbers<[1], [0], [0], [1], [0, 0, 1, 1], [], []>} : vector<16x144xbf16>, vector<144x96xbf16>, vector<16x96xf32> -> vector<16x96xf32>
    %241 = arith.addf %234, %240 : vector<16x96xf32>
    %c0_224 = arith.constant 0 : index
    %c4_225 = arith.constant 4 : index
    %c0_226 = arith.constant 0 : index
    %242 = vector.load %arg14[%c0_224, %c4_225, %c0_226] : memref<2x12x144xf32, #tpu.memory_space<vmem>>, vector<2x8x144xf32>
    %243 = vector.shape_cast %242 : vector<2x8x144xf32> to vector<16x144xf32>
    %244 = arith.truncf %243 : vector<16x144xf32> to vector<16x144xbf16>
    %c4_227 = arith.constant 4 : index
    %c0_228 = arith.constant 0 : index
    %c0_229 = arith.constant 0 : index
    %245 = vector.load %arg7[%c4_227, %c0_228, %c0_229] : memref<5x144x96xbf16, #tpu.memory_space<vmem>>, vector<1x144x96xbf16>
    %246 = vector.shape_cast %245 : vector<1x144x96xbf16> to vector<144x96xbf16>
    %cst_230 = arith.constant dense<0.000000e+00> : vector<16x96xf32>
    %247 = tpu.matmul %244, %246, %cst_230 {dimension_numbers = #tpu.dot_dimension_numbers<[1], [0], [0], [1], [0, 0, 1, 1], [], []>} : vector<16x144xbf16>, vector<144x96xbf16>, vector<16x96xf32> -> vector<16x96xf32>
    %248 = arith.addf %241, %247 : vector<16x96xf32>
    %c0_231 = arith.constant 0 : index
    %c0_232 = arith.constant 0 : index
    %249 = vector.load %arg8[%c0_231, %c0_232] : memref<1x96xf32, #tpu.memory_space<vmem>>, vector<1x96xf32>
    %250 = vector.broadcast %249 : vector<1x96xf32> to vector<16x96xf32>
    %251 = arith.addf %248, %250 : vector<16x96xf32>
    %cst_233 = arith.constant 0.000000e+00 : f32
    %252 = vector.broadcast %cst_233 : f32 to vector<16x96xf32>
    %253 = arith.subf %252, %251 : vector<16x96xf32>
    %254 = math.exp %253 : vector<16x96xf32>
    %cst_234 = arith.constant 1.000000e+00 : f32
    %255 = vector.broadcast %cst_234 : f32 to vector<16x96xf32>
    %256 = arith.addf %255, %254 : vector<16x96xf32>
    %257 = tpu.reciprocal %256 {approx = true} : vector<16x96xf32> -> vector<16x96xf32>
    %258 = vector.shape_cast %257 : vector<16x96xf32> to vector<2x8x96xf32>
    %cst_235 = arith.constant 0.000000e+00 : f32
    %259 = vector.broadcast %cst_235 : f32 to vector<2x128xf32>
    %260 = vector.extract_strided_slice %258 {offsets = [0, 0, 0], sizes = [2, 1, 96], strides = [1, 1, 1]} : vector<2x8x96xf32> to vector<2x1x96xf32>
    %261 = vector.shape_cast %260 : vector<2x1x96xf32> to vector<2x96xf32>
    %262 = arith.truncf %261 : vector<2x96xf32> to vector<2x96xbf16>
    %c0_236 = arith.constant 0 : index
    %c0_237 = arith.constant 0 : index
    %c0_238 = arith.constant 0 : index
    %263 = vector.load %arg9[%c0_236, %c0_237, %c0_238] : memref<8x96x128xbf16, #tpu.memory_space<vmem>>, vector<1x96x128xbf16>
    %264 = vector.shape_cast %263 : vector<1x96x128xbf16> to vector<96x128xbf16>
    %cst_239 = arith.constant dense<0.000000e+00> : vector<2x128xf32>
    %265 = tpu.matmul %262, %264, %cst_239 {dimension_numbers = #tpu.dot_dimension_numbers<[1], [0], [0], [1], [0, 0, 1, 1], [], []>} : vector<2x96xbf16>, vector<96x128xbf16>, vector<2x128xf32> -> vector<2x128xf32>
    %266 = arith.addf %259, %265 : vector<2x128xf32>
    %267 = vector.extract_strided_slice %258 {offsets = [0, 1, 0], sizes = [2, 1, 96], strides = [1, 1, 1]} : vector<2x8x96xf32> to vector<2x1x96xf32>
    %268 = vector.shape_cast %267 : vector<2x1x96xf32> to vector<2x96xf32>
    %269 = arith.truncf %268 : vector<2x96xf32> to vector<2x96xbf16>
    %c1_240 = arith.constant 1 : index
    %c0_241 = arith.constant 0 : index
    %c0_242 = arith.constant 0 : index
    %270 = vector.load %arg9[%c1_240, %c0_241, %c0_242] : memref<8x96x128xbf16, #tpu.memory_space<vmem>>, vector<1x96x128xbf16>
    %271 = vector.shape_cast %270 : vector<1x96x128xbf16> to vector<96x128xbf16>
    %cst_243 = arith.constant dense<0.000000e+00> : vector<2x128xf32>
    %272 = tpu.matmul %269, %271, %cst_243 {dimension_numbers = #tpu.dot_dimension_numbers<[1], [0], [0], [1], [0, 0, 1, 1], [], []>} : vector<2x96xbf16>, vector<96x128xbf16>, vector<2x128xf32> -> vector<2x128xf32>
    %273 = arith.addf %266, %272 : vector<2x128xf32>
    %274 = vector.extract_strided_slice %258 {offsets = [0, 2, 0], sizes = [2, 1, 96], strides = [1, 1, 1]} : vector<2x8x96xf32> to vector<2x1x96xf32>
    %275 = vector.shape_cast %274 : vector<2x1x96xf32> to vector<2x96xf32>
    %276 = arith.truncf %275 : vector<2x96xf32> to vector<2x96xbf16>
    %c2_244 = arith.constant 2 : index
    %c0_245 = arith.constant 0 : index
    %c0_246 = arith.constant 0 : index
    %277 = vector.load %arg9[%c2_244, %c0_245, %c0_246] : memref<8x96x128xbf16, #tpu.memory_space<vmem>>, vector<1x96x128xbf16>
    %278 = vector.shape_cast %277 : vector<1x96x128xbf16> to vector<96x128xbf16>
    %cst_247 = arith.constant dense<0.000000e+00> : vector<2x128xf32>
    %279 = tpu.matmul %276, %278, %cst_247 {dimension_numbers = #tpu.dot_dimension_numbers<[1], [0], [0], [1], [0, 0, 1, 1], [], []>} : vector<2x96xbf16>, vector<96x128xbf16>, vector<2x128xf32> -> vector<2x128xf32>
    %280 = arith.addf %273, %279 : vector<2x128xf32>
    %281 = vector.extract_strided_slice %258 {offsets = [0, 3, 0], sizes = [2, 1, 96], strides = [1, 1, 1]} : vector<2x8x96xf32> to vector<2x1x96xf32>
    %282 = vector.shape_cast %281 : vector<2x1x96xf32> to vector<2x96xf32>
    %283 = arith.truncf %282 : vector<2x96xf32> to vector<2x96xbf16>
    %c3_248 = arith.constant 3 : index
    %c0_249 = arith.constant 0 : index
    %c0_250 = arith.constant 0 : index
    %284 = vector.load %arg9[%c3_248, %c0_249, %c0_250] : memref<8x96x128xbf16, #tpu.memory_space<vmem>>, vector<1x96x128xbf16>
    %285 = vector.shape_cast %284 : vector<1x96x128xbf16> to vector<96x128xbf16>
    %cst_251 = arith.constant dense<0.000000e+00> : vector<2x128xf32>
    %286 = tpu.matmul %283, %285, %cst_251 {dimension_numbers = #tpu.dot_dimension_numbers<[1], [0], [0], [1], [0, 0, 1, 1], [], []>} : vector<2x96xbf16>, vector<96x128xbf16>, vector<2x128xf32> -> vector<2x128xf32>
    %287 = arith.addf %280, %286 : vector<2x128xf32>
    %288 = vector.extract_strided_slice %258 {offsets = [0, 4, 0], sizes = [2, 1, 96], strides = [1, 1, 1]} : vector<2x8x96xf32> to vector<2x1x96xf32>
    %289 = vector.shape_cast %288 : vector<2x1x96xf32> to vector<2x96xf32>
    %290 = arith.truncf %289 : vector<2x96xf32> to vector<2x96xbf16>
    %c4_252 = arith.constant 4 : index
    %c0_253 = arith.constant 0 : index
    %c0_254 = arith.constant 0 : index
    %291 = vector.load %arg9[%c4_252, %c0_253, %c0_254] : memref<8x96x128xbf16, #tpu.memory_space<vmem>>, vector<1x96x128xbf16>
    %292 = vector.shape_cast %291 : vector<1x96x128xbf16> to vector<96x128xbf16>
    %cst_255 = arith.constant dense<0.000000e+00> : vector<2x128xf32>
    %293 = tpu.matmul %290, %292, %cst_255 {dimension_numbers = #tpu.dot_dimension_numbers<[1], [0], [0], [1], [0, 0, 1, 1], [], []>} : vector<2x96xbf16>, vector<96x128xbf16>, vector<2x128xf32> -> vector<2x128xf32>
    %294 = arith.addf %287, %293 : vector<2x128xf32>
    %295 = vector.extract_strided_slice %258 {offsets = [0, 5, 0], sizes = [2, 1, 96], strides = [1, 1, 1]} : vector<2x8x96xf32> to vector<2x1x96xf32>
    %296 = vector.shape_cast %295 : vector<2x1x96xf32> to vector<2x96xf32>
    %297 = arith.truncf %296 : vector<2x96xf32> to vector<2x96xbf16>
    %c5 = arith.constant 5 : index
    %c0_256 = arith.constant 0 : index
    %c0_257 = arith.constant 0 : index
    %298 = vector.load %arg9[%c5, %c0_256, %c0_257] : memref<8x96x128xbf16, #tpu.memory_space<vmem>>, vector<1x96x128xbf16>
    %299 = vector.shape_cast %298 : vector<1x96x128xbf16> to vector<96x128xbf16>
    %cst_258 = arith.constant dense<0.000000e+00> : vector<2x128xf32>
    %300 = tpu.matmul %297, %299, %cst_258 {dimension_numbers = #tpu.dot_dimension_numbers<[1], [0], [0], [1], [0, 0, 1, 1], [], []>} : vector<2x96xbf16>, vector<96x128xbf16>, vector<2x128xf32> -> vector<2x128xf32>
    %301 = arith.addf %294, %300 : vector<2x128xf32>
    %302 = vector.extract_strided_slice %258 {offsets = [0, 6, 0], sizes = [2, 1, 96], strides = [1, 1, 1]} : vector<2x8x96xf32> to vector<2x1x96xf32>
    %303 = vector.shape_cast %302 : vector<2x1x96xf32> to vector<2x96xf32>
    %304 = arith.truncf %303 : vector<2x96xf32> to vector<2x96xbf16>
    %c6 = arith.constant 6 : index
    %c0_259 = arith.constant 0 : index
    %c0_260 = arith.constant 0 : index
    %305 = vector.load %arg9[%c6, %c0_259, %c0_260] : memref<8x96x128xbf16, #tpu.memory_space<vmem>>, vector<1x96x128xbf16>
    %306 = vector.shape_cast %305 : vector<1x96x128xbf16> to vector<96x128xbf16>
    %cst_261 = arith.constant dense<0.000000e+00> : vector<2x128xf32>
    %307 = tpu.matmul %304, %306, %cst_261 {dimension_numbers = #tpu.dot_dimension_numbers<[1], [0], [0], [1], [0, 0, 1, 1], [], []>} : vector<2x96xbf16>, vector<96x128xbf16>, vector<2x128xf32> -> vector<2x128xf32>
    %308 = arith.addf %301, %307 : vector<2x128xf32>
    %309 = vector.extract_strided_slice %258 {offsets = [0, 7, 0], sizes = [2, 1, 96], strides = [1, 1, 1]} : vector<2x8x96xf32> to vector<2x1x96xf32>
    %310 = vector.shape_cast %309 : vector<2x1x96xf32> to vector<2x96xf32>
    %311 = arith.truncf %310 : vector<2x96xf32> to vector<2x96xbf16>
    %c7 = arith.constant 7 : index
    %c0_262 = arith.constant 0 : index
    %c0_263 = arith.constant 0 : index
    %312 = vector.load %arg9[%c7, %c0_262, %c0_263] : memref<8x96x128xbf16, #tpu.memory_space<vmem>>, vector<1x96x128xbf16>
    %313 = vector.shape_cast %312 : vector<1x96x128xbf16> to vector<96x128xbf16>
    %cst_264 = arith.constant dense<0.000000e+00> : vector<2x128xf32>
    %314 = tpu.matmul %311, %313, %cst_264 {dimension_numbers = #tpu.dot_dimension_numbers<[1], [0], [0], [1], [0, 0, 1, 1], [], []>} : vector<2x96xbf16>, vector<96x128xbf16>, vector<2x128xf32> -> vector<2x128xf32>
    %315 = arith.addf %308, %314 : vector<2x128xf32>
    %c0_265 = arith.constant 0 : index
    %c0_266 = arith.constant 0 : index
    %316 = vector.load %arg10[%c0_265, %c0_266] : memref<1x128xf32, #tpu.memory_space<vmem>>, vector<1x128xf32>
    %317 = vector.broadcast %316 : vector<1x128xf32> to vector<2x128xf32>
    %318 = arith.addf %315, %317 : vector<2x128xf32>
    %c0_267 = arith.constant 0 : index
    %c0_268 = arith.constant 0 : index
    %319 = vector.load %arg11[%c0_267, %c0_268] : memref<2x128xf32, #tpu.memory_space<vmem>>, vector<2x128xf32>
    tpu.vector_store %arg11[%c0_267, %c0_268], %318 {strides = array<i32>} : memref<2x128xf32, #tpu.memory_space<vmem>>, vector<2x128xf32>,
    return
  }
}

</mosaic_0001>

<bundles_post_ra>
// kernel: lenet_forward.1
= control target key start
LH: loop header
LB: loop body
LE: loop exit
PB: predicated region body
PF: predicated region fallthrough
CT: control target
= control target key end

     0   :  { %vm184_vm0 = vcmask 1045504   ;;  %vm180_vm1 = vcmask 883712   ;;  %s8531_s0 = inlined_call_operand.vmem [shape: f32[4,2,9,108], index: 0, kind: input, shape index: {}]   ;;  %s8532_s1 = inlined_call_operand.vmem [shape: bf16[5,108,192], index: 1, kind: input, shape index: {}]   ;;  %s8533_s2 = inlined_call_operand.vmem [shape: f32[1,192], index: 2, kind: input, shape index: {}]   ;;  %s8534_s3 = inlined_call_operand.vmem [shape: bf16[5,240,96], index: 3, kind: input, shape index: {}]   ;;  %s8535_s4 = inlined_call_operand.vmem [shape: f32[1,96], index: 4, kind: input, shape index: {}]   ;;  %s8536_s5 = inlined_call_operand.vmem [shape: bf16[5,144,96], index: 5, kind: input, shape index: {}]   ;;  %s8537_s6 = inlined_call_operand.vmem [shape: f32[1,96], index: 6, kind: input, shape index: {}]   ;;  %s8538_s7 = inlined_call_operand.vmem [shape: bf16[5,144,96], index: 7, kind: input, shape index: {}]   ;;  %s8539_s8 = inlined_call_operand.vmem [shape: f32[1,96], index: 8, kind: input, shape index: {}]   ;;  %s8540_s9 = inlined_call_operand.vmem [shape: bf16[8,96,128], index: 9, kind: input, shape index: {}]   ;;  %s8541_s10 = inlined_call_operand.vmem [shape: f32[1,128], index: 10, kind: input, shape index: {}]   ;;  %s8542_s11 = inlined_call_operand.hbm [shape: f32[2,128], index: 11, kind: output, shape index: {}]  }
   0x1   :  { %v4400_v0 = vld [vmem:[%s8532_s1 + $0xd0] sm:$0xf]  ;;  %v6290_v1 = vld [vmem:[%s8532_s1 + $0xd4] sm:$0x30]  ;;  %v6289_v3 = vld [vmem:[%s8532_s1 + $0xd4] sm:$0xf] }
   0x2   :  { %v4401_v2 = vor.u32 %v6290_v1, %v4400_v0  ;;  %v4402_v4 = vld [vmem:[%s8532_s1 + $0xd8] sm:$0x30]  ;;  %v4458_v5 = vld [vmem:[%s8532_s1 + $0x60] sm:$0xf]  ;;  %v6276_v7 = vld [vmem:[%s8532_s1 + $0x64] sm:$0x30] }
   0x3   :  { %v4405_v6 = vor.u32 %v6289_v3, %v4402_v4  ;;  %v6275_v8 = vld [vmem:[%s8532_s1 + $0x64] sm:$0xf]  ;;  %v4460_v9 = vld [vmem:[%s8532_s1 + $0x68] sm:$0x30]  ;;  %v4459_v11 = vor.u32 %v6276_v7, %v4458_v5  ;;  %v4392_v13 = vld [vmem:[%s8532_s1 + $0xc0] sm:$0xf] }
   0x4   :  { %v186_v10 = vsel %vm184_vm0, %v4401_v2, 0  ;;  %v4463_v12 = vor.u32 %v6275_v8, %v4460_v9  ;;  %v6288_v14 = vld [vmem:[%s8532_s1 + $0xc4] sm:$0xf0]  ;;  %v6287_v17 = vld [vmem:[%s8532_s1 + $0xc4] sm:$0xf] }
   0x5   :  { %192 = vmatpush.bf16.msra.mxu0 %v186_v10  ;;  %v189_v15 = vsel %vm184_vm0, %v4405_v6, 0  ;;  %v4393_v16 = vor.u32 %v6288_v14, %v4392_v13  ;;  %v4394_v18 = vld [vmem:[%s8532_s1 + $0xc8] sm:$0xf0]  ;;  %v291_v19 = vsel %vm184_vm0, %v4459_v11, 0  ;;  %v4450_v22 = vld [vmem:[%s8532_s1 + $0x50] sm:$0xf] }
   0x6   :  { %206 = vmatpush.bf16.msra.mxu1 %v189_v15  ;;  %v294_v20 = vsel %vm184_vm0, %v4463_v12, 0  ;;  %v4397_v21 = vor.u32 %v6287_v17, %v4394_v18  ;;  %v6274_v23 = vld [vmem:[%s8532_s1 + $0x54] sm:$0xf0]  ;;  %297 = vmatpush.bf16.msra.mxu2 %v291_v19  ;;  %v6273_v25 = vld [vmem:[%s8532_s1 + $0x54] sm:$0xf] }
   0x7   :  { %311 = vmatpush.bf16.msra.mxu3 %v294_v20  ;;  %v4451_v24 = vor.u32 %v6274_v23, %v4450_v22  ;;  %v4452_v26 = vld [vmem:[%s8532_s1 + $0x58] sm:$0xf0]  ;;  %v4384_v27 = vld [vmem:[%s8532_s1 + $0xb0] sm:$0xf]  ;;  %v6286_v29 = vld [vmem:[%s8532_s1 + $0xb4] sm:$0xf0] }
   0x8   :  { %v4455_v28 = vor.u32 %v6273_v25, %v4452_v26  ;;  %v6285_v30 = vld [vmem:[%s8532_s1 + $0xb4] sm:$0xf]  ;;  %v4386_v31 = vld [vmem:[%s8532_s1 + $0xb8] sm:$0xf0]  ;;  %v4385_v32 = vor.u32 %v6286_v29, %v4384_v27  ;;  %v4442_v33 = vld [vmem:[%s8532_s1 + $0x40] sm:$0xf] }
   0x9   :  { %193 = vmatpush.bf16.msra.mxu0 %v4393_v16  ;;  %v6272_v34 = vld [vmem:[%s8532_s1 + $0x44] sm:$0xf0]  ;;  %v6271_v35 = vld [vmem:[%s8532_s1 + $0x44] sm:$0xf]  ;;  %v4389_v36 = vor.u32 %v6285_v30, %v4386_v31  ;;  %v4444_v37 = vld [vmem:[%s8532_s1 + $0x48] sm:$0xf0] }
   0xa   :  { %207 = vmatpush.bf16.msra.mxu1 %v4397_v21  ;;  %v4376_v38 = vld [vmem:[%s8532_s1 + $0xa0] sm:$0xf]  ;;  %v6284_v39 = vld [vmem:[%s8532_s1 + $0xa4] sm:$0xf0]  ;;  %298 = vmatpush.bf16.msra.mxu2 %v4451_v24  ;;  %v4443_v40 = vor.u32 %v6272_v34, %v4442_v33  ;;  %v4447_v41 = vor.u32 %v6271_v35, %v4444_v37  ;;  %v6283_v42 = vld [vmem:[%s8532_s1 + $0xa4] sm:$0xf] }
   0xb   :  { %312 = vmatpush.bf16.msra.mxu3 %v4455_v28  ;;  %v4378_v43 = vld [vmem:[%s8532_s1 + $0xa8] sm:$0xf0]  ;;  %v4434_v44 = vld [vmem:[%s8532_s1 + $0x30] sm:$0xf]  ;;  %v6270_v45 = vld [vmem:[%s8532_s1 + $0x34] sm:$0xf0]  ;;  %v4377_v48 = vor.u32 %v6284_v39, %v4376_v38 }
   0xc   :  { %v6269_v46 = vld [vmem:[%s8532_s1 + $0x34] sm:$0xf]  ;;  %v4436_v47 = vld [vmem:[%s8532_s1 + $0x38] sm:$0xf0]  ;;  %v4381_v49 = vor.u32 %v6283_v42, %v4378_v43  ;;  %v4368_v50 = vld [vmem:[%s8532_s1 + $0x90] sm:$0xf]  ;;  %v4435_v52 = vor.u32 %v6270_v45, %v4434_v44 }
   0xd   :  { %194 = vmatpush.bf16.msra.mxu0 %v4385_v32  ;;  %v6282_v51 = vld [vmem:[%s8532_s1 + $0x94] sm:$0xf0]  ;;  %v4439_v53 = vor.u32 %v6269_v46, %v4436_v47  ;;  %v6281_v54 = vld [vmem:[%s8532_s1 + $0x94] sm:$0xf]  ;;  %v4370_v55 = vld [vmem:[%s8532_s1 + $0x98] sm:$0xf0] }
   0xe   :  { %208 = vmatpush.bf16.msra.mxu1 %v4389_v36  ;;  %299 = vmatpush.bf16.msra.mxu2 %v4443_v40  ;;  %v4426_v56 = vld [vmem:[%s8532_s1 + $0x20] sm:$0xf]  ;;  %v6268_v57 = vld [vmem:[%s8532_s1 + $0x24] sm:$0xf0]  ;;  %v6267_v58 = vld [vmem:[%s8532_s1 + $0x24] sm:$0xf]  ;;  %v4369_v60 = vor.u32 %v6282_v51, %v4368_v50  ;;  %v4373_v62 = vor.u32 %v6281_v54, %v4370_v55 }
   0xf   :  { %313 = vmatpush.bf16.msra.mxu3 %v4447_v41  ;;  %v4428_v59 = vld [vmem:[%s8532_s1 + $0x28] sm:$0xf0]  ;;  %v4360_v61 = vld [vmem:[%s8532_s1 + $0x80] sm:$0xf]  ;;  %v6280_v63 = vld [vmem:[%s8532_s1 + $0x84] sm:$0xf0]  ;;  %v4427_v2 = vor.u32 %v6268_v57, %v4426_v56 }
  0x10   :  { %v6279_v0 = vld [vmem:[%s8532_s1 + $0x84] sm:$0xf]  ;;  %v4362_v1 = vld [vmem:[%s8532_s1 + $0x88] sm:$0xf0]  ;;  %v4431_v3 = vor.u32 %v6267_v58, %v4428_v59  ;;  %v4418_v4 = vld [vmem:[%s8532_s1 + $0x10] sm:$0xf]  ;;  %v4361_v10 = vor.u32 %v6280_v63, %v4360_v61 }
  0x11   :  { %195 = vmatpush.bf16.msra.mxu0 %v4377_v48  ;;  %v6266_v5 = vld [vmem:[%s8532_s1 + $0x14] sm:$0xf0]  ;;  %v6265_v6 = vld [vmem:[%s8532_s1 + $0x14] sm:$0xf]  ;;  %v4420_v7 = vld [vmem:[%s8532_s1 + $0x18] sm:$0xf0]  ;;  %v4365_v16 = vor.u32 %v6279_v0, %v4362_v1 }
  0x12   :  { %209 = vmatpush.bf16.msra.mxu1 %v4381_v49  ;;  %300 = vmatpush.bf16.msra.mxu2 %v4435_v52  ;;  %v4352_v8 = vld [vmem:[%s8532_s1 + $0x70] sm:$0xf]  ;;  %v6278_v9 = vld [vmem:[%s8532_s1 + $0x74] sm:$0xf0]  ;;  %v6277_v11 = vld [vmem:[%s8532_s1 + $0x74] sm:$0xf]  ;;  %v4419_v20 = vor.u32 %v6266_v5, %v4418_v4  ;;  %v4423_v21 = vor.u32 %v6265_v6, %v4420_v7 }
  0x13   :  { %314 = vmatpush.bf16.msra.mxu3 %v4439_v53  ;;  %v4354_v12 = vld [vmem:[%s8532_s1 + $0x78] sm:$0xf0]  ;;  %v4532_v13 = vld [vmem:[%s8532_s1 + $0x140] sm:$0xf]  ;;  %v6304_v14 = vld [vmem:[%s8532_s1 + $0x144] sm:$0x30]  ;;  %v4353_v31 = vor.u32 %v6278_v9, %v4352_v8 }
  0x14   :  { %v6303_v15 = vld [vmem:[%s8532_s1 + $0x144] sm:$0xf]  ;;  %v4534_v17 = vld [vmem:[%s8532_s1 + $0x148] sm:$0x30]  ;;  %v4606_v18 = vld [vmem:[%s8532_s1 + $0x1b0] sm:$0xf]  ;;  %v4533_v23 = vor.u32 %v6304_v14, %v4532_v13  ;;  %v4357_v32 = vor.u32 %v6277_v11, %v4354_v12 }
  0x15   :  { %196 = vmatpush.bf16.msra.mxu0 %v4369_v60  ;;  %v6318_v19 = vld [vmem:[%s8532_s1 + $0x1b4] sm:$0x30]  ;;  %v4410_v22 = vld [vmem:[%s8532_s1] sm:$0xf]  ;;  %v6317_v24 = vld [vmem:[%s8532_s1 + $0x1b4] sm:$0xf]  ;;  %v4537_v29 = vor.u32 %v6303_v15, %v4534_v17 }
  0x16   :  { %210 = vmatpush.bf16.msra.mxu1 %v4373_v62  ;;  %301 = vmatpush.bf16.msra.mxu2 %v4427_v2  ;;  %v4608_v25 = vld [vmem:[%s8532_s1 + $0x1b8] sm:$0x30]  ;;  %v6264_v26 = vld [vmem:[%s8532_s1 + $0x4] sm:$0xf0]  ;;  %v6263_v27 = vld [vmem:[%s8532_s1 + $0x4] sm:$0xf]  ;;  %v4607_v30 = vor.u32 %v6318_v19, %v4606_v18 }
  0x17   :  { %315 = vmatpush.bf16.msra.mxu3 %v4431_v3  ;;  %v4412_v28 = vld [vmem:[%s8532_s1 + $0x8] sm:$0xf0]  ;;  %v4611_v33 = vor.u32 %v6317_v24, %v4608_v25  ;;  %v4334_v34 = vld [vmem:[%s8531_s0 + $0x20] sm:$0xff]  ;;  %v4335_v35 = vld [vmem:[%s8531_s0 + $0x30] sm:$0xff]  ;;  %v4411_v36 = vor.u32 %v6264_v26, %v4410_v22  ;;  %v415_v38 = vsel %vm184_vm0, %v4533_v23, 0  ;;  %v418_v41 = vsel %vm184_vm0, %v4537_v29, 0 }
  0x18   :  { %v4415_v37 = vor.u32 %v6263_v27, %v4412_v28  ;;  %v4524_v39 = vld [vmem:[%s8532_s1 + $0x130] sm:$0xf]  ;;  %v6302_v40 = vld [vmem:[%s8532_s1 + $0x134] sm:$0xf0]  ;;  %v543_v42 = vsel %vm184_vm0, %v4607_v30, 0  ;;  %v96_v48 = vpack.c.bf16 %v4335_v35, %v4334_v34  ;;  %v76_v52 = vld [vmem:[%s8531_s0] sm:$0xff] }
  0x19   :  { %197 = vmatpush.bf16.msra.mxu0 %v4361_v10  ;;  %v6301_v43 = vld [vmem:[%s8532_s1 + $0x134] sm:$0xf]  ;;  %v4526_v44 = vld [vmem:[%s8532_s1 + $0x138] sm:$0xf0]  ;;  %v4598_v45 = vld [vmem:[%s8532_s1 + $0x1a0] sm:$0xf]  ;;  %v4525_v50 = vor.u32 %v6302_v40, %v4524_v39 }
  0x1a   :  { %211 = vmatpush.bf16.msra.mxu1 %v4365_v16  ;;  %302 = vmatpush.bf16.msra.mxu2 %v4419_v20  ;;  %v6316_v46 = vld [vmem:[%s8532_s1 + $0x1a4] sm:$0xf0]  ;;  %v6315_v47 = vld [vmem:[%s8532_s1 + $0x1a4] sm:$0xf]  ;;  %v546_v49 = vsel %vm184_vm0, %v4611_v33, 0  ;;  %v77_v53 = vld [vmem:[%s8531_s0 + $0x10] sm:$0xff]  ;;  %v4529_v57 = vor.u32 %v6301_v43, %v4526_v44 }
  0x1b   :  { %316 = vmatpush.bf16.msra.mxu3 %v4423_v21  ;;  %v4600_v51 = vld [vmem:[%s8532_s1 + $0x1a8] sm:$0xf0]  ;;  %v4516_v54 = vld [vmem:[%s8532_s1 + $0x120] sm:$0xf]  ;;  %v6300_v55 = vld [vmem:[%s8532_s1 + $0x124] sm:$0xf0]  ;;  %v78_v56 = vpack.c.bf16 %v77_v53, %v76_v52  ;;  %v4599_v58 = vor.u32 %v6316_v46, %v4598_v45 }
  0x1c   :  { %v6299_v59 = vld [vmem:[%s8532_s1 + $0x124] sm:$0xf]  ;;  %v4603_v60 = vor.u32 %v6315_v47, %v4600_v51  ;;  %v4518_v61 = vld [vmem:[%s8532_s1 + $0x128] sm:$0xf0]  ;;  %v4590_v62 = vld [vmem:[%s8532_s1 + $0x190] sm:$0xf]  ;;  %v4517_v0 = vor.u32 %v6300_v55, %v4516_v54 }
  0x1d   :  { %198 = vmatpush.bf16.msra.mxu0 %v4353_v31  ;;  %v6314_v63 = vld [vmem:[%s8532_s1 + $0x194] sm:$0xf0]  ;;  %v6313_v1 = vld [vmem:[%s8532_s1 + $0x194] sm:$0xf]  ;;  %v4592_v2 = vld [vmem:[%s8532_s1 + $0x198] sm:$0xf0]  ;;  %v4521_v5 = vor.u32 %v6299_v59, %v4518_v61 }
  0x1e   :  { %212 = vmatpush.bf16.msra.mxu1 %v4357_v32  ;;  %303 = vmatpush.bf16.msra.mxu2 %v4411_v36  ;;  %v4508_v3 = vld [vmem:[%s8532_s1 + $0x110] sm:$0xf]  ;;  %v6298_v4 = vld [vmem:[%s8532_s1 + $0x114] sm:$0xf0]  ;;  %v4591_v6 = vor.u32 %v6314_v63, %v4590_v62  ;;  %v6297_v7 = vld [vmem:[%s8532_s1 + $0x114] sm:$0xf]  ;;  %v4595_v8 = vor.u32 %v6313_v1, %v4592_v2 }
  0x1f   :  { %317 = vmatpush.bf16.msra.mxu3 %v4415_v37  ;;  %v4510_v9 = vld [vmem:[%s8532_s1 + $0x118] sm:$0xf0]  ;;  %v4582_v10 = vld [vmem:[%s8532_s1 + $0x180] sm:$0xf]  ;;  %v6312_v11 = vld [vmem:[%s8532_s1 + $0x184] sm:$0xf0]  ;;  %v4509_v12 = vor.u32 %v6298_v4, %v4508_v3 }
  0x20   :  { %4406 = vmatmul.msk.bf16.vlgmr.msra.gmra.mxu0 %vm180_vm1, %v96_v48  ;;  %v6311_v13 = vld [vmem:[%s8532_s1 + $0x184] sm:$0xf]  ;;  %v4584_v14 = vld [vmem:[%s8532_s1 + $0x188] sm:$0xf0]  ;;  %v4500_v15 = vld [vmem:[%s8532_s1 + $0x100] sm:$0xf]  ;;  %v4513_v17 = vor.u32 %v6297_v7, %v4510_v9  ;;  %v4583_v18 = vor.u32 %v6312_v11, %v4582_v10 }
  0x21   :  { %421 = vmatpush.bf16.msrb.mxu0 %v415_v38  ;;  %4407 = vmatmul.msk.bf16.vlgmr.msra.gmra.mxu1 %vm180_vm1, %v96_v48  ;;  %v6296_v16 = vld [vmem:[%s8532_s1 + $0x104] sm:$0xf0]  ;;  %v6295_v19 = vld [vmem:[%s8532_s1 + $0x104] sm:$0xf]  ;;  %v4502_v20 = vld [vmem:[%s8532_s1 + $0x108] sm:$0xf0]  ;;  %v4587_v22 = vor.u32 %v6311_v13, %v4584_v14 }
  0x22   :  { %435 = vmatpush.bf16.msrb.mxu1 %v418_v41  ;;  %549 = vmatpush.bf16.msrb.mxu2 %v543_v42  ;;  %v4574_v21 = vld [vmem:[%s8532_s1 + $0x170] sm:$0xf]  ;;  %v6310_v23 = vld [vmem:[%s8532_s1 + $0x174] sm:$0xf0]  ;;  %v6309_v24 = vld [vmem:[%s8532_s1 + $0x174] sm:$0xf]  ;;  %v4501_v26 = vor.u32 %v6296_v16, %v4500_v15  ;;  %v4505_v33 = vor.u32 %v6295_v19, %v4502_v20 }
  0x23   :  { %563 = vmatpush.bf16.msrb.mxu3 %v546_v49  ;;  %4464 = vmatmul.msk.bf16.vlgmr.msra.gmra.mxu2 %vm180_vm1, %v78_v56  ;;  %v4576_v25 = vld [vmem:[%s8532_s1 + $0x178] sm:$0xf0]  ;;  %v4492_v27 = vld [vmem:[%s8532_s1 + $0xf0] sm:$0xf]  ;;  %v6294_v28 = vld [vmem:[%s8532_s1 + $0xf4] sm:$0xf0]  ;;  %v4575_v34 = vor.u32 %v6310_v23, %v4574_v21 }
  0x24   :  { %4465 = vmatmul.msk.bf16.vlgmr.msra.gmra.mxu3 %vm180_vm1, %v78_v56  ;;  %v6293_v29 = vld [vmem:[%s8532_s1 + $0xf4] sm:$0xf]  ;;  %v4494_v30 = vld [vmem:[%s8532_s1 + $0xf8] sm:$0xf0]  ;;  %v4566_v31 = vld [vmem:[%s8532_s1 + $0x160] sm:$0xf]  ;;  %v4579_v39 = vor.u32 %v6309_v24, %v4576_v25  ;;  %v4493_v43 = vor.u32 %v6294_v28, %v4492_v27 }
  0x25   :  { %422 = vmatpush.bf16.msrb.mxu0 %v4525_v50  ;;  %v6308_v32 = vld [vmem:[%s8532_s1 + $0x164] sm:$0xf0]  ;;  %v6307_v35 = vld [vmem:[%s8532_s1 + $0x164] sm:$0xf]  ;;  %v4568_v36 = vld [vmem:[%s8532_s1 + $0x168] sm:$0xf0]  ;;  %v4497_v47 = vor.u32 %v6293_v29, %v4494_v30 }
  0x26   :  { %436 = vmatpush.bf16.msrb.mxu1 %v4529_v57  ;;  %550 = vmatpush.bf16.msrb.mxu2 %v4599_v58  ;;  %v4678_v37 = vld [vmem:[%s8532_s1 + $0x220] sm:$0xf]  ;;  %v6332_v38 = vld [vmem:[%s8532_s1 + $0x224] sm:$0x30]  ;;  %v6331_v40 = vld [vmem:[%s8532_s1 + $0x224] sm:$0xf]  ;;  %v4567_v50 = vor.u32 %v6308_v32, %v4566_v31  ;;  %v4571_v54 = vor.u32 %v6307_v35, %v4568_v36 }
  0x27   :  { %564 = vmatpush.bf16.msrb.mxu3 %v4603_v60  ;;  %v4680_v41 = vld [vmem:[%s8532_s1 + $0x228] sm:$0x30]  ;;  %v4754_v42 = vld [vmem:[%s8532_s1 + $0xd0] sm:$0xf]  ;;  %v6360_v44 = vld [vmem:[%s8532_s1 + $0xd4] sm:$0x30]  ;;  %v4679_v52 = vor.u32 %v6332_v38, %v4678_v37 }
  0x28   :  { %v6359_v45 = vld [vmem:[%s8532_s1 + $0xd4] sm:$0xf]  ;;  %v4756_v46 = vld [vmem:[%s8532_s1 + $0xd8] sm:$0x30]  ;;  %v4484_v48 = vld [vmem:[%s8532_s1 + $0xe0] sm:$0xf]  ;;  %v4683_v53 = vor.u32 %v6331_v40, %v4680_v41  ;;  %v4755_v58 = vor.u32 %v6360_v44, %v4754_v42 }
  0x29   :  { %423 = vmatpush.bf16.msrb.mxu0 %v4517_v0  ;;  %v6292_v49 = vld [vmem:[%s8532_s1 + $0xe4] sm:$0xf0]  ;;  %v6291_v51 = vld [vmem:[%s8532_s1 + $0xe4] sm:$0xf]  ;;  %v4486_v55 = vld [vmem:[%s8532_s1 + $0xe8] sm:$0xf0]  ;;  %v4759_v59 = vor.u32 %v6359_v45, %v4756_v46 }
  0x2a   :  { %437 = vmatpush.bf16.msrb.mxu1 %v4521_v5  ;;  %551 = vmatpush.bf16.msrb.mxu2 %v4591_v6  ;;  %v4558_v56 = vld [vmem:[%s8532_s1 + $0x150] sm:$0xf]  ;;  %v6306_v57 = vld [vmem:[%s8532_s1 + $0x154] sm:$0xf0]  ;;  %v4485_v60 = vor.u32 %v6292_v49, %v4484_v48  ;;  %v6305_v61 = vld [vmem:[%s8532_s1 + $0x154] sm:$0xf]  ;;  %v4489_v0 = vor.u32 %v6291_v51, %v4486_v55 }
  0x2b   :  { %565 = vmatpush.bf16.msrb.mxu3 %v4595_v8  ;;  %v4560_v62 = vld [vmem:[%s8532_s1 + $0x158] sm:$0xf0]  ;;  %v4466_v63 = vld [vmem:[%s8531_s0 + $0x40] sm:$0xff]  ;;  %v4559_v1 = vor.u32 %v6306_v57, %v4558_v56  ;;  %v670_v2 = vsel %vm184_vm0, %v4679_v52, 0  ;;  %v673_v3 = vsel %vm184_vm0, %v4683_v53, 0  ;;  %v4467_v4 = vld [vmem:[%s8531_s0 + $0x50] sm:$0xff] }
  0x2c   :  { %v4540_v5 = vld [vmem:[%s8531_s0 + $0x60] sm:$0xff]  ;;  %v4541_v6 = vld [vmem:[%s8531_s0 + $0x70] sm:$0xff]  ;;  %v4563_v7 = vor.u32 %v6305_v61, %v4560_v62  ;;  %v878_v8 = vsel %vm184_vm0, %v4755_v58, 0  ;;  %v881_v9 = vsel %vm184_vm0, %v4759_v59, 0  ;;  %v6330_v11 = vld [vmem:[%s8532_s1 + $0x214] sm:$0xf0]  ;;  %v7183_v15 = vpack.c.bf16 %v4467_v4, %v4466_v63 }
  0x2d   :  { %424 = vmatpush.bf16.msrb.mxu0 %v4509_v12  ;;  %v4670_v10 = vld [vmem:[%s8532_s1 + $0x210] sm:$0xf]  ;;  %v6329_v12 = vld [vmem:[%s8532_s1 + $0x214] sm:$0xf]  ;;  %v4672_v13 = vld [vmem:[%s8532_s1 + $0x218] sm:$0xf0]  ;;  %v7194_v19 = vpack.c.bf16 %v4541_v6, %v4540_v5 }
  0x2e   :  { %438 = vmatpush.bf16.msrb.mxu1 %v4513_v17  ;;  %552 = vmatpush.bf16.msrb.mxu2 %v4583_v18  ;;  %v4746_v14 = vld [vmem:[%s8532_s1 + $0xc0] sm:$0xf]  ;;  %v6358_v16 = vld [vmem:[%s8532_s1 + $0xc4] sm:$0xf0]  ;;  %v6357_v17 = vld [vmem:[%s8532_s1 + $0xc4] sm:$0xf]  ;;  %v4671_v20 = vor.u32 %v6330_v11, %v4670_v10  ;;  %v4675_v21 = vor.u32 %v6329_v12, %v4672_v13 }
  0x2f   :  { %566 = vmatpush.bf16.msrb.mxu3 %v4587_v22  ;;  %v4748_v18 = vld [vmem:[%s8532_s1 + $0xc8] sm:$0xf0]  ;;  %v4662_v22 = vld [vmem:[%s8532_s1 + $0x200] sm:$0xf]  ;;  %v6328_v23 = vld [vmem:[%s8532_s1 + $0x204] sm:$0xf0]  ;;  %v4747_v24 = vor.u32 %v6358_v16, %v4746_v14 }
  0x30   :  { %v4751_v25 = vor.u32 %v6357_v17, %v4748_v18  ;;  %v4664_v27 = vld [vmem:[%s8532_s1 + $0x208] sm:$0xf0]  ;;  %v4738_v28 = vld [vmem:[%s8532_s1 + $0xb0] sm:$0xf]  ;;  %v6356_v29 = vld [vmem:[%s8532_s1 + $0xb4] sm:$0xf0]  ;;  %v4663_v32 = vor.u32 %v6328_v23, %v4662_v22 }
  0x31   :  { %425 = vmatpush.bf16.msrb.mxu0 %v4501_v26  ;;  %v6327_v26 = vld [vmem:[%s8532_s1 + $0x204] sm:$0xf]  ;;  %v6355_v30 = vld [vmem:[%s8532_s1 + $0xb4] sm:$0xf]  ;;  %v4740_v31 = vld [vmem:[%s8532_s1 + $0xb8] sm:$0xf0]  ;;  %v4739_v36 = vor.u32 %v6356_v29, %v4738_v28 }
  0x32   :  { %439 = vmatpush.bf16.msrb.mxu1 %v4505_v33  ;;  %553 = vmatpush.bf16.msrb.mxu2 %v4575_v34  ;;  %v4667_v33 = vor.u32 %v6327_v26, %v4664_v27  ;;  %v4654_v34 = vld [vmem:[%s8532_s1 + $0x1f0] sm:$0xf]  ;;  %v6326_v35 = vld [vmem:[%s8532_s1 + $0x1f4] sm:$0xf0]  ;;  %v4743_v37 = vor.u32 %v6355_v30, %v4740_v31  ;;  %v6325_v38 = vld [vmem:[%s8532_s1 + $0x1f4] sm:$0xf] }
  0x33   :  { %567 = vmatpush.bf16.msrb.mxu3 %v4579_v39  ;;  %v4656_v39 = vld [vmem:[%s8532_s1 + $0x1f8] sm:$0xf0]  ;;  %v4730_v40 = vld [vmem:[%s8532_s1 + $0xa0] sm:$0xf]  ;;  %v6354_v41 = vld [vmem:[%s8532_s1 + $0xa4] sm:$0xf0]  ;;  %v4655_v44 = vor.u32 %v6326_v35, %v4654_v34 }
  0x34   :  { %v6353_v42 = vld [vmem:[%s8532_s1 + $0xa4] sm:$0xf]  ;;  %v4659_v45 = vor.u32 %v6325_v38, %v4656_v39  ;;  %v4646_v46 = vld [vmem:[%s8532_s1 + $0x1e0] sm:$0xf]  ;;  %v4731_v48 = vor.u32 %v6354_v41, %v4730_v40  ;;  %v4648_v51 = vld [vmem:[%s8532_s1 + $0x1e8] sm:$0xf0] }
  0x35   :  { %426 = vmatpush.bf16.msrb.mxu0 %v4493_v43  ;;  %v4732_v43 = vld [vmem:[%s8532_s1 + $0xa8] sm:$0xf0]  ;;  %v4722_v52 = vld [vmem:[%s8532_s1 + $0x90] sm:$0xf]  ;;  %v6352_v53 = vld [vmem:[%s8532_s1 + $0x94] sm:$0xf0] }
  0x36   :  { %440 = vmatpush.bf16.msrb.mxu1 %v4497_v47  ;;  %554 = vmatpush.bf16.msrb.mxu2 %v4567_v50  ;;  %v6324_v47 = vld [vmem:[%s8532_s1 + $0x1e4] sm:$0xf0]  ;;  %v4735_v49 = vor.u32 %v6353_v42, %v4732_v43  ;;  %v6323_v50 = vld [vmem:[%s8532_s1 + $0x1e4] sm:$0xf]  ;;  %v4724_v55 = vld [vmem:[%s8532_s1 + $0x98] sm:$0xf0] }
  0x37   :  { %568 = vmatpush.bf16.msrb.mxu3 %v4571_v54  ;;  %v6351_v54 = vld [vmem:[%s8532_s1 + $0x94] sm:$0xf]  ;;  %v4638_v56 = vld [vmem:[%s8532_s1 + $0x1d0] sm:$0xf]  ;;  %v6322_v57 = vld [vmem:[%s8532_s1 + $0x1d4] sm:$0xf0]  ;;  %v4647_v59 = vor.u32 %v6324_v47, %v4646_v46 }
  0x38   :  { %v6321_v58 = vld [vmem:[%s8532_s1 + $0x1d4] sm:$0xf]  ;;  %v4640_v61 = vld [vmem:[%s8532_s1 + $0x1d8] sm:$0xf0]  ;;  %v4714_v62 = vld [vmem:[%s8532_s1 + $0x80] sm:$0xf]  ;;  %v4639_v11 = vor.u32 %v6322_v57, %v4638_v56 }
  0x39   :  { %427 = vmatpush.bf16.msrb.mxu0 %v4485_v60  ;;  %v4651_v60 = vor.u32 %v6323_v50, %v4648_v51  ;;  %v6350_v63 = vld [vmem:[%s8532_s1 + $0x84] sm:$0xf0]  ;;  %v4812_v4 = vld [vmem:[%s8532_s1 + $0x60] sm:$0xf]  ;;  %v6345_v6 = vld [vmem:[%s8532_s1 + $0x64] sm:$0xf]  ;;  %v4643_v12 = vor.u32 %v6321_v58, %v4640_v61 }
  0x3a   :  { %441 = vmatpush.bf16.msrb.mxu1 %v4489_v0  ;;  %555 = vmatpush.bf16.msrb.mxu2 %v4559_v1  ;;  %v4723_v0 = vor.u32 %v6352_v53, %v4722_v52  ;;  %v4727_v1 = vor.u32 %v6351_v54, %v4724_v55  ;;  %v6346_v5 = vld [vmem:[%s8532_s1 + $0x64] sm:$0x30]  ;;  %v4884_v10 = vld [vmem:[%s8532_s1 + $0x140] sm:$0xf]  ;;  %v4715_v13 = vor.u32 %v6350_v63, %v4714_v62  ;;  %v6373_v16 = vld [vmem:[%s8532_s1 + $0x144] sm:$0xf] }
  0x3b   :  { %569 = vmatpush.bf16.msrb.mxu3 %v4563_v7  ;;  %v4814_v7 = vld [vmem:[%s8532_s1 + $0x68] sm:$0x30]  ;;  %v6374_v14 = vld [vmem:[%s8532_s1 + $0x144] sm:$0x30]  ;;  %v4706_v22 = vld [vmem:[%s8532_s1 + $0x70] sm:$0xf]  ;;  %v4813_v23 = vor.u32 %v6346_v5, %v4812_v4 }
  0x3c   :  { %4538 = vmatmul.msk.bf16.vlgmr.msrb.gmra.mxu0 %vm180_vm1, %v7183_v15  ;;  %v4886_v17 = vld [vmem:[%s8532_s1 + $0x148] sm:$0x30]  ;;  %v6347_v26 = vld [vmem:[%s8532_s1 + $0x74] sm:$0xf]  ;;  %v4708_v27 = vld [vmem:[%s8532_s1 + $0x78] sm:$0xf0]  ;;  %v4885_v28 = vor.u32 %v6374_v14, %v4884_v10 }
  0x3d   :  { %676 = vmatpush.bf16.msra.mxu0 %v670_v2  ;;  %4539 = vmatmul.msk.bf16.vlgmr.msrb.gmra.mxu1 %vm180_vm1, %v7183_v15  ;;  %v6349_v2 = vld [vmem:[%s8532_s1 + $0x84] sm:$0xf]  ;;  %v4889_v29 = vor.u32 %v6373_v16, %v4886_v17  ;;  %v983_v34 = vsel %vm184_vm0, %v4813_v23, 0  ;;  %v4804_v38 = vld [vmem:[%s8532_s1 + $0x50] sm:$0xf] }
  0x3e   :  { %690 = vmatpush.bf16.msra.mxu1 %v673_v3  ;;  %884 = vmatpush.bf16.msra.mxu2 %v878_v8  ;;  %v4716_v3 = vld [vmem:[%s8532_s1 + $0x88] sm:$0xf0]  ;;  %v4630_v8 = vld [vmem:[%s8532_s1 + $0x1c0] sm:$0xf]  ;;  %v6344_v39 = vld [vmem:[%s8532_s1 + $0x54] sm:$0xf0] }
  0x3f   :  { %898 = vmatpush.bf16.msra.mxu3 %v881_v9  ;;  %4612 = vmatmul.msk.bf16.vlgmr.msrb.gmra.mxu2 %vm180_vm1, %v7194_v19  ;;  %v6320_v9 = vld [vmem:[%s8532_s1 + $0x1c4] sm:$0xf0]  ;;  %v4719_v18 = vor.u32 %v6349_v2, %v4716_v3  ;;  %v6343_v40 = vld [vmem:[%s8532_s1 + $0x54] sm:$0xf]  ;;  %v1105_v41 = vsel %vm184_vm0, %v4885_v28, 0  ;;  %v1108_v42 = vsel %vm184_vm0, %v4889_v29, 0 }
  0x40   :  { %4613 = vmatmul.msk.bf16.vlgmr.msrb.gmra.mxu3 %vm180_vm1, %v7194_v19  ;;  %v4631_v30 = vor.u32 %v6320_v9, %v4630_v8  ;;  %v4806_v43 = vld [vmem:[%s8532_s1 + $0x58] sm:$0xf0]  ;;  %v6372_v46 = vld [vmem:[%s8532_s1 + $0x134] sm:$0xf0]  ;;  %v6371_v47 = vld [vmem:[%s8532_s1 + $0x134] sm:$0xf] }
  0x41   :  { %677 = vmatpush.bf16.msra.mxu0 %v4671_v20  ;;  %v6319_v20 = vld [vmem:[%s8532_s1 + $0x1c4] sm:$0xf]  ;;  %v4809_v50 = vor.u32 %v6343_v40, %v4806_v43  ;;  %v4796_v51 = vld [vmem:[%s8532_s1 + $0x40] sm:$0xf]  ;;  %v6342_v52 = vld [vmem:[%s8532_s1 + $0x44] sm:$0xf0] }
  0x42   :  { %691 = vmatpush.bf16.msra.mxu1 %v4675_v21  ;;  %885 = vmatpush.bf16.msra.mxu2 %v4747_v24  ;;  %v4632_v21 = vld [vmem:[%s8532_s1 + $0x1c8] sm:$0xf0]  ;;  %v4817_v24 = vor.u32 %v6345_v6, %v4814_v7  ;;  %v6341_v55 = vld [vmem:[%s8532_s1 + $0x44] sm:$0xf]  ;;  %v4868_v57 = vld [vmem:[%s8532_s1 + $0x120] sm:$0xf]  ;;  %v4797_v61 = vor.u32 %v6342_v52, %v4796_v51 }
  0x43   :  { %899 = vmatpush.bf16.msra.mxu3 %v4751_v25  ;;  %v6348_v25 = vld [vmem:[%s8532_s1 + $0x74] sm:$0xf0]  ;;  %v4635_v31 = vor.u32 %v6319_v20, %v4632_v21  ;;  %v4798_v56 = vld [vmem:[%s8532_s1 + $0x48] sm:$0xf0]  ;;  %v6370_v58 = vld [vmem:[%s8532_s1 + $0x124] sm:$0xf0] }
  0x44   :  { %v986_v35 = vsel %vm184_vm0, %v4817_v24, 0  ;;  %v4801_v62 = vor.u32 %v6341_v55, %v4798_v56  ;;  %v4788_v63 = vld [vmem:[%s8532_s1 + $0x30] sm:$0xf]  ;;  %v4790_v3 = vld [vmem:[%s8532_s1 + $0x38] sm:$0xf0] }
  0x45   :  { %678 = vmatpush.bf16.msra.mxu0 %v4663_v32  ;;  %v4707_v32 = vor.u32 %v6348_v25, %v4706_v22  ;;  %v4860_v4 = vld [vmem:[%s8532_s1 + $0x110] sm:$0xf]  ;;  %v6368_v5 = vld [vmem:[%s8532_s1 + $0x114] sm:$0xf0]  ;;  %v6367_v6 = vld [vmem:[%s8532_s1 + $0x114] sm:$0xf] }
  0x46   :  { %692 = vmatpush.bf16.msra.mxu1 %v4667_v33  ;;  %886 = vmatpush.bf16.msra.mxu2 %v4739_v36  ;;  %v4711_v33 = vor.u32 %v6347_v26, %v4708_v27  ;;  %v580_v36 = vld [vmem:[%s8531_s0 + $0x1] sm:$0xff]  ;;  %v4862_v7 = vld [vmem:[%s8532_s1 + $0x118] sm:$0xf0]  ;;  %v4782_v16 = vld [vmem:[%s8532_s1 + $0x28] sm:$0xf0] }
  0x47   :  { %900 = vmatpush.bf16.msra.mxu3 %v4743_v37  ;;  %v581_v37 = vld [vmem:[%s8531_s0 + $0x11] sm:$0xff]  ;;  %v4780_v10 = vld [vmem:[%s8532_s1 + $0x20] sm:$0xf]  ;;  %v6337_v14 = vld [vmem:[%s8532_s1 + $0x24] sm:$0xf] }
  0x48   :  { %v4852_v17 = vld [vmem:[%s8532_s1 + $0x100] sm:$0xf]  ;;  %v6365_v20 = vld [vmem:[%s8532_s1 + $0x104] sm:$0xf]  ;;  %v4854_v21 = vld [vmem:[%s8532_s1 + $0x108] sm:$0xf0]  ;;  %v4785_v24 = vor.u32 %v6337_v14, %v4782_v16 }
  0x49   :  { %679 = vmatpush.bf16.msra.mxu0 %v4655_v44  ;;  %v4876_v44 = vld [vmem:[%s8532_s1 + $0x130] sm:$0xf]  ;;  %v6336_v25 = vld [vmem:[%s8532_s1 + $0x14] sm:$0xf0]  ;;  %v6335_v26 = vld [vmem:[%s8532_s1 + $0x14] sm:$0xf]  ;;  %v4857_v29 = vor.u32 %v6365_v20, %v4854_v21 }
  0x4a   :  { %693 = vmatpush.bf16.msra.mxu1 %v4659_v45  ;;  %887 = vmatpush.bf16.msra.mxu2 %v4731_v48  ;;  %v7373_v45 = vpack.c.bf16 %v581_v37, %v580_v36  ;;  %v4878_v48 = vld [vmem:[%s8532_s1 + $0x138] sm:$0xf0]  ;;  %v4877_v53 = vor.u32 %v6372_v46, %v4876_v44  ;;  %v4772_v22 = vld [vmem:[%s8532_s1 + $0x10] sm:$0xf]  ;;  %v4764_v36 = vld [vmem:[%s8532_s1] sm:$0xf] }
  0x4b   :  { %901 = vmatpush.bf16.msra.mxu3 %v4735_v49  ;;  %v4805_v49 = vor.u32 %v6344_v39, %v4804_v38  ;;  %v4881_v54 = vor.u32 %v6371_v47, %v4878_v48  ;;  %v4774_v27 = vld [vmem:[%s8532_s1 + $0x18] sm:$0xf0]  ;;  %v6334_v37 = vld [vmem:[%s8532_s1 + $0x4] sm:$0xf0]  ;;  %v6333_v38 = vld [vmem:[%s8532_s1 + $0x4] sm:$0xf] }
  0x4c   :  { %v6387_v39 = vld [vmem:[%s8532_s1 + $0x1b4] sm:$0xf]  ;;  %v4960_v40 = vld [vmem:[%s8532_s1 + $0x1b8] sm:$0x30]  ;;  %v4777_v43 = vor.u32 %v6335_v26, %v4774_v27  ;;  %v6402_v44 = vld [vmem:[%s8532_s1 + $0x224] sm:$0x30] }
  0x4d   :  { %680 = vmatpush.bf16.msra.mxu0 %v4647_v59  ;;  %v6369_v59 = vld [vmem:[%s8532_s1 + $0x124] sm:$0xf]  ;;  %v5034_v47 = vld [vmem:[%s8532_s1 + $0x228] sm:$0x30]  ;;  %v4836_v51 = vld [vmem:[%s8532_s1 + $0xe0] sm:$0xf]  ;;  %v4963_v56 = vor.u32 %v6387_v39, %v4960_v40 }
  0x4e   :  { %694 = vmatpush.bf16.msra.mxu1 %v4651_v60  ;;  %888 = vmatpush.bf16.msra.mxu2 %v4723_v0  ;;  %v4870_v60 = vld [vmem:[%s8532_s1 + $0x128] sm:$0xf0]  ;;  %v6340_v0 = vld [vmem:[%s8532_s1 + $0x34] sm:$0xf0]  ;;  %v6401_v46 = vld [vmem:[%s8532_s1 + $0x224] sm:$0xf] }
  0x4f   :  { %902 = vmatpush.bf16.msra.mxu3 %v4727_v1  ;;  %v4869_v1 = vor.u32 %v6370_v58, %v4868_v57  ;;  %v4873_v2 = vor.u32 %v6369_v59, %v4870_v60  ;;  %v4789_v8 = vor.u32 %v6340_v0, %v4788_v63  ;;  %v6362_v52 = vld [vmem:[%s8532_s1 + $0xe4] sm:$0xf0]  ;;  %v5037_v58 = vor.u32 %v6401_v46, %v5034_v47  ;;  %v4950_v63 = vld [vmem:[%s8532_s1 + $0x1a0] sm:$0xf] }
  0x50   :  { %v4765_v59 = vor.u32 %v6334_v37, %v4764_v36 }
  0x51   :  { %681 = vmatpush.bf16.msra.mxu0 %v4639_v11  ;;  %v6338_v11 = vld [vmem:[%s8532_s1 + $0x24] sm:$0xf0] }
  0x52   :  { %695 = vmatpush.bf16.msra.mxu1 %v4643_v12  ;;  %889 = vmatpush.bf16.msra.mxu2 %v4715_v13  ;;  %v4861_v12 = vor.u32 %v6368_v5, %v4860_v4  ;;  %v4865_v13 = vor.u32 %v6367_v6, %v4862_v7  ;;  %v4781_v23 = vor.u32 %v6338_v11, %v4780_v10 }
  0x53   :  { %903 = vmatpush.bf16.msra.mxu3 %v4719_v18  ;;  %v6366_v18 = vld [vmem:[%s8532_s1 + $0x104] sm:$0xf0] }
  0x54   :  { %v4853_v28 = vor.u32 %v6366_v18, %v4852_v17 }
  0x55   :  { %682 = vmatpush.bf16.msra.mxu0 %v4631_v30  ;;  %v4844_v30 = vld [vmem:[%s8532_s1 + $0xf0] sm:$0xf] }
  0x56   :  { %696 = vmatpush.bf16.msra.mxu1 %v4635_v31  ;;  %890 = vmatpush.bf16.msra.mxu2 %v4707_v32  ;;  %v6364_v31 = vld [vmem:[%s8532_s1 + $0xf4] sm:$0xf0]  ;;  %v6363_v32 = vld [vmem:[%s8532_s1 + $0xf4] sm:$0xf] }
  0x57   :  { %904 = vmatpush.bf16.msra.mxu3 %v4711_v33  ;;  %v4846_v33 = vld [vmem:[%s8532_s1 + $0xf8] sm:$0xf0]  ;;  %v4845_v48 = vor.u32 %v6364_v31, %v4844_v30 }
  0x58   :  { %4684 = vmatmul.msk.bf16.vlgmr.msra.gmra.mxu0 %vm180_vm1, %v7373_v45 }
  0x59   :  { %989 = vmatpush.bf16.msrb.mxu0 %v983_v34  ;;  %4685 = vmatmul.msk.bf16.vlgmr.msra.gmra.mxu1 %vm180_vm1, %v7373_v45  ;;  %v4958_v34 = vld [vmem:[%s8532_s1 + $0x1b0] sm:$0xf] }
  0x5a   :  { %1003 = vmatpush.bf16.msrb.mxu1 %v986_v35  ;;  %1111 = vmatpush.bf16.msrb.mxu2 %v1105_v41  ;;  %v6388_v35 = vld [vmem:[%s8532_s1 + $0x1b4] sm:$0x30]  ;;  %v5032_v41 = vld [vmem:[%s8532_s1 + $0x220] sm:$0xf] }
  0x5b   :  { %1125 = vmatpush.bf16.msrb.mxu3 %v1108_v42  ;;  %4760 = vmatmul.msk.bf16.vlgmr.msra.gmra.mxu2 %vm180_vm1, %v7194_v19  ;;  %v4773_v42 = vor.u32 %v6336_v25, %v4772_v22  ;;  %v4959_v55 = vor.u32 %v6388_v35, %v4958_v34  ;;  %v5033_v57 = vor.u32 %v6402_v44, %v5032_v41 }
  0x5c   :  { %4761 = vmatmul.msk.bf16.vlgmr.msra.gmra.mxu3 %vm180_vm1, %v7194_v19  ;;  %v6339_v19 = vld [vmem:[%s8532_s1 + $0x34] sm:$0xf] }
  0x5d   :  { %990 = vmatpush.bf16.msrb.mxu0 %v4805_v49  ;;  %v4793_v9 = vor.u32 %v6339_v19, %v4790_v3  ;;  %v4849_v49 = vor.u32 %v6363_v32, %v4846_v33 }
  0x5e   :  { %1004 = vmatpush.bf16.msrb.mxu1 %v4809_v50  ;;  %1112 = vmatpush.bf16.msrb.mxu2 %v4877_v53  ;;  %v4766_v50 = vld [vmem:[%s8532_s1 + $0x8] sm:$0xf0]  ;;  %v6361_v53 = vld [vmem:[%s8532_s1 + $0xe4] sm:$0xf] }
  0x5f   :  { %1126 = vmatpush.bf16.msrb.mxu3 %v4881_v54  ;;  %v4838_v54 = vld [vmem:[%s8532_s1 + $0xe8] sm:$0xf0]  ;;  %v4769_v60 = vor.u32 %v6333_v38, %v4766_v50 }
  0x61   :  { %991 = vmatpush.bf16.msrb.mxu0 %v4797_v61  ;;  %v4837_v61 = vor.u32 %v6362_v52, %v4836_v51 }
  0x62   :  { %1005 = vmatpush.bf16.msrb.mxu1 %v4801_v62  ;;  %1113 = vmatpush.bf16.msrb.mxu2 %v4869_v1  ;;  %v4841_v62 = vor.u32 %v6361_v53, %v4838_v54 }
  0x63   :  { %1127 = vmatpush.bf16.msrb.mxu3 %v4873_v2 }
  0x65   :  { %992 = vmatpush.bf16.msrb.mxu0 %v4789_v8 }
  0x66   :  { %1006 = vmatpush.bf16.msrb.mxu1 %v4793_v9  ;;  %1114 = vmatpush.bf16.msrb.mxu2 %v4861_v12 }
  0x67   :  { %1128 = vmatpush.bf16.msrb.mxu3 %v4865_v13 }
  0x69   :  { %993 = vmatpush.bf16.msrb.mxu0 %v4781_v23 }
  0x6a   :  { %1007 = vmatpush.bf16.msrb.mxu1 %v4785_v24  ;;  %1115 = vmatpush.bf16.msrb.mxu2 %v4853_v28 }
  0x6b   :  { %1129 = vmatpush.bf16.msrb.mxu3 %v4857_v29 }
  0x6d   :  { %994 = vmatpush.bf16.msrb.mxu0 %v4773_v42 }
  0x6e   :  { %1008 = vmatpush.bf16.msrb.mxu1 %v4777_v43  ;;  %1116 = vmatpush.bf16.msrb.mxu2 %v4845_v48 }
  0x6f   :  { %1130 = vmatpush.bf16.msrb.mxu3 %v4849_v49 }
  0x70   :  { %16 = vsyncpa [#allocation6], 0  ;;  %v1231_v0 = vsel %vm184_vm0, %v4959_v55, 0  ;;  %v1234_v1 = vsel %vm184_vm0, %v4963_v56, 0  ;;  %v6386_v2 = vld [vmem:[%s8532_s1 + $0x1a4] sm:$0xf0] }
  0x71   :  { %v6385_v19 = vld [vmem:[%s8532_s1 + $0x1a4] sm:$0xf]  ;;  %v1357_v3 = vsel %vm184_vm0, %v5033_v57, 0  ;;  %v1360_v4 = vsel %vm184_vm0, %v5037_v58, 0  ;;  %v4952_v5 = vld [vmem:[%s8532_s1 + $0x1a8] sm:$0xf0]  ;;  %995 = vmatpush.bf16.msrb.mxu0 %v4765_v59  ;;  %v4951_v10 = vor.u32 %v6386_v2, %v4950_v63 }
  0x72   :  { %v5024_v6 = vld [vmem:[%s8532_s1 + $0x210] sm:$0xf]  ;;  %1009 = vmatpush.bf16.msrb.mxu1 %v4769_v60  ;;  %v6400_v7 = vld [vmem:[%s8532_s1 + $0x214] sm:$0xf0]  ;;  %v6399_v8 = vld [vmem:[%s8532_s1 + $0x214] sm:$0xf]  ;;  %1117 = vmatpush.bf16.msrb.mxu2 %v4837_v61  ;;  %v4955_v11 = vor.u32 %v6385_v19, %v4952_v5 }
  0x73   :  { %v5026_v9 = vld [vmem:[%s8532_s1 + $0x218] sm:$0xf0]  ;;  %1131 = vmatpush.bf16.msrb.mxu3 %v4841_v62  ;;  %v4942_v12 = vld [vmem:[%s8532_s1 + $0x190] sm:$0xf]  ;;  %v6384_v13 = vld [vmem:[%s8532_s1 + $0x194] sm:$0xf0]  ;;  %v5025_v14 = vor.u32 %v6400_v7, %v5024_v6 }
  0x74   :  { %v5029_v16 = vor.u32 %v6399_v8, %v5026_v9  ;;  %v6383_v17 = vld [vmem:[%s8532_s1 + $0x194] sm:$0xf]  ;;  %v4944_v18 = vld [vmem:[%s8532_s1 + $0x198] sm:$0xf0]  ;;  %v5016_v20 = vld [vmem:[%s8532_s1 + $0x200] sm:$0xf]  ;;  %4818 = vmatmul.msk.bf16.vlgmr.msrb.gmra.mxu0 %vm180_vm1, %v7183_v15 }
  0x75   :  { %1237 = vmatpush.bf16.msra.mxu0 %v1231_v0  ;;  %4819 = vmatmul.msk.bf16.vlgmr.msrb.gmra.mxu1 %vm180_vm1, %v7183_v15  ;;  %v6398_v21 = vld [vmem:[%s8532_s1 + $0x204] sm:$0xf0]  ;;  %v6397_v22 = vld [vmem:[%s8532_s1 + $0x204] sm:$0xf]  ;;  %v5018_v23 = vld [vmem:[%s8532_s1 + $0x208] sm:$0xf0]  ;;  %v4943_v15 = vor.u32 %v6384_v13, %v4942_v12  ;;  %v4947_v24 = vor.u32 %v6383_v17, %v4944_v18 }
  0x76   :  { %1251 = vmatpush.bf16.msra.mxu1 %v1234_v1  ;;  %1363 = vmatpush.bf16.msra.mxu2 %v1357_v3  ;;  %v4934_v25 = vld [vmem:[%s8532_s1 + $0x180] sm:$0xf]  ;;  %v6382_v26 = vld [vmem:[%s8532_s1 + $0x184] sm:$0xf0]  ;;  %v5017_v27 = vor.u32 %v6398_v21, %v5016_v20  ;;  %v5021_v28 = vor.u32 %v6397_v22, %v5018_v23  ;;  %v4936_v29 = vld [vmem:[%s8532_s1 + $0x188] sm:$0xf0] }
  0x77   :  { %1377 = vmatpush.bf16.msra.mxu3 %v1360_v4  ;;  %4890 = vmatmul.msk.bf16.vlgmr.msrb.gmra.mxu2 %vm180_vm1, %v7373_v45  ;;  %v5008_v30 = vld [vmem:[%s8532_s1 + $0x1f0] sm:$0xf]  ;;  %v6396_v31 = vld [vmem:[%s8532_s1 + $0x1f4] sm:$0xf0]  ;;  %v6395_v32 = vld [vmem:[%s8532_s1 + $0x1f4] sm:$0xf]  ;;  %v4935_v34 = vor.u32 %v6382_v26, %v4934_v25 }
  0x78   :  { %4891 = vmatmul.msk.bf16.vlgmr.msrb.gmra.mxu3 %vm180_vm1, %v7373_v45  ;;  %v6381_v45 = vld [vmem:[%s8532_s1 + $0x184] sm:$0xf]  ;;  %v5010_v33 = vld [vmem:[%s8532_s1 + $0x1f8] sm:$0xf0]  ;;  %v4926_v36 = vld [vmem:[%s8532_s1 + $0x170] sm:$0xf]  ;;  %v5009_v38 = vor.u32 %v6396_v31, %v5008_v30 }
  0x79   :  { %1238 = vmatpush.bf16.msra.mxu0 %v4951_v10  ;;  %v4939_v35 = vor.u32 %v6381_v45, %v4936_v29  ;;  %v6380_v37 = vld [vmem:[%s8532_s1 + $0x174] sm:$0xf0]  ;;  %v5013_v39 = vor.u32 %v6395_v32, %v5010_v33  ;;  %v6379_v40 = vld [vmem:[%s8532_s1 + $0x174] sm:$0xf]  ;;  %v4928_v41 = vld [vmem:[%s8532_s1 + $0x178] sm:$0xf0] }
  0x7a   :  { %1252 = vmatpush.bf16.msra.mxu1 %v4955_v11  ;;  %1364 = vmatpush.bf16.msra.mxu2 %v5025_v14  ;;  %v5000_v42 = vld [vmem:[%s8532_s1 + $0x1e0] sm:$0xf]  ;;  %v6394_v43 = vld [vmem:[%s8532_s1 + $0x1e4] sm:$0xf0]  ;;  %v6393_v44 = vld [vmem:[%s8532_s1 + $0x1e4] sm:$0xf]  ;;  %v4927_v47 = vor.u32 %v6380_v37, %v4926_v36  ;;  %v4931_v48 = vor.u32 %v6379_v40, %v4928_v41 }
  0x7b   :  { %1378 = vmatpush.bf16.msra.mxu3 %v5029_v16  ;;  %v5002_v46 = vld [vmem:[%s8532_s1 + $0x1e8] sm:$0xf0]  ;;  %v4918_v49 = vld [vmem:[%s8532_s1 + $0x160] sm:$0xf]  ;;  %v6378_v50 = vld [vmem:[%s8532_s1 + $0x164] sm:$0xf0]  ;;  %v5001_v51 = vor.u32 %v6394_v43, %v5000_v42 }
  0x7c   :  { %v5005_v52 = vor.u32 %v6393_v44, %v5002_v46  ;;  %v6377_v53 = vld [vmem:[%s8532_s1 + $0x164] sm:$0xf]  ;;  %v4920_v54 = vld [vmem:[%s8532_s1 + $0x168] sm:$0xf0]  ;;  %v4992_v55 = vld [vmem:[%s8532_s1 + $0x1d0] sm:$0xf]  ;;  %v4919_v59 = vor.u32 %v6378_v50, %v4918_v49 }
  0x7d   :  { %1239 = vmatpush.bf16.msra.mxu0 %v4943_v15  ;;  %v6392_v56 = vld [vmem:[%s8532_s1 + $0x1d4] sm:$0xf0]  ;;  %v6391_v57 = vld [vmem:[%s8532_s1 + $0x1d4] sm:$0xf]  ;;  %v4994_v58 = vld [vmem:[%s8532_s1 + $0x1d8] sm:$0xf0]  ;;  %v4923_v60 = vor.u32 %v6377_v53, %v4920_v54 }
  0x7e   :  { %1253 = vmatpush.bf16.msra.mxu1 %v4947_v24  ;;  %1365 = vmatpush.bf16.msra.mxu2 %v5017_v27  ;;  %v4910_v61 = vld [vmem:[%s8532_s1 + $0x150] sm:$0xf]  ;;  %v6376_v62 = vld [vmem:[%s8532_s1 + $0x154] sm:$0xf0]  ;;  %v4993_v63 = vor.u32 %v6392_v56, %v4992_v55  ;;  %v4997_v0 = vor.u32 %v6391_v57, %v4994_v58  ;;  %v6375_v1 = vld [vmem:[%s8532_s1 + $0x154] sm:$0xf] }
  0x7f   :  { %1379 = vmatpush.bf16.msra.mxu3 %v5021_v28  ;;  %v4912_v2 = vld [vmem:[%s8532_s1 + $0x158] sm:$0xf0]  ;;  %v4984_v19 = vld [vmem:[%s8532_s1 + $0x1c0] sm:$0xf]  ;;  %v6390_v3 = vld [vmem:[%s8532_s1 + $0x1c4] sm:$0xf0]  ;;  %v4911_v6 = vor.u32 %v6376_v62, %v4910_v61 }
  0x80   :  { %v6389_v4 = vld [vmem:[%s8532_s1 + $0x1c4] sm:$0xf]  ;;  %v4986_v5 = vld [vmem:[%s8532_s1 + $0x1c8] sm:$0xf0]  ;;  %v4915_v7 = vor.u32 %v6375_v1, %v4912_v2  ;;  %v4893_v9 = vld [vmem:[%s8531_s0 + $0x31] sm:$0xff]  ;;  %v4985_v10 = vor.u32 %v6390_v3, %v4984_v19  ;;  %s6705_s16 = smov 24  }
  0x81   :  { %1240 = vmatpush.bf16.msra.mxu0 %v4935_v34  ;;  %v4892_v8 = vld [vmem:[%s8531_s0 + $0x21] sm:$0xff]  ;;  %v4989_v11 = vor.u32 %v6389_v4, %v4986_v5  ;;  %v4967_v13 = vld [vmem:[%s8531_s0 + $0x51] sm:$0xff]  ;;  %vm41_vm2 = vcmask 916480   ;;  %vm44_vm3 = vcmask 910336   ;;  %vm760_vm4 = vcmask 1047745   ;;  %s6707_s21 = smov [#allocation5]  }
  0x82   :  { %1254 = vmatpush.bf16.msra.mxu1 %v4939_v35  ;;  %1366 = vmatpush.bf16.msra.mxu2 %v5009_v38  ;;  %v4966_v12 = vld [vmem:[%s8531_s0 + $0x41] sm:$0xff]  ;;  %v1144_v14 = vpack.c.bf16 %v4893_v9, %v4892_v8  ;;  %vm764_vm5 = vcmask 1040576   ;;  %vm753_vm6 = vcmask 195584   ;;  %vm762_vm7 = vcmask 719873   ;;  %s4323_s22 = sshll.u32 %s6707_s21, 4  ;;  %s4325_s25 = sshll.u32 %s8542_s11, 4  ;;  %s4324_s22 = int_to_ptr.vmem [resolvable:$true] %s4323_s22  ;;  %s4326_s25 = int_to_ptr.hbm [resolvable:$true] %s4325_s25 }
  0x83   :  { %1380 = vmatpush.bf16.msra.mxu3 %v5013_v39  ;;  %v1270_v16 = vpack.c.bf16 %v4967_v13, %v4966_v12  ;;  %v707_v34 = vld [vmem:[%s8533_s2] sm:$0x3]  ;;  %vm766_vm8 = vcmask 712704   ;;  %vm1786_vm9 = vcmask 1046528   ;;  %vm59_vm10 = vcmask 130048  }
  0x84   :  { %v709_v37 = vperm.slane %v707_v34, 0  ;;  %v710_v38 = vperm.slane %v707_v34, 1  ;;  %vm62_vm11 = vcmask 125952   ;;  %vm2361_vm12 = vcmask 982210  }
  0x85   :  { %1241 = vmatpush.bf16.msra.mxu0 %v4927_v47  ;;  %vm2363_vm13 = vcmask 976064   ;;  %vm2770_vm14 = vcmask 1044480   ;;  %vm2911_vm15 = vcmask 1043456  }
  0x86   :  { %1255 = vmatpush.bf16.msra.mxu1 %v4931_v48  ;;  %1367 = vmatpush.bf16.msra.mxu2 %v5001_v51 }
  0x87   :  { %1381 = vmatpush.bf16.msra.mxu3 %v5005_v52 }
  0x89   :  { %1242 = vmatpush.bf16.msra.mxu0 %v4919_v59 }
  0x8a   :  { %1256 = vmatpush.bf16.msra.mxu1 %v4923_v60  ;;  %1368 = vmatpush.bf16.msra.mxu2 %v4993_v63 }
  0x8b   :  { %1382 = vmatpush.bf16.msra.mxu3 %v4997_v0 }
  0x8d   :  { %1243 = vmatpush.bf16.msra.mxu0 %v4911_v6 }
  0x8e   :  { %1257 = vmatpush.bf16.msra.mxu1 %v4915_v7  ;;  %1369 = vmatpush.bf16.msra.mxu2 %v4985_v10 }
  0x8f   :  { %1383 = vmatpush.bf16.msra.mxu3 %v4989_v11 }
  0x90   :  { %4964 = vmatmul.msk.bf16.vlgmr.msra.gmra.mxu0 %vm180_vm1, %v1144_v14 }
  0x91   :  { %4965 = vmatmul.msk.bf16.vlgmr.msra.gmra.mxu1 %vm180_vm1, %v1144_v14  ;;  %5038 = vmatmul.msk.bf16.vlgmr.msra.gmra.mxu2 %vm180_vm1, %v1270_v16 }
  0x92   :  { %5039 = vmatmul.msk.bf16.vlgmr.msra.gmra.mxu3 %vm180_vm1, %v1270_v16  ;;  %vm3820_vm1 = vcmask 785408  }
  0x9d   :  { %v200_v17 = vpop.f32.mrf.mxu0 }
  0x9e   :  { %v214_v18 = vpop.f32.mrf.mxu1 }
  0xa5   :  { %v202_v20 = vpop.f32.mrf.mxu0 }
  0xa6   :  { %v216_v21 = vpop.f32.mrf.mxu1  ;;  %v305_v22 = vpop.f32.mrf.mxu2 }
  0xa7   :  { %v319_v23 = vpop.f32.mrf.mxu3  ;;  %v306_v27 = vadd.f32 %v305_v22, %v200_v17 }
  0xa8   :  { %v320_v28 = vadd.f32 %v319_v23, %v214_v18 }
  0xae   :  { %v307_v25 = vpop.f32.mrf.mxu2 }
  0xaf   :  { %v321_v26 = vpop.f32.mrf.mxu3  ;;  %v308_v43 = vadd.f32 %v307_v25, %v202_v20 }
  0xb0   :  { %v322_v44 = vadd.f32 %v321_v26, %v216_v21 }
  0xb9   :  { %v429_v15 = vpop.f32.mrf.mxu0 }
  0xba   :  { %v443_v24 = vpop.f32.mrf.mxu1  ;;  %v448_v32 = vadd.f32 %v429_v15, %v306_v27 }
  0xbb   :  { %v449_v33 = vadd.f32 %v443_v24, %v320_v28 }
  0xc1   :  { %v431_v45 = vpop.f32.mrf.mxu0 }
  0xc2   :  { %v445_v29 = vpop.f32.mrf.mxu1  ;;  %v557_v30 = vpop.f32.mrf.mxu2  ;;  %v450_v50 = vadd.f32 %v431_v45, %v308_v43 }
  0xc3   :  { %v571_v31 = vpop.f32.mrf.mxu3  ;;  %v576_v35 = vadd.f32 %v557_v30, %v448_v32  ;;  %v451_v51 = vadd.f32 %v445_v29, %v322_v44 }
  0xc4   :  { %v577_v36 = vadd.f32 %v571_v31, %v449_v33 }
  0xca   :  { %v559_v48 = vpop.f32.mrf.mxu2 }
  0xcb   :  { %v573_v49 = vpop.f32.mrf.mxu3  ;;  %v578_v54 = vadd.f32 %v559_v48, %v450_v50 }
  0xcc   :  { %v579_v55 = vadd.f32 %v573_v49, %v451_v51 }
  0xd5   :  { %v684_v39 = vpop.f32.mrf.mxu0 }
  0xd6   :  { %v698_v40 = vpop.f32.mrf.mxu1  ;;  %v703_v41 = vadd.f32 %v684_v39, %v576_v35  ;;  %v1394_v35 = vld [vmem:[%s8533_s2] sm:$0x3] }
  0xd7   :  { %v704_v42 = vadd.f32 %v698_v40, %v577_v36  ;;  %v1396_v40 = vperm.slane %v1394_v35, 0 }
  0xd8   :  { %v713_v46 = vadd.f32 %v709_v37, %v703_v41  ;;  %v1397_v41 = vperm.slane %v1394_v35, 1  ;;  %v6447_v35 = vld [vmem:[%s8534_s3 + $0x160] sm:$0xff] }
  0xd9   :  { %v714_v47 = vadd.f32 %v710_v38, %v704_v42 }
  0xda   :  { %v717_v52 = vsub.f32 0.0, %v713_v46 }
  0xdb   :  { %v718_v53 = vsub.f32 0.0, %v714_v47 }
  0xdc   :  { %v721_v56 = vmul.f32 1.442695, %v717_v52 }
  0xdd   :  { %v723_v57 = vmul.f32 1.442695, %v718_v53  ;;  %v686_v58 = vpop.f32.mrf.mxu0  ;;  %v6417_v53 = vld [vmem:[%s8534_s3 + $0x70] sm:$0xff] }
  0xde   :  { %v700_v59 = vpop.f32.mrf.mxu1  ;;  %6623 = vpow2.f32 %v721_v56  ;;  %v705_v60 = vadd.f32 %v686_v58, %v578_v54  ;;  %v892_v6 = vpop.f32.mrf.mxu2  ;;  %v6410_v58 = vld [vmem:[%s8534_s3 + $0x38] sm:$0xff]  ;;  %1757 = vmatpush.bf16.msrb.mxu3 %v6417_v53  ;;  %v6429_v53 = vld [vmem:[%s8534_s3 + $0xd0] sm:$0xff] }
  0xdf   :  { %v706_v61 = vadd.f32 %v700_v59, %v579_v55  ;;  %6625 = vpow2.f32 %v723_v57  ;;  %v906_v7 = vpop.f32.mrf.mxu3  ;;  %v6416_v59 = vld [vmem:[%s8534_s3 + $0x68] sm:$0xff]  ;;  %1742 = vmatpush.bf16.msrb.mxu2 %v6410_v58 }
  0xe0   :  { %v715_v62 = vadd.f32 %v709_v37, %v705_v60  ;;  %v6428_v58 = vld [vmem:[%s8534_s3 + $0xc8] sm:$0xff] }
  0xe1   :  { %v716_v63 = vadd.f32 %v710_v38, %v706_v61 }
  0xe2   :  { %v719_v0 = vsub.f32 0.0, %v715_v62  ;;  %1758 = vmatpush.bf16.msrb.mxu3 %v6416_v59  ;;  %v6421_v59 = vld [vmem:[%s8534_s3 + $0x90] sm:$0xff] }
  0xe3   :  { %v720_v1 = vsub.f32 0.0, %v716_v63  ;;  %v6409_v63 = vld [vmem:[%s8534_s3 + $0x30] sm:$0xff] }
  0xe4   :  { %v6624_v2 = vpop.eup %6623  ;;  %v725_v19 = vmul.f32 1.442695, %v719_v0  ;;  %1743 = vmatpush.bf16.msrb.mxu2 %v6409_v63  ;;  %v6427_v63 = vld [vmem:[%s8534_s3 + $0xc0] sm:$0xff] }
  0xe5   :  { %v727_v3 = vmul.f32 1.442695, %v720_v1  ;;  %v729_v4 = vadd.f32 1.0, %v6624_v2  ;;  %v6626_v5 = vpop.eup %6625 }
  0xe6   :  { %6627 = vpow2.f32 %v725_v19  ;;  %v730_v8 = vadd.f32 1.0, %v6626_v5  ;;  %v894_v16 = vpop.f32.mrf.mxu2 }
  0xe7   :  { %6629 = vpow2.f32 %v727_v3  ;;  %v908_v17 = vpop.f32.mrf.mxu3 }
  0xe8   :  { %6631 = vrcp.f32 %v729_v4  ;;  %v6415_v4 = vld [vmem:[%s8534_s3 + $0x60] sm:$0xff] }
  0xe9   :  { %6633 = vrcp.f32 %v730_v8  ;;  %1759 = vmatpush.bf16.msrb.mxu3 %v6415_v4  ;;  %v6440_v4 = vld [vmem:[%s8534_s3 + $0x128] sm:$0xff] }
  0xec   :  { %v6628_v9 = vpop.eup %6627 }
  0xed   :  { %v6630_v10 = vpop.eup %6629  ;;  %v731_v11 = vadd.f32 1.0, %v6628_v9 }
  0xee   :  { %v6632_v12 = vpop.eup %6631  ;;  %v732_v14 = vadd.f32 1.0, %v6630_v10  ;;  %v6414_v10 = vld [vmem:[%s8534_s3 + $0x58] sm:$0xff] }
  0xef   :  { %v741_v13 = vrot.slane %v6632_v12, 7  ;;  %6635 = vrcp.f32 %v731_v11  ;;  %v6634_v18 = vpop.eup %6633  ;;  %1760 = vmatpush.bf16.msrb.mxu3 %v6414_v10  ;;  %v6439_v10 = vld [vmem:[%s8534_s3 + $0x120] sm:$0xff] }
  0xf0   :  { %6637 = vrcp.f32 %v732_v14  ;;  %v742_v15 = vrot.slane %v6634_v18, 7  ;;  %v6407_v14 = vld [vmem:[%s8534_s3 + $0x20] sm:$0xff]  ;;  %v6413_v18 = vld [vmem:[%s8534_s3 + $0x50] sm:$0xff] }
  0xf1   :  { %745 = vrot.lane.b32.xlu0 %v741_v13, %s6705_s16  ;;  %v997_v22 = vpop.f32.mrf.mxu0 }
  0xf2   :  { %v1011_v23 = vpop.f32.mrf.mxu1  ;;  %v998_v33 = vadd.f32 %v997_v22, %v892_v6 }
  0xf3   :  { %v1012_v34 = vadd.f32 %v1011_v23, %v906_v7  ;;  %v6408_v7 = vld [vmem:[%s8534_s3 + $0x28] sm:$0xff]  ;;  %1761 = vmatpush.bf16.msrb.mxu3 %v6413_v18  ;;  %v6459_v18 = vld [vmem:[%s8534_s3 + $0x1c0] sm:$0xff] }
  0xf4   :  { %1744 = vmatpush.bf16.msrb.mxu2 %v6408_v7  ;;  %v6470_v7 = vld [vmem:[%s8534_s3 + $0x218] sm:$0xff] }
  0xf5   :  { %v6636_v20 = vpop.eup %6635 }
  0xf6   :  { %v743_v21 = vrot.slane %v6636_v20, 7  ;;  %v6638_v24 = vpop.eup %6637 }
  0xf7   :  { %v744_v27 = vrot.slane %v6638_v24, 7 }
  0xf8   :  { %749 = vrot.lane.b32.xlu1 %v743_v21, %s6705_s16  ;;  %1745 = vmatpush.bf16.msrb.mxu2 %v6407_v14  ;;  %v6412_v21 = vld [vmem:[%s8534_s3 + $0x48] sm:$0xff]  ;;  %v6455_v14 = vld [vmem:[%s8534_s3 + $0x1a0] sm:$0xff] }
  0xf9   :  { %747 = vrot.lane.b32.xlu0 %v742_v15, %s6705_s16  ;;  %v999_v28 = vpop.f32.mrf.mxu0  ;;  %1762 = vmatpush.bf16.msrb.mxu3 %v6412_v21 }
  0xfa   :  { %v1119_v25 = vpop.f32.mrf.mxu2  ;;  %v1013_v45 = vpop.f32.mrf.mxu1  ;;  %v1000_v47 = vadd.f32 %v999_v28, %v894_v16 }
  0xfb   :  { %v1133_v26 = vpop.f32.mrf.mxu3  ;;  %v1138_v36 = vadd.f32 %v1119_v25, %v998_v33  ;;  %v1014_v48 = vadd.f32 %v1013_v45, %v908_v17  ;;  %v6411_v33 = vld [vmem:[%s8534_s3 + $0x40] sm:$0xff] }
  0xfc   :  { %v1139_v37 = vadd.f32 %v1133_v26, %v1012_v34  ;;  %v6406_v34 = vld [vmem:[%s8534_s3 + $0x18] sm:$0xff] }
  0xfd   :  { %1763 = vmatpush.bf16.msrb.mxu3 %v6411_v33  ;;  %1746 = vmatpush.bf16.msrb.mxu2 %v6406_v34  ;;  %v6453_v33 = vld [vmem:[%s8534_s3 + $0x190] sm:$0xff]  ;;  %v6458_v34 = vld [vmem:[%s8534_s3 + $0x1b8] sm:$0xff] }
 0x100   :  { %751 = vrot.lane.b32.xlu1 %v744_v27, %s6705_s16 }
 0x101   :  { %1944 = vmatpush.bf16.msra.mxu3 %v6447_v35 }
 0x102   :  { %v1121_v29 = vpop.f32.mrf.mxu2 }
 0x103   :  { %v1135_v30 = vpop.f32.mrf.mxu3  ;;  %v1140_v54 = vadd.f32 %v1121_v29, %v1000_v47  ;;  %v6425_v47 = vld [vmem:[%s8534_s3 + $0xb0] sm:$0xff] }
 0x104   :  { %v1141_v55 = vadd.f32 %v1135_v30, %v1014_v48  ;;  %v6431_v48 = vld [vmem:[%s8534_s3 + $0xe0] sm:$0xff]  ;;  %1621 = vmatpush.bf16.msrb.mxu0 %v6425_v47 }
 0x105   :  { %v6451_v47 = vld [vmem:[%s8534_s3 + $0x180] sm:$0xff] }
 0x10d   :  { %v1245_v31 = vpop.f32.mrf.mxu0 }
 0x10e   :  { %v1259_v32 = vpop.f32.mrf.mxu1  ;;  %v1264_v38 = vadd.f32 %v1245_v31, %v1138_v36  ;;  %v6405_v36 = vld [vmem:[%s8534_s3 + $0x10] sm:$0xff] }
 0x10f   :  { %v1265_v39 = vadd.f32 %v1259_v32, %v1139_v37  ;;  %v6706_v32 = vmov 0.0   ;;  %v6446_v37 = vld [vmem:[%s8534_s3 + $0x158] sm:$0xff]  ;;  %1747 = vmatpush.bf16.msrb.mxu2 %v6405_v36  ;;  %v6452_v36 = vld [vmem:[%s8534_s3 + $0x188] sm:$0xff] }
 0x110   :  { %40 = vst [vmem:[#allocation2] sm:$0xff] %v6706_v32  ;;  %1945 = vmatpush.bf16.msra.mxu3 %v6446_v37 }
 0x111   :  { %43 = vst [vmem:[#allocation2 + $0x10] sm:$0x3] %v6706_v32 }
 0x112   :  { %46 = vst [vmem:[#allocation2 + $0x20] sm:$0xff] %v6706_v32 }
 0x113   :  { %48 = vst [vmem:[#allocation2 + $0x30] sm:$0x3] %v6706_v32 }
 0x114   :  { %v1371_v42 = vpop.f32.mrf.mxu2  ;;  %50 = vst [vmem:[#allocation2 + $0x40] sm:$0xff] %v6706_v32 }
 0x115   :  { %v1385_v43 = vpop.f32.mrf.mxu3  ;;  %v1390_v44 = vadd.f32 %v1371_v42, %v1264_v38  ;;  %v1247_v51 = vpop.f32.mrf.mxu0  ;;  %52 = vst [vmem:[#allocation2 + $0x50] sm:$0x3] %v6706_v32  ;;  %v6404_v38 = vld [vmem:[%s8534_s3 + $0x8] sm:$0xff]  ;;  %v6443_v42 = vld [vmem:[%s8534_s3 + $0x140] sm:$0xff] }
 0x116   :  { %v1391_v46 = vadd.f32 %v1385_v43, %v1265_v39  ;;  %v1261_v52 = vpop.f32.mrf.mxu1  ;;  %v1266_v61 = vadd.f32 %v1247_v51, %v1140_v54  ;;  %54 = vst [vmem:[#allocation2 + $0x60] sm:$0xff] %v6706_v32  ;;  %v6445_v39 = vld [vmem:[%s8534_s3 + $0x150] sm:$0xff]  ;;  %1748 = vmatpush.bf16.msrb.mxu2 %v6404_v38  ;;  %v6432_v43 = vld [vmem:[%s8534_s3 + $0xe8] sm:$0xff]  ;;  %v6430_v51 = vld [vmem:[%s8534_s3 + $0xd8] sm:$0xff] }
 0x117   :  { %v1400_v49 = vadd.f32 %v1396_v40, %v1390_v44  ;;  %v1267_v62 = vadd.f32 %v1261_v52, %v1141_v55  ;;  %56 = vst [vmem:[#allocation2 + $0x70] sm:$0x3] %v6706_v32  ;;  %1946 = vmatpush.bf16.msra.mxu3 %v6445_v39  ;;  %1636 = vmatpush.bf16.msrb.mxu1 %v6432_v43  ;;  %v6442_v44 = vld [vmem:[%s8534_s3 + $0x138] sm:$0xff]  ;;  %v6423_v52 = vld [vmem:[%s8534_s3 + $0xa0] sm:$0xff] }
 0x118   :  { %v1401_v50 = vadd.f32 %v1397_v41, %v1391_v46  ;;  %58 = vst [vmem:[#allocation3] sm:$0xff] %v6706_v32  ;;  %v6441_v46 = vld [vmem:[%s8534_s3 + $0x130] sm:$0xff]  ;;  %v6466_v38 = vld [vmem:[%s8534_s3 + $0x1f8] sm:$0xff]  ;;  %v6435_v39 = vld [vmem:[%s8534_s3 + $0x100] sm:$0xff] }
 0x119   :  { %v1404_v56 = vsub.f32 0.0, %v1400_v49  ;;  %61 = vst [vmem:[#allocation3 + $0x10] sm:$0xf] %v6706_v32 }
 0x11a   :  { %v1405_v57 = vsub.f32 0.0, %v1401_v50  ;;  %64 = vst [vmem:[#allocation3 + $0x20] sm:$0xff] %v6706_v32  ;;  %v6424_v50 = vld [vmem:[%s8534_s3 + $0xa8] sm:$0xff] }
 0x11b   :  { %v1408_v60 = vmul.f32 1.442695, %v1404_v56  ;;  %66 = vst [vmem:[#allocation3 + $0x30] sm:$0xf] %v6706_v32  ;;  %1637 = vmatpush.bf16.msrb.mxu1 %v6431_v48  ;;  %1622 = vmatpush.bf16.msrb.mxu0 %v6424_v50  ;;  %v6456_v48 = vld [vmem:[%s8534_s3 + $0x1a8] sm:$0xff] }
 0x11c   :  { %v1410_v0 = vmul.f32 1.442695, %v1405_v57  ;;  %v1373_v1 = vpop.f32.mrf.mxu2  ;;  %68 = vst [vmem:[#allocation4] sm:$0xff] %v6706_v32  ;;  %v6422_v57 = vld [vmem:[%s8534_s3 + $0x98] sm:$0xff] }
 0x11d   :  { %v1387_v2 = vpop.f32.mrf.mxu3  ;;  %6639 = vpow2.f32 %v1408_v60  ;;  %v1392_v19 = vadd.f32 %v1373_v1, %v1266_v61  ;;  %70 = vst [vmem:[#allocation4 + $0x10] sm:$0xf] %v6706_v32 }
 0x11e   :  { %v1393_v3 = vadd.f32 %v1387_v2, %v1267_v62  ;;  %6641 = vpow2.f32 %v1410_v0  ;;  %72 = vst [vmem:[#allocation4 + $0x20] sm:$0xff] %v6706_v32  ;;  %v6462_v2 = vld [vmem:[%s8534_s3 + $0x1d8] sm:$0xff] }
 0x11f   :  { %v1402_v5 = vadd.f32 %v1396_v40, %v1392_v19  ;;  %v6403_v40 = vld [vmem:[%s8534_s3] sm:$0xff]  ;;  %74 = vst [vmem:[#allocation4 + $0x30] sm:$0xf] %v6706_v32  ;;  %1638 = vmatpush.bf16.msrb.mxu1 %v6430_v51  ;;  %1623 = vmatpush.bf16.msrb.mxu0 %v6423_v52  ;;  %v6420_v19 = vld [vmem:[%s8534_s3 + $0x88] sm:$0xff] }
 0x120   :  { %v1403_v6 = vadd.f32 %v1397_v41, %v1393_v3  ;;  %v6444_v41 = vld [vmem:[%s8534_s3 + $0x148] sm:$0xff]  ;;  %42 = vst.msk [vmem:[#allocation2 + $0x8] sm:$0xff] %vm41_vm2, %v6706_v32  ;;  %1749 = vmatpush.bf16.msrb.mxu2 %v6403_v40  ;;  %v6426_v3 = vld [vmem:[%s8534_s3 + $0xb8] sm:$0xff] }
 0x121   :  { %v1406_v8 = vsub.f32 0.0, %v1402_v5  ;;  %1947 = vmatpush.bf16.msra.mxu3 %v6444_v41  ;;  %45 = vst.msk [vmem:[#allocation2 + $0x18] sm:$0x3] %vm44_vm3, %v6706_v32  ;;  %v6461_v5 = vld [vmem:[%s8534_s3 + $0x1d0] sm:$0xff]  ;;  %v6464_v51 = vld [vmem:[%s8534_s3 + $0x1e8] sm:$0xff] }
 0x122   :  { %v1407_v9 = vsub.f32 0.0, %v1403_v6  ;;  %47 = vst.msk [vmem:[#allocation2 + $0x28] sm:$0xff] %vm41_vm2, %v6706_v32  ;;  %v6419_v6 = vld [vmem:[%s8534_s3 + $0x80] sm:$0xff]  ;;  %v6457_v41 = vld [vmem:[%s8534_s3 + $0x1b0] sm:$0xff] }
 0x123   :  { %v6640_v11 = vpop.eup %6639  ;;  %v1412_v12 = vmul.f32 1.442695, %v1406_v8  ;;  %49 = vst.msk [vmem:[#allocation2 + $0x38] sm:$0x3] %vm44_vm3, %v6706_v32  ;;  %1639 = vmatpush.bf16.msrb.mxu1 %v6429_v53  ;;  %1624 = vmatpush.bf16.msrb.mxu0 %v6422_v57 }
 0x124   :  { %v1414_v13 = vmul.f32 1.442695, %v1407_v9  ;;  %v1416_v16 = vadd.f32 1.0, %v6640_v11  ;;  %v6642_v17 = vpop.eup %6641  ;;  %51 = vst.msk [vmem:[#allocation2 + $0x48] sm:$0xff] %vm41_vm2, %v6706_v32  ;;  %2132 = vmatpush.bf16.msra.mxu2 %v6462_v2 }
 0x125   :  { %6643 = vpow2.f32 %v1412_v12  ;;  %v1417_v20 = vadd.f32 1.0, %v6642_v17  ;;  %1948 = vmatpush.bf16.msra.mxu3 %v6443_v42  ;;  %53 = vst.msk [vmem:[#allocation2 + $0x58] sm:$0x3] %vm44_vm3, %v6706_v32  ;;  %v6418_v12 = vld [vmem:[%s8534_s3 + $0x78] sm:$0xff] }
 0x126   :  { %6645 = vpow2.f32 %v1414_v13  ;;  %55 = vst.msk [vmem:[#allocation2 + $0x68] sm:$0xff] %vm41_vm2, %v6706_v32  ;;  %v6460_v13 = vld [vmem:[%s8534_s3 + $0x1c8] sm:$0xff]  ;;  %v6438_v17 = vld [vmem:[%s8534_s3 + $0x118] sm:$0xff] }
 0x127   :  { %6647 = vrcp.f32 %v1416_v16  ;;  %57 = vst.msk [vmem:[#allocation2 + $0x78] sm:$0x3] %vm44_vm3, %v6706_v32  ;;  %1640 = vmatpush.bf16.msrb.mxu1 %v6428_v58  ;;  %1625 = vmatpush.bf16.msrb.mxu0 %v6421_v59  ;;  %v6469_v16 = vld [vmem:[%s8534_s3 + $0x210] sm:$0xff]  ;;  %v6463_v59 = vld [vmem:[%s8534_s3 + $0x1e0] sm:$0xff] }
 0x128   :  { %6649 = vrcp.f32 %v1417_v20  ;;  %2133 = vmatpush.bf16.msra.mxu2 %v6461_v5  ;;  %v6449_v58 = vld [vmem:[%s8534_s3 + $0x170] sm:$0xff]  ;;  %60 = vst.msk [vmem:[#allocation3 + $0x8] sm:$0xff] %vm59_vm10, %v6706_v32 }
 0x129   :  { %1949 = vmatpush.bf16.msra.mxu3 %v6442_v44  ;;  %v6465_v44 = vld [vmem:[%s8534_s3 + $0x1f0] sm:$0xff]  ;;  %63 = vst.msk [vmem:[#allocation3 + $0x18] sm:$0xf] %vm62_vm11, %v6706_v32 }
 0x12a   :  { %65 = vst.msk [vmem:[#allocation3 + $0x28] sm:$0xff] %vm59_vm10, %v6706_v32 }
 0x12b   :  { %v6644_v22 = vpop.eup %6643  ;;  %1641 = vmatpush.bf16.msrb.mxu1 %v6427_v63  ;;  %1626 = vmatpush.bf16.msrb.mxu0 %v6420_v19  ;;  %v6448_v63 = vld [vmem:[%s8534_s3 + $0x168] sm:$0xff]  ;;  %67 = vst.msk [vmem:[#allocation3 + $0x38] sm:$0xf] %vm62_vm11, %v6706_v32 }
 0x12c   :  { %v6646_v23 = vpop.eup %6645  ;;  %v1418_v15 = vadd.f32 1.0, %v6644_v22  ;;  %2134 = vmatpush.bf16.msra.mxu2 %v6460_v13  ;;  %v6454_v22 = vld [vmem:[%s8534_s3 + $0x198] sm:$0xff]  ;;  %69 = vst.msk [vmem:[#allocation4 + $0x8] sm:$0xff] %vm59_vm10, %v6706_v32 }
 0x12d   :  { %v6648_v24 = vpop.eup %6647  ;;  %v1419_v25 = vadd.f32 1.0, %v6646_v23  ;;  %1950 = vmatpush.bf16.msra.mxu3 %v6441_v46  ;;  %v6468_v23 = vld [vmem:[%s8534_s3 + $0x208] sm:$0xff]  ;;  %v6434_v46 = vld [vmem:[%s8534_s3 + $0xf8] sm:$0xff]  ;;  %71 = vst.msk [vmem:[#allocation4 + $0x18] sm:$0xf] %vm62_vm11, %v6706_v32 }
 0x12e   :  { %v1428_v26 = vrot.slane %v6648_v24, 7  ;;  %6651 = vrcp.f32 %v1418_v15  ;;  %v6650_v27 = vpop.eup %6649  ;;  %v6437_v15 = vld [vmem:[%s8534_s3 + $0x110] sm:$0xff]  ;;  %73 = vst.msk [vmem:[#allocation4 + $0x28] sm:$0xff] %vm59_vm10, %v6706_v32 }
 0x12f   :  { %6653 = vrcp.f32 %v1419_v25  ;;  %v1429_v30 = vrot.slane %v6650_v27, 7  ;;  %1642 = vmatpush.bf16.msrb.mxu1 %v6426_v3  ;;  %1627 = vmatpush.bf16.msrb.mxu0 %v6419_v6  ;;  %75 = vst.msk [vmem:[#allocation4 + $0x38] sm:$0xf] %vm62_vm11, %v6706_v32 }
 0x130   :  { %1432 = vrot.lane.b32.xlu2 %v1428_v26, %s6705_s16  ;;  %2135 = vmatpush.bf16.msra.mxu2 %v6459_v18 }
 0x133   :  { %1929 = vmatpush.bf16.msra.mxu1 %v6440_v4  ;;  %1628 = vmatpush.bf16.msrb.mxu0 %v6418_v12 }
 0x134   :  { %v6652_v28 = vpop.eup %6651  ;;  %2136 = vmatpush.bf16.msra.mxu2 %v6458_v34 }
 0x135   :  { %v6654_v45 = vpop.eup %6653  ;;  %v1430_v29 = vrot.slane %v6652_v28, 7 }
 0x136   :  { %v1431_v31 = vrot.slane %v6654_v45, 7  ;;  %v6467_v45 = vld [vmem:[%s8534_s3 + $0x200] sm:$0xff] }
 0x137   :  { %1436 = vrot.lane.b32.xlu0 %v1430_v29, %s6705_s16  ;;  %1930 = vmatpush.bf16.msra.mxu1 %v6439_v10 }
 0x138   :  { %1434 = vrot.lane.b32.xlu2 %v1429_v30, %s6705_s16  ;;  %1438 = vrot.lane.b32.xlu1 %v1431_v31, %s6705_s16  ;;  %v6436_v31 = vld [vmem:[%s8534_s3 + $0x108] sm:$0xff] }
 0x139   :  { %2117 = vmatpush.bf16.msra.mxu0 %v6455_v14  ;;  %2137 = vmatpush.bf16.msra.mxu2 %v6457_v41 }
 0x13b   :  { %1931 = vmatpush.bf16.msra.mxu1 %v6438_v17 }
 0x13d   :  { %2118 = vmatpush.bf16.msra.mxu0 %v6454_v22  ;;  %2138 = vmatpush.bf16.msra.mxu2 %v6456_v48  ;;  %v6473_v48 = vld [vmem:[%s8534_s3 + $0x230] sm:$0xff] }
 0x13f   :  { %1932 = vmatpush.bf16.msra.mxu1 %v6437_v15 }
 0x141   :  { %2119 = vmatpush.bf16.msra.mxu0 %v6453_v33 }
 0x143   :  { %1933 = vmatpush.bf16.msra.mxu1 %v6436_v31 }
 0x145   :  { %2120 = vmatpush.bf16.msra.mxu0 %v6452_v36 }
 0x147   :  { %1934 = vmatpush.bf16.msra.mxu1 %v6435_v39 }
 0x149   :  { %2121 = vmatpush.bf16.msra.mxu0 %v6451_v47 }
 0x14b   :  { %1935 = vmatpush.bf16.msra.mxu1 %v6434_v46 }
 0x163   :  { %v746_v49 = vpop.permute.xlu0 %745 }
 0x164   :  { %761 = vst.msk [vmem:[#allocation2] sm:$0xfe] %vm760_vm4, %v746_v49 }
 0x165   :  { %765 = vst.msk [vmem:[#allocation2 + $0x10] sm:$0x1] %vm764_vm5, %v746_v49 }
 0x16a   :  { %v750_v54 = vpop.permute.xlu1 %749 }
 0x16b   :  { %768 = vst.msk [vmem:[#allocation2 + $0x20] sm:$0xfe] %vm760_vm4, %v750_v54  ;;  %v748_v55 = vpop.permute.xlu0 %747  ;;  %v1455_v61 = vld [vmem:[#allocation2] sm:$0xff] }
 0x16c   :  { %770 = vst.msk [vmem:[#allocation2 + $0x30] sm:$0x1] %vm764_vm5, %v750_v54  ;;  %v754_v56 = vsel %vm753_vm6, %v746_v49, %v748_v55  ;;  %v2147_v52 = vld [vmem:[#allocation2] sm:$0xfc]  ;;  %v2149_v53 = vld [vmem:[#allocation2 + $0x10] sm:$0x3] }
 0x16d   :  { %763 = vst.msk [vmem:[#allocation2 + $0x8] sm:$0xfe] %vm762_vm7, %v754_v56  ;;  %v6450_v55 = vld [vmem:[%s8534_s3 + $0x178] sm:$0xff]  ;;  %v1770_v33 = vld [vmem:[#allocation2] sm:$0xfe] }
 0x16e   :  { %767 = vst.msk [vmem:[#allocation2 + $0x18] sm:$0x1] %vm766_vm8, %v754_v56  ;;  %2122 = vmatpush.bf16.msra.mxu0 %v6450_v55  ;;  %v1772_v34 = vld [vmem:[#allocation2 + $0x10] sm:$0x1] }
 0x16f   :  { %v1788_v41 = vrot.slane %v1772_v34, 1 }
 0x172   :  { %v752_v60 = vpop.permute.xlu1 %751  ;;  %v1457_v62 = vld [vmem:[#allocation2 + $0x20] sm:$0xff]  ;;  %2123 = vmatpush.bf16.msra.mxu0 %v6449_v58 }
 0x173   :  { %v755_v0 = vsel %vm753_vm6, %v750_v54, %v752_v60  ;;  %v1459_v1 = vpack.c.bf16 %v1457_v62, %v1455_v61  ;;  %v2151_v49 = vld [vmem:[#allocation2 + $0x20] sm:$0xfc]  ;;  %v2153_v50 = vld [vmem:[#allocation2 + $0x30] sm:$0x3]  ;;  %v2163_v60 = vrot.slane %v2147_v52, 2  ;;  %v2164_v61 = vrot.slane %v2149_v53, 2 }
 0x174   :  { %769 = vst.msk [vmem:[#allocation2 + $0x28] sm:$0xfe] %vm762_vm7, %v755_v0  ;;  %v1456_v8 = vld [vmem:[#allocation2 + $0x8] sm:$0xff]  ;;  %v6433_v54 = vld [vmem:[%s8534_s3 + $0xf0] sm:$0xff]  ;;  %v2169_v56 = vrot.slane %v2151_v49, 2  ;;  %v2170_v57 = vrot.slane %v2153_v50, 2 }
 0x175   :  { %771 = vst.msk [vmem:[#allocation2 + $0x38] sm:$0x1] %vm766_vm8, %v755_v0  ;;  %1750 = vmatmul.bf16.vlgmr.msrb.gmra.mxu2 %v1459_v1  ;;  %v1771_v24 = vld [vmem:[#allocation2 + $0x8] sm:$0xfe]  ;;  %v1773_v25 = vld [vmem:[#allocation2 + $0x18] sm:$0x1]  ;;  %1936 = vmatpush.bf16.msra.mxu1 %v6433_v54  ;;  %v2165_v0 = vsel %vm184_vm0, %v2163_v60, %v2164_v61 }
 0x176   :  { %v1790_v29 = vrot.slane %v1771_v24, 1  ;;  %v1791_v30 = vrot.slane %v1773_v25, 1  ;;  %v2171_v62 = vsel %vm184_vm0, %v2169_v56, %v2170_v57  ;;  %2124 = vmatpush.bf16.msra.mxu0 %v6448_v63  ;;  %v6472_v50 = vld [vmem:[%s8534_s3 + $0x228] sm:$0xff]  ;;  %v6471_v53 = vld [vmem:[%s8534_s3 + $0x220] sm:$0xff]  ;;  %v2150_v55 = vld [vmem:[#allocation2 + $0x18] sm:$0x3] }
 0x177   :  { %v2179_v1 = vpack.c.bf16 %v2171_v62, %v2165_v0  ;;  %v2148_v54 = vld [vmem:[#allocation2 + $0x8] sm:$0xfc] }
 0x178   :  { %v1792_v37 = vsel %vm1786_vm9, %v1790_v29, %v1791_v30  ;;  %v6475_v29 = vld [vmem:[%s8534_s3 + $0x240] sm:$0xff]  ;;  %v2166_v58 = vrot.slane %v2148_v54, 2 }
 0x17b   :  { %v1458_v9 = vld [vmem:[#allocation2 + $0x28] sm:$0xff] }
 0x17c   :  { %v1460_v11 = vpack.c.bf16 %v1458_v9, %v1456_v8  ;;  %v1775_v20 = vld [vmem:[#allocation2 + $0x28] sm:$0xfe]  ;;  %v1777_v21 = vld [vmem:[#allocation2 + $0x38] sm:$0x1]  ;;  %v6477_v9 = vld [vmem:[%s8534_s3 + $0x250] sm:$0xff] }
 0x17d   :  { %v1796_v27 = vrot.slane %v1775_v20, 1  ;;  %v1797_v28 = vrot.slane %v1777_v21, 1  ;;  %v2154_v52 = vld [vmem:[#allocation2 + $0x38] sm:$0x3] }
 0x17e   :  { %5191 = vmatmul.msk.bf16.vlgmr.msrb.gmra.mxu3 %vm41_vm2, %v1460_v11  ;;  %v2173_v57 = vrot.slane %v2154_v52, 2 }
 0x17f   :  { %2305 = vmatpush.bf16.msrb.mxu3 %v6470_v7  ;;  %v1798_v35 = vsel %vm1786_vm9, %v1796_v27, %v1797_v28 }
 0x180   :  { %v1804_v40 = vpack.c.bf16 %v1798_v35, %v1792_v37 }
 0x183   :  { %2306 = vmatpush.bf16.msrb.mxu3 %v6469_v16 }
 0x187   :  { %2307 = vmatpush.bf16.msrb.mxu3 %v6468_v23  ;;  %v6476_v23 = vld [vmem:[%s8534_s3 + $0x248] sm:$0xff] }
 0x18a   :  { %v1433_v26 = vpop.permute.xlu2 %1432 }
 0x18b   :  { %1447 = vst.msk [vmem:[#allocation2 + $0x40] sm:$0xfe] %vm760_vm4, %v1433_v26  ;;  %2308 = vmatpush.bf16.msrb.mxu3 %v6467_v45  ;;  %v1776_v45 = vld [vmem:[#allocation2 + $0x30] sm:$0x1] }
 0x18c   :  { %1449 = vst.msk [vmem:[#allocation2 + $0x50] sm:$0x1] %vm764_vm5, %v1433_v26 }
 0x18e   :  { %5282 = vmatmul.msk.bf16.vlgmr.msra.gmra.mxu3 %vm41_vm2, %v1804_v40  ;;  %v1787_v40 = vrot.slane %v1770_v33, 1  ;;  %v6485_v33 = vld [vmem:[%s8536_s5 + $0x38] sm:$0xff] }
 0x18f   :  { %2309 = vmatpush.bf16.msrb.mxu3 %v6466_v38  ;;  %v1794_v38 = vrot.slane %v1776_v45, 1 }
 0x190   :  { %v1789_v47 = vsel %vm1786_vm9, %v1787_v40, %v1788_v41 }
 0x192   :  { %v1435_v42 = vpop.permute.xlu2 %1434  ;;  %v1491_v6 = vld [vmem:[#allocation2 + $0x40] sm:$0xff] }
 0x193   :  { %v1440_v43 = vsel %vm753_vm6, %v1433_v26, %v1435_v42  ;;  %2310 = vmatpush.bf16.msrb.mxu3 %v6465_v44  ;;  %v1774_v26 = vld [vmem:[#allocation2 + $0x20] sm:$0xfe]  ;;  %v1961_v28 = vld [vmem:[#allocation2 + $0x50] sm:$0x1]  ;;  %v6474_v42 = vld [vmem:[%s8534_s3 + $0x238] sm:$0xff] }
 0x194   :  { %1448 = vst.msk [vmem:[#allocation2 + $0x48] sm:$0xfe] %vm762_vm7, %v1440_v43  ;;  %v1959_v27 = vld [vmem:[#allocation2 + $0x40] sm:$0xfe]  ;;  %v1976_v36 = vrot.slane %v1961_v28, 1  ;;  %v1793_v37 = vrot.slane %v1774_v26, 1 }
 0x195   :  { %1450 = vst.msk [vmem:[#allocation2 + $0x58] sm:$0x1] %vm766_vm8, %v1440_v43  ;;  %v1975_v35 = vrot.slane %v1959_v27, 1  ;;  %v6619_v26 = vld [vmem:[%s8535_s4] ss:$0 sm:$0xff] }
 0x196   :  { %v1795_v44 = vsel %vm1786_vm9, %v1793_v37, %v1794_v38 }
 0x197   :  { %2311 = vmatpush.bf16.msrb.mxu3 %v6464_v51  ;;  %v1977_v43 = vsel %vm1786_vm9, %v1975_v35, %v1976_v36  ;;  %v1803_v49 = vpack.c.bf16 %v1795_v44, %v1789_v47  ;;  %v2152_v51 = vld [vmem:[#allocation2 + $0x28] sm:$0xfc] }
 0x198   :  { %v2172_v56 = vrot.slane %v2152_v51, 2 }
 0x19a   :  { %v2174_v60 = vsel %vm184_vm0, %v2172_v56, %v2173_v57  ;;  %v6486_v56 = vld [vmem:[%s8536_s5 + $0x40] sm:$0xff] }
 0x19b   :  { %2312 = vmatpush.bf16.msrb.mxu3 %v6463_v59  ;;  %v1960_v4 = vld [vmem:[#allocation2 + $0x48] sm:$0xfe]  ;;  %v2167_v59 = vrot.slane %v2150_v55, 2  ;;  %v6484_v55 = vld [vmem:[%s8536_s5 + $0x30] sm:$0xff]  ;;  %v6494_v57 = vld [vmem:[%s8536_s5 + $0x80] sm:$0xff] }
 0x19c   :  { %v1962_v5 = vld [vmem:[#allocation2 + $0x58] sm:$0x1]  ;;  %v1492_v10 = vld [vmem:[#allocation2 + $0x48] sm:$0xff]  ;;  %v1978_v13 = vrot.slane %v1960_v4, 1  ;;  %2501 = vmatpush.bf16.msrb.mxu2 %v6494_v57 }
 0x19d   :  { %v1979_v14 = vrot.slane %v1962_v5, 1  ;;  %v2168_v61 = vsel %vm184_vm0, %v2166_v58, %v2167_v59  ;;  %v6483_v58 = vld [vmem:[%s8536_s5 + $0x28] sm:$0xff] }
 0x19e   :  { %2313 = vmatmul.bf16.vlgmr.msrb.gmra.mxu3 %v2179_v1  ;;  %v2180_v62 = vpack.c.bf16 %v2174_v60, %v2168_v61  ;;  %v6503_v59 = vld [vmem:[%s8536_s5 + $0xc8] sm:$0xff]  ;;  %v6512_v60 = vld [vmem:[%s8536_s5 + $0x110] sm:$0xff]  ;;  %v6493_v61 = vld [vmem:[%s8536_s5 + $0x78] sm:$0xff] }
 0x19f   :  { %v1980_v21 = vsel %vm1786_vm9, %v1978_v13, %v1979_v14  ;;  %2724 = vmatpush.bf16.msra.mxu3 %v6503_v59 }
 0x1a0   :  { %2502 = vmatpush.bf16.msrb.mxu2 %v6493_v61 }
 0x1a9   :  { %v1437_v2 = vpop.permute.xlu0 %1436 }
 0x1aa   :  { %v1439_v19 = vpop.permute.xlu1 %1438  ;;  %1451 = vst.msk [vmem:[#allocation2 + $0x60] sm:$0xfe] %vm760_vm4, %v1437_v2 }
 0x1ab   :  { %v1441_v3 = vsel %vm753_vm6, %v1437_v2, %v1439_v19  ;;  %1453 = vst.msk [vmem:[#allocation2 + $0x70] sm:$0x1] %vm764_vm5, %v1437_v2 }
 0x1ac   :  { %1452 = vst.msk [vmem:[#allocation2 + $0x68] sm:$0xfe] %vm762_vm7, %v1441_v3 }
 0x1ad   :  { %1454 = vst.msk [vmem:[#allocation2 + $0x78] sm:$0x1] %vm766_vm8, %v1441_v3 }
 0x1b1   :  { %v1493_v7 = vld [vmem:[#allocation2 + $0x60] sm:$0xff] }
 0x1b2   :  { %v1495_v8 = vpack.c.bf16 %v1493_v7, %v1491_v6  ;;  %v1963_v24 = vld [vmem:[#allocation2 + $0x60] sm:$0xfe]  ;;  %v1965_v25 = vld [vmem:[#allocation2 + $0x70] sm:$0x1] }
 0x1b3   :  { %v1494_v11 = vld [vmem:[#allocation2 + $0x68] sm:$0xff]  ;;  %v1981_v30 = vrot.slane %v1963_v24, 1  ;;  %v1982_v31 = vrot.slane %v1965_v25, 1 }
 0x1b4   :  { %v1964_v12 = vld [vmem:[#allocation2 + $0x68] sm:$0xfe]  ;;  %1629 = vmatmul.bf16.vlgmr.msrb.gmra.mxu0 %v1495_v8  ;;  %v1496_v16 = vpack.c.bf16 %v1494_v11, %v1492_v10  ;;  %v1966_v17 = vld [vmem:[#allocation2 + $0x78] sm:$0x1] }
 0x1b5   :  { %v1984_v18 = vrot.slane %v1964_v12, 1  ;;  %v1985_v20 = vrot.slane %v1966_v17, 1  ;;  %v1983_v39 = vsel %vm1786_vm9, %v1981_v30, %v1982_v31  ;;  %v6495_v31 = vld [vmem:[%s8536_s5 + $0x88] sm:$0xff] }
 0x1b6   :  { %5130 = vmatmul.msk.bf16.vlgmr.msrb.gmra.mxu1 %vm41_vm2, %v1496_v16  ;;  %v1991_v46 = vpack.c.bf16 %v1983_v39, %v1977_v43  ;;  %2522 = vmatpush.bf16.msrb.mxu0 %v6495_v31  ;;  %v6507_v31 = vld [vmem:[%s8536_s5 + $0xe8] sm:$0xff] }
 0x1b7   :  { %v1986_v22 = vsel %vm1786_vm9, %v1984_v18, %v1985_v20  ;;  %2320 = vmatpush.bf16.msrb.mxu1 %v6477_v9 }
 0x1b8   :  { %v1992_v15 = vpack.c.bf16 %v1986_v22, %v1980_v21 }
 0x1ba   :  { %5373 = vmatmul.msk.bf16.vlgmr.msra.gmra.mxu2 %vm41_vm2, %v1992_v15 }
 0x1bb   :  { %2321 = vmatpush.bf16.msrb.mxu1 %v6476_v23 }
 0x1bf   :  { %2322 = vmatpush.bf16.msrb.mxu1 %v6475_v29 }
 0x1c3   :  { %2323 = vmatpush.bf16.msrb.mxu1 %v6474_v42 }
 0x1c4   :  { %2125 = vmatmul.bf16.vlgmr.msra.gmra.mxu0 %v1991_v46 }
 0x1c5   :  { %2586 = vmatpush.bf16.msra.mxu0 %v6485_v33  ;;  %v6519_v33 = vld [vmem:[%s8536_s5 + $0x148] sm:$0xff] }
 0x1c6   :  { %1937 = vmatmul.bf16.vlgmr.msra.gmra.mxu1 %v1803_v49 }
 0x1c7   :  { %2324 = vmatpush.bf16.msrb.mxu1 %v6473_v48 }
 0x1c9   :  { %2587 = vmatpush.bf16.msra.mxu0 %v6484_v55 }
 0x1cb   :  { %2325 = vmatpush.bf16.msrb.mxu1 %v6472_v50 }
 0x1cd   :  { %2588 = vmatpush.bf16.msra.mxu0 %v6483_v58 }
 0x1cf   :  { %2326 = vmatpush.bf16.msrb.mxu1 %v6471_v53 }
 0x1d3   :  { %2607 = vmatpush.bf16.msra.mxu1 %v6486_v56 }
 0x1d6   :  { %5464 = vmatmul.msk.bf16.vlgmr.msrb.gmra.mxu1 %vm41_vm2, %v2180_v62  ;;  %v6502_v62 = vld [vmem:[%s8536_s5 + $0xc0] sm:$0xff] }
 0x1d7   :  { %2865 = vmatpush.bf16.msrb.mxu1 %v6512_v60  ;;  %2725 = vmatpush.bf16.msra.mxu3 %v6502_v62 }
 0x1f8   :  { %v1751_v3 = vpop.f32.mrf.mxu2 }
 0x200   :  { %v1753_v8 = vpop.f32.mrf.mxu2 }
 0x201   :  { %v1765_v63 = vpop.f32.mrf.mxu3 }
 0x209   :  { %v1767_v0 = vpop.f32.mrf.mxu3 }
 0x211   :  { %v1952_v4 = vpop.f32.mrf.mxu3 }
 0x219   :  { %v1954_v9 = vpop.f32.mrf.mxu3 }
 0x221   :  { %v2314_v20 = vpop.f32.mrf.mxu3 }
 0x229   :  { %v2316_v37 = vpop.f32.mrf.mxu3 }
 0x231   :  { %v1630_v2 = vpop.f32.mrf.mxu0 }
 0x233   :  { %v1644_v1 = vpop.f32.mrf.mxu1 }
 0x234   :  { %v1645_v7 = vadd.f32 %v1644_v1, %v1630_v2  ;;  %v6492_v1 = vld [vmem:[%s8536_s5 + $0x70] sm:$0xff]  ;;  %v6501_v2 = vld [vmem:[%s8536_s5 + $0xb8] sm:$0xff] }
 0x235   :  { %2503 = vmatpush.bf16.msrb.mxu2 %v6492_v1  ;;  %2726 = vmatpush.bf16.msra.mxu3 %v6501_v2 }
 0x236   :  { %v1752_v10 = vadd.f32 %v1751_v3, %v1645_v7  ;;  %v2392_v3 = vld [vmem:[#allocation3 + $0x8] sm:$0xfe]  ;;  %v6481_v7 = vld [vmem:[%s8536_s5 + $0x18] sm:$0xff] }
 0x238   :  { %v1766_v16 = vadd.f32 %v1765_v63, %v1752_v10  ;;  %v6511_v63 = vld [vmem:[%s8536_s5 + $0x108] sm:$0xff] }
 0x239   :  { %v1632_v5 = vpop.f32.mrf.mxu0  ;;  %2866 = vmatpush.bf16.msrb.mxu1 %v6511_v63  ;;  %v2370_v10 = vld [vmem:[#allocation3 + $0x28] sm:$0xff] }
 0x23b   :  { %v1646_v19 = vpop.f32.mrf.mxu1 }
 0x23c   :  { %v1647_v14 = vadd.f32 %v1646_v19, %v1632_v5  ;;  %v6510_v19 = vld [vmem:[%s8536_s5 + $0x100] sm:$0xff]  ;;  %v2394_v5 = vld [vmem:[#allocation3 + $0x18] sm:$0x1] }
 0x23d   :  { %v2140_v17 = vpop.f32.mrf.mxu2  ;;  %2867 = vmatpush.bf16.msrb.mxu1 %v6510_v19 }
 0x23e   :  { %v1754_v21 = vadd.f32 %v1753_v8, %v1647_v14  ;;  %v2396_v8 = vld [vmem:[#allocation3 + $0x28] sm:$0xfe] }
 0x240   :  { %v1768_v27 = vadd.f32 %v1767_v0, %v1754_v21  ;;  %v6482_v0 = vld [vmem:[%s8536_s5 + $0x20] sm:$0xff] }
 0x241   :  { %v2126_v13 = vpop.f32.mrf.mxu0  ;;  %2589 = vmatpush.bf16.msra.mxu0 %v6482_v0 }
 0x242   :  { %v2141_v22 = vadd.f32 %v2140_v17, %v2126_v13  ;;  %v2416_v13 = vrot.slane %v2396_v8, 1  ;;  %v6500_v17 = vld [vmem:[%s8536_s5 + $0xb0] sm:$0xff] }
 0x243   :  { %v1938_v6 = vpop.f32.mrf.mxu1  ;;  %2727 = vmatpush.bf16.msra.mxu3 %v6500_v17 }
 0x244   :  { %v1953_v12 = vadd.f32 %v1952_v4, %v1938_v6  ;;  %v2368_v4 = vld [vmem:[#allocation3 + $0x8] sm:$0xff]  ;;  %v2410_v6 = vrot.slane %v2392_v3, 1 }
 0x245   :  { %v2142_v34 = vpop.f32.mrf.mxu2  ;;  %v2372_v14 = vpack.c.bf16 %v2370_v10, %v2368_v4  ;;  %2590 = vmatpush.bf16.msra.mxu0 %v6481_v7 }
 0x246   :  { %v1957_v18 = vadd.f32 %v1953_v12, %v1766_v16  ;;  %v2398_v12 = vld [vmem:[#allocation3 + $0x38] sm:$0x1] }
 0x247   :  { %v2417_v16 = vrot.slane %v2398_v12, 1  ;;  %5556 = vmatmul.msk.bf16.vlgmr.msra.gmra.mxu1 %vm59_vm10, %v2372_v14 }
 0x248   :  { %v2145_v24 = vadd.f32 %v2141_v22, %v1957_v18  ;;  %v6509_v18 = vld [vmem:[%s8536_s5 + $0xf8] sm:$0xff] }
 0x249   :  { %v2128_v45 = vpop.f32.mrf.mxu0  ;;  %v2418_v21 = vsel %vm1786_vm9, %v2416_v13, %v2417_v16  ;;  %2868 = vmatpush.bf16.msrb.mxu1 %v6509_v18 }
 0x24a   :  { %v2143_v35 = vadd.f32 %v2142_v34, %v2128_v45  ;;  %v6488_v34 = vld [vmem:[%s8536_s5 + $0x50] sm:$0xff] }
 0x24b   :  { %v1940_v11 = vpop.f32.mrf.mxu1 }
 0x24c   :  { %v1955_v15 = vadd.f32 %v1954_v9, %v1940_v11  ;;  %v2411_v9 = vrot.slane %v2394_v5, 1  ;;  %v6491_v11 = vld [vmem:[%s8536_s5 + $0x68] sm:$0xff] }
 0x24d   :  { %2504 = vmatpush.bf16.msrb.mxu2 %v6491_v11 }
 0x24e   :  { %v1958_v29 = vadd.f32 %v1955_v15, %v1768_v27  ;;  %v2412_v32 = vsel %vm1786_vm9, %v2410_v6, %v2411_v9  ;;  %v6499_v15 = vld [vmem:[%s8536_s5 + $0xa8] sm:$0xff]  ;;  %v6521_v27 = vld [vmem:[%s8536_s5 + $0x158] sm:$0xff] }
 0x24f   :  { %v2424_v22 = vpack.c.bf16 %v2418_v21, %v2412_v32  ;;  %2728 = vmatpush.bf16.msra.mxu3 %v6499_v15  ;;  %v6522_v32 = vld [vmem:[%s8536_s5 + $0x160] sm:$0xff]  ;;  %v2615_v15 = vld [vmem:[#allocation3 + $0x8] sm:$0xfc] }
 0x250   :  { %v2146_v40 = vadd.f32 %v2143_v35, %v1958_v29  ;;  %v6489_v29 = vld [vmem:[%s8536_s5 + $0x58] sm:$0xff] }
 0x251   :  { %5519 = vmatmul.msk.bf16.vlgmr.msrb.gmra.mxu0 %vm59_vm10, %v2424_v22  ;;  %v6497_v35 = vld [vmem:[%s8536_s5 + $0x98] sm:$0xff] }
 0x253   :  { %v2328_v23 = vpop.f32.mrf.mxu1 }
 0x254   :  { %v2329_v25 = vadd.f32 %v2328_v23, %v2314_v20  ;;  %v6480_v20 = vld [vmem:[%s8536_s5 + $0x10] sm:$0xff]  ;;  %v6490_v23 = vld [vmem:[%s8536_s5 + $0x60] sm:$0xff] }
 0x255   :  { %2591 = vmatpush.bf16.msra.mxu0 %v6480_v20  ;;  %2505 = vmatpush.bf16.msrb.mxu2 %v6490_v23 }
 0x256   :  { %v2333_v28 = vadd.f32 %v2329_v25, %v2145_v24  ;;  %v6508_v24 = vld [vmem:[%s8536_s5 + $0xf0] sm:$0xff]  ;;  %v6479_v25 = vld [vmem:[%s8536_s5 + $0x8] sm:$0xff] }
 0x257   :  { %2869 = vmatpush.bf16.msrb.mxu1 %v6508_v24 }
 0x258   :  { %v2339_v30 = vadd.f32 %v6619_v26, %v2333_v28  ;;  %v6520_v28 = vld [vmem:[%s8536_s5 + $0x150] sm:$0xff] }
 0x259   :  { %2592 = vmatpush.bf16.msra.mxu0 %v6479_v25  ;;  %2506 = vmatpush.bf16.msrb.mxu2 %v6489_v29  ;;  %v2757_v29 = vld [vmem:[#allocation3 + $0x18] sm:$0x7] }
 0x25a   :  { %v2341_v36 = vsub.f32 0.0, %v2339_v30  ;;  %v6498_v30 = vld [vmem:[%s8536_s5 + $0xa0] sm:$0xff] }
 0x25b   :  { %v2330_v38 = vpop.f32.mrf.mxu1  ;;  %2729 = vmatpush.bf16.msra.mxu3 %v6498_v30  ;;  %2870 = vmatpush.bf16.msrb.mxu1 %v6507_v31  ;;  %v2759_v30 = vld [vmem:[#allocation3 + $0x28] sm:$0xf8]  ;;  %v2761_v31 = vld [vmem:[#allocation3 + $0x38] sm:$0x7] }
 0x25c   :  { %v2343_v39 = vmul.f32 1.442695, %v2341_v36  ;;  %v2331_v41 = vadd.f32 %v2330_v38, %v2316_v37  ;;  %v6506_v36 = vld [vmem:[%s8536_s5 + $0xe0] sm:$0xff]  ;;  %v6487_v38 = vld [vmem:[%s8536_s5 + $0x48] sm:$0xff] }
 0x25d   :  { %v6518_v37 = vld [vmem:[%s8536_s5 + $0x140] sm:$0xff]  ;;  %2507 = vmatpush.bf16.msrb.mxu2 %v6488_v34 }
 0x25e   :  { %6655 = vpow2.f32 %v2343_v39  ;;  %v2334_v42 = vadd.f32 %v2331_v41, %v2146_v40  ;;  %v6496_v39 = vld [vmem:[%s8536_s5 + $0x90] sm:$0xff]  ;;  %v6505_v40 = vld [vmem:[%s8536_s5 + $0xd8] sm:$0xff] }
 0x25f   :  { %2730 = vmatpush.bf16.msra.mxu3 %v6497_v35  ;;  %2871 = vmatpush.bf16.msrb.mxu1 %v6506_v36  ;;  %v6517_v41 = vld [vmem:[%s8536_s5 + $0x138] sm:$0xff] }
 0x260   :  { %v2340_v43 = vadd.f32 %v6619_v26, %v2334_v42  ;;  %v6478_v26 = vld [vmem:[%s8536_s5] sm:$0xff]  ;;  %v6504_v42 = vld [vmem:[%s8536_s5 + $0xd0] sm:$0xff] }
 0x261   :  { %2593 = vmatpush.bf16.msra.mxu0 %v6478_v26  ;;  %2508 = vmatpush.bf16.msrb.mxu2 %v6487_v38  ;;  %v2617_v26 = vld [vmem:[#allocation3 + $0x18] sm:$0x3] }
 0x262   :  { %v2342_v44 = vsub.f32 0.0, %v2340_v43  ;;  %v6516_v43 = vld [vmem:[%s8536_s5 + $0x130] sm:$0xff]  ;;  %v2634_v38 = vrot.slane %v2617_v26, 2 }
 0x263   :  { %2731 = vmatpush.bf16.msra.mxu3 %v6496_v39  ;;  %2872 = vmatpush.bf16.msrb.mxu1 %v6505_v40 }
 0x264   :  { %v6656_v46 = vpop.eup %6655  ;;  %v2345_v47 = vmul.f32 1.442695, %v2342_v44  ;;  %v6513_v44 = vld [vmem:[%s8536_s5 + $0x118] sm:$0xff] }
 0x265   :  { %v2347_v48 = vadd.f32 1.0, %v6656_v46  ;;  %3006 = vmatpush.bf16.msrb.mxu0 %v6521_v27  ;;  %v6515_v46 = vld [vmem:[%s8536_s5 + $0x128] sm:$0xff]  ;;  %2886 = vmatpush.bf16.msra.mxu2 %v6513_v44  ;;  %v2781_v44 = vrot.slane %v2761_v31, 3 }
 0x266   :  { %6657 = vpow2.f32 %v2345_v47  ;;  %v6514_v47 = vld [vmem:[%s8536_s5 + $0x120] sm:$0xff]  ;;  %v2619_v27 = vld [vmem:[#allocation3 + $0x28] sm:$0xfc] }
 0x267   :  { %6659 = vrcp.f32 %v2347_v48  ;;  %2745 = vmatpush.bf16.msrb.mxu3 %v6504_v42  ;;  %v2639_v39 = vrot.slane %v2619_v27, 2  ;;  %v2775_v42 = vrot.slane %v2757_v29, 3 }
 0x269   :  { %3007 = vmatpush.bf16.msrb.mxu0 %v6520_v28  ;;  %v2621_v28 = vld [vmem:[#allocation3 + $0x38] sm:$0x3] }
 0x26a   :  { %v2640_v40 = vrot.slane %v2621_v28, 2  ;;  %v6620_v28 = vld [vmem:[%s8537_s6] ss:$0 sm:$0xff] }
 0x26c   :  { %v6658_v49 = vpop.eup %6657 }
 0x26d   :  { %v6660_v50 = vpop.eup %6659  ;;  %v2348_v51 = vadd.f32 1.0, %v6658_v49  ;;  %3008 = vmatpush.bf16.msrb.mxu0 %v6519_v33 }
 0x26e   :  { %v2353_v52 = vrot.slane %v6660_v50, 6 }
 0x26f   :  { %6661 = vrcp.f32 %v2348_v51 }
 0x270   :  { %2355 = vrot.lane.b32.xlu2 %v2353_v52, %s6705_s16 }
 0x271   :  { %3009 = vmatpush.bf16.msrb.mxu0 %v6518_v37  ;;  %v2633_v37 = vrot.slane %v2615_v15, 2 }
 0x275   :  { %v6662_v53 = vpop.eup %6661  ;;  %3010 = vmatpush.bf16.msrb.mxu0 %v6517_v41 }
 0x276   :  { %v2354_v54 = vrot.slane %v6662_v53, 6 }
 0x278   :  { %2357 = vrot.lane.b32.xlu0 %v2354_v54, %s6705_s16 }
 0x279   :  { %3011 = vmatpush.bf16.msrb.mxu0 %v6516_v43  ;;  %v2780_v43 = vrot.slane %v2759_v30, 3 }
 0x27d   :  { %3012 = vmatpush.bf16.msrb.mxu0 %v6515_v46 }
 0x281   :  { %3013 = vmatpush.bf16.msrb.mxu0 %v6514_v47 }
 0x2ca   :  { %v2356_v45 = vpop.permute.xlu2 %2355 }
 0x2cb   :  { %2362 = vst.msk [vmem:[#allocation3] sm:$0xfc] %vm2361_vm12, %v2356_v45 }
 0x2cc   :  { %2364 = vst.msk [vmem:[#allocation3 + $0x10] sm:$0x3] %vm2363_vm13, %v2356_v45  ;;  %v2755_v45 = vld [vmem:[#allocation3 + $0x8] sm:$0xf8] }
 0x2cd   :  { %v2774_v41 = vrot.slane %v2755_v45, 3 }
 0x2d2   :  { %v2391_v49 = vld [vmem:[#allocation3] sm:$0xfe] }
 0x2d3   :  { %v2614_v50 = vld [vmem:[#allocation3] sm:$0xfc]  ;;  %v2393_v51 = vld [vmem:[#allocation3 + $0x10] sm:$0x1]  ;;  %v2407_v55 = vrot.slane %v2391_v49, 1  ;;  %v2641_v49 = vsel %vm184_vm0, %v2639_v39, %v2640_v40  ;;  %v6548_v39 = vld [vmem:[%s8538_s7 + $0xc8] sm:$0xff] }
 0x2d4   :  { %v2616_v52 = vld [vmem:[#allocation3 + $0x10] sm:$0x3]  ;;  %v2754_v53 = vld [vmem:[#allocation3] sm:$0xf8]  ;;  %v2408_v57 = vrot.slane %v2393_v51, 1  ;;  %v2630_v58 = vrot.slane %v2614_v50, 2  ;;  %v2776_v50 = vsel %vm2770_vm14, %v2774_v41, %v2775_v42  ;;  %v2782_v51 = vsel %vm2770_vm14, %v2780_v43, %v2781_v44 }
 0x2d5   :  { %v2756_v54 = vld [vmem:[#allocation3 + $0x10] sm:$0x7]  ;;  %v2367_v56 = vld [vmem:[#allocation3] sm:$0xff]  ;;  %v2631_v59 = vrot.slane %v2616_v52, 2  ;;  %v2771_v60 = vrot.slane %v2754_v53, 3 }
 0x2d6   :  { %v2772_v0 = vrot.slane %v2756_v54, 3  ;;  %v2409_v11 = vsel %vm1786_vm9, %v2407_v55, %v2408_v57  ;;  %v2895_v22 = vld [vmem:[#allocation3] sm:$0xf0]  ;;  %v2897_v23 = vld [vmem:[#allocation3 + $0x10] sm:$0xf]  ;;  %v2788_v54 = vpack.c.bf16 %v2782_v51, %v2776_v50 }
 0x2d7   :  { %v2632_v13 = vsel %vm184_vm0, %v2630_v58, %v2631_v59  ;;  %v2912_v33 = vrot.slane %v2895_v22, 4  ;;  %v2913_v34 = vrot.slane %v2897_v23, 4  ;;  %v2896_v55 = vld [vmem:[#allocation3 + $0x8] sm:$0xf0]  ;;  %v2902_v58 = vld [vmem:[#allocation3 + $0x38] sm:$0xf] }
 0x2d8   :  { %v2773_v18 = vsel %vm2770_vm14, %v2771_v60, %v2772_v0  ;;  %v2900_v57 = vld [vmem:[#allocation3 + $0x28] sm:$0xf0]  ;;  %v2915_v59 = vrot.slane %v2896_v55, 4  ;;  %v6557_v40 = vld [vmem:[%s8538_s7 + $0x110] sm:$0xff] }
 0x2d9   :  { %v2914_v47 = vsel %vm2911_vm15, %v2912_v33, %v2913_v34  ;;  %v6530_v34 = vld [vmem:[%s8538_s7 + $0x38] sm:$0xff]  ;;  %v6529_v43 = vld [vmem:[%s8538_s7 + $0x30] sm:$0xff] }
 0x2ea   :  { %v2358_v48 = vpop.permute.xlu0 %2357 }
 0x2eb   :  { %2365 = vst.msk [vmem:[#allocation3 + $0x20] sm:$0xfc] %vm2361_vm12, %v2358_v48 }
 0x2ec   :  { %2366 = vst.msk [vmem:[#allocation3 + $0x30] sm:$0x3] %vm2363_vm13, %v2358_v48  ;;  %v2635_v48 = vsel %vm184_vm0, %v2633_v37, %v2634_v38  ;;  %v6539_v38 = vld [vmem:[%s8538_s7 + $0x80] sm:$0xff] }
 0x2ed   :  { %v2647_v53 = vpack.c.bf16 %v2641_v49, %v2635_v48 }
 0x2f2   :  { %v2369_v61 = vld [vmem:[#allocation3 + $0x20] sm:$0xff] }
 0x2f3   :  { %v2395_v62 = vld [vmem:[#allocation3 + $0x20] sm:$0xfe]  ;;  %v2371_v1 = vpack.c.bf16 %v2369_v61, %v2367_v56  ;;  %v2397_v2 = vld [vmem:[#allocation3 + $0x30] sm:$0x1]  ;;  %v2898_v56 = vld [vmem:[#allocation3 + $0x18] sm:$0xf] }
 0x2f4   :  { %v2618_v63 = vld [vmem:[#allocation3 + $0x20] sm:$0xfc]  ;;  %v2413_v19 = vrot.slane %v2395_v62, 1  ;;  %v2620_v3 = vld [vmem:[#allocation3 + $0x30] sm:$0x3]  ;;  %v2414_v5 = vrot.slane %v2397_v2, 1  ;;  %v2524_v2 = vpop.f32.mrf.mxu0 }
 0x2f5   :  { %v2636_v4 = vrot.slane %v2618_v63, 2  ;;  %v2637_v6 = vrot.slane %v2620_v3, 2  ;;  %v2758_v7 = vld [vmem:[#allocation3 + $0x20] sm:$0xf8]  ;;  %v2760_v8 = vld [vmem:[#allocation3 + $0x30] sm:$0x7]  ;;  %2594 = vmatmul.bf16.vlgmr.msra.gmra.mxu0 %v2371_v1 }
 0x2f6   :  { %v2777_v9 = vrot.slane %v2758_v7, 3  ;;  %v2778_v10 = vrot.slane %v2760_v8, 3  ;;  %v2415_v12 = vsel %vm1786_vm9, %v2413_v19, %v2414_v5  ;;  %v2899_v24 = vld [vmem:[#allocation3 + $0x20] sm:$0xf0]  ;;  %v2901_v25 = vld [vmem:[#allocation3 + $0x30] sm:$0xf]  ;;  %v2609_v5 = vpop.f32.mrf.mxu1 }
 0x2f7   :  { %v2638_v14 = vsel %vm184_vm0, %v2636_v4, %v2637_v6  ;;  %v2423_v16 = vpack.c.bf16 %v2415_v12, %v2409_v11  ;;  %v2918_v35 = vrot.slane %v2899_v24, 4  ;;  %v2919_v36 = vrot.slane %v2901_v25, 4 }
 0x2f8   :  { %v2646_v17 = vpack.c.bf16 %v2638_v14, %v2632_v13  ;;  %v2779_v20 = vsel %vm2770_vm14, %v2777_v9, %v2778_v10  ;;  %v2916_v60 = vrot.slane %v2898_v56, 4  ;;  %v2921_v61 = vrot.slane %v2900_v57, 4 }
 0x2f9   :  { %v2787_v21 = vpack.c.bf16 %v2779_v20, %v2773_v18  ;;  %2509 = vmatmul.bf16.vlgmr.msrb.gmra.mxu2 %v2423_v16  ;;  %v2920_v46 = vsel %vm2911_vm15, %v2918_v35, %v2919_v36  ;;  %v2922_v62 = vrot.slane %v2902_v58, 4  ;;  %v6540_v35 = vld [vmem:[%s8538_s7 + $0x88] sm:$0xff]  ;;  %v6531_v36 = vld [vmem:[%s8538_s7 + $0x40] sm:$0xff] }
 0x2fa   :  { %2732 = vmatmul.bf16.vlgmr.msra.gmra.mxu3 %v2646_v17  ;;  %v2928_v52 = vpack.c.bf16 %v2920_v46, %v2914_v47  ;;  %v2917_v63 = vsel %vm2911_vm15, %v2915_v59, %v2916_v60  ;;  %3221 = vmatpush.bf16.msra.mxu1 %v6540_v35  ;;  %v6532_v35 = vld [vmem:[%s8538_s7 + $0x48] sm:$0xff] }
 0x2fb   :  { %2873 = vmatmul.bf16.vlgmr.msrb.gmra.mxu1 %v2787_v21  ;;  %3027 = vmatpush.bf16.msra.mxu3 %v6522_v32  ;;  %v2923_v0 = vsel %vm2911_vm15, %v2921_v61, %v2922_v62  ;;  %v6538_v62 = vld [vmem:[%s8538_s7 + $0x78] sm:$0xff] }
 0x2fc   :  { %v2929_v1 = vpack.c.bf16 %v2923_v0, %v2917_v63  ;;  %v2526_v19 = vpop.f32.mrf.mxu0  ;;  %3306 = vmatpush.bf16.msra.mxu0 %v6531_v36  ;;  %3200 = vmatpush.bf16.msrb.mxu2 %v6539_v38  ;;  %v6547_v63 = vld [vmem:[%s8538_s7 + $0xc0] sm:$0xff]  ;;  %v6556_v0 = vld [vmem:[%s8538_s7 + $0x108] sm:$0xff]  ;;  %v6541_v36 = vld [vmem:[%s8538_s7 + $0x90] sm:$0xff] }
 0x2fd   :  { %v6549_v38 = vld [vmem:[%s8538_s7 + $0xd0] sm:$0xff] }
 0x2fe   :  { %v2611_v10 = vpop.f32.mrf.mxu1  ;;  %3423 = vmatpush.bf16.msrb.mxu1 %v6548_v39 }
 0x300   :  { %3201 = vmatpush.bf16.msrb.mxu2 %v6538_v62 }
 0x302   :  { %3424 = vmatpush.bf16.msrb.mxu1 %v6547_v63 }
 0x305   :  { %3014 = vmatmul.bf16.vlgmr.msrb.gmra.mxu0 %v2928_v52 }
 0x306   :  { %3563 = vmatpush.bf16.msrb.mxu0 %v6557_v40  ;;  %v6558_v40 = vld [vmem:[%s8538_s7 + $0x118] sm:$0xff] }
 0x309   :  { %5666 = vmatmul.msk.bf16.vlgmr.msra.gmra.mxu2 %vm59_vm10, %v2788_v54 }
 0x30a   :  { %5611 = vmatmul.msk.bf16.vlgmr.msrb.gmra.mxu3 %vm59_vm10, %v2647_v53  ;;  %3564 = vmatpush.bf16.msrb.mxu0 %v6556_v0 }
 0x30b   :  { %3285 = vmatpush.bf16.msrb.mxu3 %v6530_v34  ;;  %v6523_v34 = vld [vmem:[%s8538_s7] sm:$0xff] }
 0x30f   :  { %3286 = vmatpush.bf16.msrb.mxu3 %v6529_v43 }
 0x31a   :  { %5721 = vmatmul.msk.bf16.vlgmr.msra.gmra.mxu3 %vm59_vm10, %v2929_v1  ;;  %v6528_v1 = vld [vmem:[%s8538_s7 + $0x28] sm:$0xff] }
 0x31b   :  { %3287 = vmatpush.bf16.msrb.mxu3 %v6528_v1 }
 0x372   :  { %v2595_v7 = vpop.f32.mrf.mxu0 }
 0x378   :  { %v2874_v20 = vpop.f32.mrf.mxu1 }
 0x37a   :  { %v2597_v12 = vpop.f32.mrf.mxu0 }
 0x37c   :  { %v2510_v4 = vpop.f32.mrf.mxu2 }
 0x37d   :  { %v2733_v3 = vpop.f32.mrf.mxu3  ;;  %v2525_v11 = vadd.f32 %v2524_v2, %v2510_v4  ;;  %v6537_v2 = vld [vmem:[%s8538_s7 + $0x70] sm:$0xff]  ;;  %v6527_v4 = vld [vmem:[%s8538_s7 + $0x20] sm:$0xff] }
 0x37e   :  { %3202 = vmatpush.bf16.msrb.mxu2 %v6537_v2  ;;  %3288 = vmatpush.bf16.msrb.mxu3 %v6527_v4 }
 0x37f   :  { %v2596_v13 = vadd.f32 %v2595_v7, %v2525_v11  ;;  %v3095_v7 = vld [vmem:[#allocation4 + $0x28] sm:$0xfe] }
 0x380   :  { %v2876_v37 = vpop.f32.mrf.mxu1  ;;  %v3115_v11 = vrot.slane %v3095_v7, 1  ;;  %v3456_v7 = vld [vmem:[#allocation4 + $0x18] sm:$0x7] }
 0x381   :  { %v2610_v18 = vadd.f32 %v2609_v5, %v2596_v13  ;;  %v3091_v5 = vld [vmem:[#allocation4 + $0x8] sm:$0xfe] }
 0x382   :  { %v3015_v22 = vpop.f32.mrf.mxu0  ;;  %v6536_v13 = vld [vmem:[%s8538_s7 + $0x68] sm:$0xff] }
 0x383   :  { %3203 = vmatpush.bf16.msrb.mxu2 %v6536_v13  ;;  %v3458_v13 = vld [vmem:[#allocation4 + $0x28] sm:$0xf8] }
 0x384   :  { %v2512_v8 = vpop.f32.mrf.mxu2 }
 0x385   :  { %v2735_v6 = vpop.f32.mrf.mxu3  ;;  %v2527_v17 = vadd.f32 %v2526_v19, %v2512_v8  ;;  %v6546_v19 = vld [vmem:[%s8538_s7 + $0xb8] sm:$0xff] }
 0x386   :  { %v3097_v8 = vld [vmem:[#allocation4 + $0x38] sm:$0x1]  ;;  %3425 = vmatpush.bf16.msrb.mxu1 %v6546_v19 }
 0x387   :  { %v2598_v23 = vadd.f32 %v2597_v12, %v2527_v17  ;;  %v3067_v12 = vld [vmem:[#allocation4 + $0x8] sm:$0xff]  ;;  %v6554_v17 = vld [vmem:[%s8538_s7 + $0xf8] sm:$0xff] }
 0x389   :  { %v2612_v45 = vadd.f32 %v2611_v10, %v2598_v23 }
 0x38a   :  { %v3017_v44 = vpop.f32.mrf.mxu0 }
 0x38c   :  { %v2888_v16 = vpop.f32.mrf.mxu2 }
 0x38d   :  { %v2747_v9 = vpop.f32.mrf.mxu3  ;;  %v2889_v15 = vadd.f32 %v2888_v16, %v2874_v20  ;;  %v3069_v16 = vld [vmem:[#allocation4 + $0x28] sm:$0xff] }
 0x38e   :  { %v2748_v32 = vadd.f32 %v2747_v9, %v2733_v3  ;;  %v6555_v3 = vld [vmem:[%s8538_s7 + $0x100] sm:$0xff]  ;;  %v3109_v9 = vrot.slane %v3091_v5, 1 }
 0x38f   :  { %3565 = vmatpush.bf16.msrb.mxu0 %v6555_v3 }
 0x390   :  { %v2752_v21 = vadd.f32 %v2748_v32, %v2610_v18  ;;  %v3116_v32 = vrot.slane %v3097_v8, 1  ;;  %v6526_v18 = vld [vmem:[%s8538_s7 + $0x18] sm:$0xff] }
 0x391   :  { %3289 = vmatpush.bf16.msrb.mxu3 %v6526_v18 }
 0x392   :  { %v2893_v25 = vadd.f32 %v2889_v15, %v2752_v21  ;;  %v3071_v21 = vpack.c.bf16 %v3069_v16, %v3067_v12  ;;  %v6535_v15 = vld [vmem:[%s8538_s7 + $0x60] sm:$0xff]  ;;  %v6566_v12 = vld [vmem:[%s8538_s7 + $0x158] sm:$0xff] }
 0x393   :  { %3566 = vmatpush.bf16.msrb.mxu0 %v6554_v17  ;;  %3204 = vmatpush.bf16.msrb.mxu2 %v6535_v15  ;;  %v3478_v15 = vrot.slane %v3458_v13, 3 }
 0x394   :  { %v2890_v30 = vpop.f32.mrf.mxu2  ;;  %5813 = vmatmul.msk.bf16.vlgmr.msra.gmra.mxu0 %vm59_vm10, %v3071_v21  ;;  %v6565_v21 = vld [vmem:[%s8538_s7 + $0x150] sm:$0xff] }
 0x395   :  { %v2749_v14 = vpop.f32.mrf.mxu3  ;;  %v2891_v41 = vadd.f32 %v2890_v30, %v2876_v37  ;;  %v6533_v30 = vld [vmem:[%s8538_s7 + $0x50] sm:$0xff]  ;;  %v6550_v37 = vld [vmem:[%s8538_s7 + $0xd8] sm:$0xff] }
 0x396   :  { %v2750_v26 = vadd.f32 %v2749_v14, %v2735_v6  ;;  %v3093_v6 = vld [vmem:[#allocation4 + $0x18] sm:$0x1]  ;;  %v6545_v14 = vld [vmem:[%s8538_s7 + $0xb0] sm:$0xff] }
 0x397   :  { %v3110_v10 = vrot.slane %v3093_v6, 1  ;;  %3426 = vmatpush.bf16.msrb.mxu1 %v6545_v14  ;;  %v3454_v6 = vld [vmem:[#allocation4 + $0x8] sm:$0xf8]  ;;  %v3460_v14 = vld [vmem:[#allocation4 + $0x38] sm:$0x7] }
 0x398   :  { %v2753_v31 = vadd.f32 %v2750_v26, %v2612_v45  ;;  %v6525_v26 = vld [vmem:[%s8538_s7 + $0x10] sm:$0xff]  ;;  %v6552_v45 = vld [vmem:[%s8538_s7 + $0xe8] sm:$0xff] }
 0x399   :  { %v3111_v20 = vsel %vm1786_vm9, %v3109_v9, %v3110_v10  ;;  %3290 = vmatpush.bf16.msrb.mxu3 %v6525_v26  ;;  %v3316_v26 = vld [vmem:[#allocation4 + $0x18] sm:$0x3] }
 0x39a   :  { %v2894_v47 = vadd.f32 %v2891_v41, %v2753_v31  ;;  %v6542_v31 = vld [vmem:[%s8538_s7 + $0x98] sm:$0xff] }
 0x39d   :  { %v3029_v24 = vpop.f32.mrf.mxu3 }
 0x39e   :  { %v3030_v27 = vadd.f32 %v3029_v24, %v3015_v22  ;;  %v3117_v22 = vsel %vm1786_vm9, %v3115_v11, %v3116_v32  ;;  %v6544_v24 = vld [vmem:[%s8538_s7 + $0xa8] sm:$0xff] }
 0x39f   :  { %v3123_v23 = vpack.c.bf16 %v3117_v22, %v3111_v20  ;;  %3427 = vmatpush.bf16.msrb.mxu1 %v6544_v24  ;;  %v3472_v22 = vrot.slane %v3454_v6, 3  ;;  %v3479_v24 = vrot.slane %v3460_v14, 3  ;;  %v6579_v14 = vld [vmem:[%s8540_s9 + $0x58] sm:$0xff] }
 0x3a0   :  { %v3034_v29 = vadd.f32 %v3030_v27, %v2893_v25  ;;  %v6553_v25 = vld [vmem:[%s8538_s7 + $0xf0] sm:$0xff]  ;;  %v6534_v27 = vld [vmem:[%s8538_s7 + $0x58] sm:$0xff] }
 0x3a1   :  { %5776 = vmatmul.msk.bf16.vlgmr.msra.gmra.mxu1 %vm59_vm10, %v3123_v23  ;;  %3567 = vmatpush.bf16.msrb.mxu0 %v6553_v25  ;;  %v3473_v23 = vrot.slane %v3456_v7, 3  ;;  %v3314_v25 = vld [vmem:[#allocation4 + $0x8] sm:$0xfc] }
 0x3a2   :  { %v3040_v33 = vadd.f32 %v6620_v28, %v3034_v29  ;;  %v6524_v29 = vld [vmem:[%s8538_s7 + $0x8] sm:$0xff]  ;;  %3205 = vmatpush.bf16.msrb.mxu2 %v6534_v27 }
 0x3a3   :  { %3291 = vmatpush.bf16.msrb.mxu3 %v6524_v29  ;;  %v3318_v27 = vld [vmem:[#allocation4 + $0x28] sm:$0xfc]  ;;  %v3596_v29 = vld [vmem:[#allocation4 + $0x18] sm:$0xf] }
 0x3a4   :  { %v3042_v42 = vsub.f32 0.0, %v3040_v33  ;;  %v6551_v33 = vld [vmem:[%s8538_s7 + $0xe0] sm:$0xff] }
 0x3a5   :  { %v3031_v46 = vpop.f32.mrf.mxu3  ;;  %3568 = vmatpush.bf16.msrb.mxu0 %v6552_v45  ;;  %v3594_v45 = vld [vmem:[#allocation4 + $0x8] sm:$0xf0] }
 0x3a6   :  { %v3044_v48 = vmul.f32 1.442695, %v3042_v42  ;;  %v3032_v49 = vadd.f32 %v3031_v46, %v3017_v44  ;;  %3206 = vmatpush.bf16.msrb.mxu2 %v6533_v30  ;;  %v3598_v30 = vld [vmem:[#allocation4 + $0x28] sm:$0xf0] }
 0x3a7   :  { %3292 = vmatpush.bf16.msrb.mxu3 %v6523_v34  ;;  %v3332_v34 = vrot.slane %v3314_v25, 2  ;;  %v6590_v25 = vld [vmem:[%s8540_s9 + $0xb0] sm:$0xff] }
 0x3a8   :  { %6663 = vpow2.f32 %v3044_v48  ;;  %v3035_v50 = vadd.f32 %v3032_v49, %v2894_v47  ;;  %v6567_v48 = vld [vmem:[%s8538_s7 + $0x160] sm:$0xff] }
 0x3a9   :  { %3569 = vmatpush.bf16.msrb.mxu0 %v6551_v33  ;;  %v3474_v33 = vsel %vm2770_vm14, %v3472_v22, %v3473_v23 }
 0x3aa   :  { %v3041_v51 = vadd.f32 %v6620_v28, %v3035_v50  ;;  %v6543_v28 = vld [vmem:[%s8538_s7 + $0xa0] sm:$0xff]  ;;  %3207 = vmatpush.bf16.msrb.mxu2 %v6532_v35  ;;  %v3480_v35 = vsel %vm2770_vm14, %v3478_v15, %v3479_v24 }
 0x3ab   :  { %3428 = vmatpush.bf16.msrb.mxu1 %v6543_v28  ;;  %3584 = vmatpush.bf16.msra.mxu3 %v6558_v40  ;;  %v3320_v28 = vld [vmem:[#allocation4 + $0x38] sm:$0x3]  ;;  %v3612_v40 = vrot.slane %v3594_v45, 4  ;;  %v6572_v15 = vld [vmem:[%s8540_s9 + $0x20] sm:$0xff]  ;;  %v6577_v45 = vld [vmem:[%s8540_s9 + $0x48] sm:$0xff] }
 0x3ac   :  { %v3043_v52 = vsub.f32 0.0, %v3041_v51  ;;  %v6584_v24 = vld [vmem:[%s8540_s9 + $0x80] sm:$0xff] }
 0x3ad   :  { %3570 = vmatpush.bf16.msrb.mxu0 %v6550_v37  ;;  %v3338_v37 = vrot.slane %v3318_v27, 2 }
 0x3ae   :  { %v6664_v53 = vpop.eup %6663  ;;  %v3046_v54 = vmul.f32 1.442695, %v3043_v52  ;;  %3444 = vmatpush.bf16.msra.mxu2 %v6549_v38  ;;  %v3339_v38 = vrot.slane %v3320_v28, 2 }
 0x3af   :  { %v3048_v55 = vadd.f32 1.0, %v6664_v53  ;;  %3429 = vmatpush.bf16.msrb.mxu1 %v6542_v31  ;;  %v3600_v31 = vld [vmem:[#allocation4 + $0x38] sm:$0xf] }
 0x3b0   :  { %6665 = vpow2.f32 %v3046_v54 }
 0x3b1   :  { %6667 = vrcp.f32 %v3048_v55 }
 0x3b3   :  { %3430 = vmatpush.bf16.msrb.mxu1 %v6541_v36  ;;  %v3333_v36 = vrot.slane %v3316_v26, 2 }
 0x3b6   :  { %v6666_v56 = vpop.eup %6665 }
 0x3b7   :  { %v6668_v57 = vpop.eup %6667  ;;  %v3049_v58 = vadd.f32 1.0, %v6666_v56  ;;  %3724 = vmatpush.bf16.msra.mxu1 %v6567_v48  ;;  %v3340_v48 = vsel %vm184_vm0, %v3338_v37, %v3339_v38  ;;  %v6576_v38 = vld [vmem:[%s8540_s9 + $0x40] sm:$0xff] }
 0x3b8   :  { %v3054_v59 = vrot.slane %v6668_v57, 6 }
 0x3b9   :  { %6669 = vrcp.f32 %v3049_v58 }
 0x3ba   :  { %3056 = vrot.lane.b32.xlu1 %v3054_v59, %s6705_s16 }
 0x3bf   :  { %v6670_v60 = vpop.eup %6669 }
 0x3c0   :  { %v3055_v61 = vrot.slane %v6670_v60, 6 }
 0x3c2   :  { %3058 = vrot.lane.b32.xlu2 %v3055_v61, %s6705_s16 }
 0x411   :  { %v3308_v7 = vpop.f32.mrf.mxu0 }
 0x41c   :  { %v3059_v39 = vpop.permute.xlu2 %3058 }
 0x41d   :  { %3064 = vst.msk [vmem:[#allocation4 + $0x20] sm:$0xfc] %vm2361_vm12, %v3059_v39 }
 0x41e   :  { %3065 = vst.msk [vmem:[#allocation4 + $0x30] sm:$0x3] %vm2363_vm13, %v3059_v39  ;;  %v6564_v39 = vld [vmem:[%s8538_s7 + $0x148] sm:$0xff] }
 0x424   :  { %v3094_v42 = vld [vmem:[#allocation4 + $0x20] sm:$0xfe] }
 0x425   :  { %v3096_v43 = vld [vmem:[#allocation4 + $0x30] sm:$0x1]  ;;  %v3317_v44 = vld [vmem:[#allocation4 + $0x20] sm:$0xfc]  ;;  %v3112_v50 = vrot.slane %v3094_v42, 1  ;;  %v3618_v42 = vrot.slane %v3598_v30, 4 }
 0x426   :  { %v3319_v46 = vld [vmem:[#allocation4 + $0x30] sm:$0x3]  ;;  %v3457_v47 = vld [vmem:[#allocation4 + $0x20] sm:$0xf8]  ;;  %v3113_v52 = vrot.slane %v3096_v43, 1  ;;  %v3335_v53 = vrot.slane %v3317_v44, 2  ;;  %v3486_v44 = vpack.c.bf16 %v3480_v35, %v3474_v33 }
 0x427   :  { %v3459_v49 = vld [vmem:[#allocation4 + $0x30] sm:$0x7]  ;;  %v3068_v51 = vld [vmem:[#allocation4 + $0x20] sm:$0xff]  ;;  %v3336_v54 = vrot.slane %v3319_v46, 2  ;;  %v3475_v55 = vrot.slane %v3457_v47, 3  ;;  %v3619_v43 = vrot.slane %v3600_v31, 4  ;;  %v3334_v47 = vsel %vm184_vm0, %v3332_v34, %v3333_v36 }
 0x428   :  { %v3476_v59 = vrot.slane %v3459_v49, 3  ;;  %v3114_v9 = vsel %vm1786_vm9, %v3112_v50, %v3113_v52  ;;  %v6563_v46 = vld [vmem:[%s8538_s7 + $0x140] sm:$0xff]  ;;  %v6571_v31 = vld [vmem:[%s8540_s9 + $0x18] sm:$0xff]  ;;  %v6589_v34 = vld [vmem:[%s8540_s9 + $0xa8] sm:$0xff] }
 0x429   :  { %v3337_v11 = vsel %vm184_vm0, %v3335_v53, %v3336_v54  ;;  %v3620_v50 = vsel %vm2911_vm15, %v3618_v42, %v3619_v43  ;;  %v6562_v53 = vld [vmem:[%s8538_s7 + $0x138] sm:$0xff]  ;;  %v6561_v54 = vld [vmem:[%s8538_s7 + $0x130] sm:$0xff] }
 0x42a   :  { %v3477_v18 = vsel %vm2770_vm14, %v3475_v55, %v3476_v59  ;;  %v3599_v59 = vld [vmem:[#allocation4 + $0x30] sm:$0xf]  ;;  %v6583_v33 = vld [vmem:[%s8540_s9 + $0x78] sm:$0xff] }
 0x42c   :  { %v3057_v41 = vpop.permute.xlu1 %3056 }
 0x42d   :  { %3062 = vst.msk [vmem:[#allocation4] sm:$0xfc] %vm2361_vm12, %v3057_v41 }
 0x42e   :  { %3063 = vst.msk [vmem:[#allocation4 + $0x10] sm:$0x3] %vm2363_vm13, %v3057_v41  ;;  %v3613_v41 = vrot.slane %v3596_v29, 4 }
 0x430   :  { %v3614_v49 = vsel %vm2911_vm15, %v3612_v40, %v3613_v41  ;;  %v6621_v40 = vld [vmem:[%s8539_s8] ss:$0 sm:$0xff] }
 0x431   :  { %v3626_v52 = vpack.c.bf16 %v3620_v50, %v3614_v49  ;;  %v6575_v50 = vld [vmem:[%s8540_s9 + $0x38] sm:$0xff] }
 0x434   :  { %v3066_v56 = vld [vmem:[#allocation4] sm:$0xff] }
 0x435   :  { %v3090_v57 = vld [vmem:[#allocation4] sm:$0xfe]  ;;  %v3070_v60 = vpack.c.bf16 %v3068_v51, %v3066_v56  ;;  %v3092_v61 = vld [vmem:[#allocation4 + $0x10] sm:$0x1]  ;;  %v3346_v51 = vpack.c.bf16 %v3340_v48, %v3334_v47 }
 0x436   :  { %v3313_v58 = vld [vmem:[#allocation4] sm:$0xfc]  ;;  %v3106_v62 = vrot.slane %v3090_v57, 1  ;;  %v3315_v63 = vld [vmem:[#allocation4 + $0x10] sm:$0x3]  ;;  %v3107_v1 = vrot.slane %v3092_v61, 1 }
 0x437   :  { %v3329_v0 = vrot.slane %v3313_v58, 2  ;;  %v3330_v2 = vrot.slane %v3315_v63, 2  ;;  %v3453_v19 = vld [vmem:[#allocation4] sm:$0xf8]  ;;  %v3455_v3 = vld [vmem:[#allocation4 + $0x10] sm:$0x7]  ;;  %3293 = vmatmul.bf16.vlgmr.msrb.gmra.mxu3 %v3070_v60 }
 0x438   :  { %v3469_v4 = vrot.slane %v3453_v19, 3  ;;  %v3470_v5 = vrot.slane %v3455_v3, 3  ;;  %v3108_v8 = vsel %vm1786_vm9, %v3106_v62, %v3107_v1  ;;  %v3593_v55 = vld [vmem:[#allocation4] sm:$0xf0]  ;;  %v3595_v56 = vld [vmem:[#allocation4 + $0x10] sm:$0xf]  ;;  %v3223_v3 = vpop.f32.mrf.mxu1  ;;  %3826 = vmatpush.bf16.msrb.mxu3 %v6579_v14 }
 0x439   :  { %v3331_v10 = vsel %vm184_vm0, %v3329_v0, %v3330_v2  ;;  %v3122_v32 = vpack.c.bf16 %v3114_v9, %v3108_v8  ;;  %v6560_v57 = vld [vmem:[%s8538_s7 + $0x128] sm:$0xff]  ;;  %v3597_v58 = vld [vmem:[#allocation4 + $0x20] sm:$0xf0]  ;;  %v3609_v60 = vrot.slane %v3593_v55, 4  ;;  %v3610_v61 = vrot.slane %v3595_v56, 4  ;;  %v6587_v56 = vld [vmem:[%s8540_s9 + $0x98] sm:$0xff] }
 0x43a   :  { %v3345_v16 = vpack.c.bf16 %v3337_v11, %v3331_v10  ;;  %v3471_v17 = vsel %vm2770_vm14, %v3469_v4, %v3470_v5  ;;  %v6559_v62 = vld [vmem:[%s8538_s7 + $0x120] sm:$0xff]  ;;  %v3615_v63 = vrot.slane %v3597_v58, 4  ;;  %v3616_v0 = vrot.slane %v3599_v59, 4  ;;  %v6581_v55 = vld [vmem:[%s8540_s9 + $0x68] sm:$0xff]  ;;  %v6574_v58 = vld [vmem:[%s8540_s9 + $0x30] sm:$0xff] }
 0x43b   :  { %v3485_v20 = vpack.c.bf16 %v3477_v18, %v3471_v17  ;;  %3208 = vmatmul.bf16.vlgmr.msrb.gmra.mxu2 %v3122_v32  ;;  %v3611_v1 = vsel %vm2911_vm15, %v3609_v60, %v3610_v61  ;;  %v6573_v32 = vld [vmem:[%s8540_s9 + $0x28] sm:$0xff]  ;;  %v6591_v17 = vld [vmem:[%s8540_s9 + $0xb8] sm:$0xff]  ;;  %v6588_v47 = vld [vmem:[%s8540_s9 + $0xa0] sm:$0xff]  ;;  %vm3781_vm0 = vcmask 1041409  }
 0x43c   :  { %3431 = vmatmul.bf16.vlgmr.msrb.gmra.mxu1 %v3345_v16  ;;  %3703 = vmatpush.bf16.msrb.mxu2 %v6566_v12  ;;  %v3617_v2 = vsel %vm2911_vm15, %v3615_v63, %v3616_v0  ;;  %v3310_v12 = vpop.f32.mrf.mxu0  ;;  %v6585_v16 = vld [vmem:[%s8540_s9 + $0x88] sm:$0xff]  ;;  %v6580_v63 = vld [vmem:[%s8540_s9 + $0x60] sm:$0xff]  ;;  %v6595_v14 = vld [vmem:[%s8540_s9 + $0xd8] sm:$0xff] }
 0x43d   :  { %3571 = vmatmul.bf16.vlgmr.msrb.gmra.mxu0 %v3485_v20  ;;  %v3625_v19 = vpack.c.bf16 %v3617_v2, %v3611_v1  ;;  %3950 = vmatpush.bf16.msrb.mxu1 %v6585_v16  ;;  %v6597_v59 = vld [vmem:[%s8540_s9 + $0xe8] sm:$0xff]  ;;  %v6586_v2 = vld [vmem:[%s8540_s9 + $0x90] sm:$0xff] }
 0x43e   :  { %3881 = vmatpush.bf16.msra.mxu0 %v6573_v32  ;;  %v6601_v16 = vld [vmem:[%s8540_s9 + $0x108] sm:$0xff] }
 0x440   :  { %3704 = vmatpush.bf16.msrb.mxu2 %v6565_v21  ;;  %v3225_v5 = vpop.f32.mrf.mxu1  ;;  %v6578_v21 = vld [vmem:[%s8540_s9 + $0x50] sm:$0xff] }
 0x441   :  { %3827 = vmatpush.bf16.msrb.mxu3 %v6578_v21  ;;  %3951 = vmatpush.bf16.msrb.mxu1 %v6584_v24  ;;  %v6613_v21 = vld [vmem:[%s8540_s9 + $0x168] sm:$0xff]  ;;  %v6606_v24 = vld [vmem:[%s8540_s9 + $0x130] sm:$0xff] }
 0x442   :  { %3882 = vmatpush.bf16.msra.mxu0 %v6572_v15  ;;  %v6600_v15 = vld [vmem:[%s8540_s9 + $0x100] sm:$0xff] }
 0x444   :  { %3705 = vmatpush.bf16.msrb.mxu2 %v6564_v39 }
 0x445   :  { %3828 = vmatpush.bf16.msrb.mxu3 %v6577_v45  ;;  %3952 = vmatpush.bf16.msrb.mxu1 %v6583_v33  ;;  %v6605_v45 = vld [vmem:[%s8540_s9 + $0x128] sm:$0xff]  ;;  %v6592_v33 = vld [vmem:[%s8540_s9 + $0xc0] sm:$0xff] }
 0x446   :  { %3883 = vmatpush.bf16.msra.mxu0 %v6571_v31 }
 0x447   :  { %5923 = vmatmul.msk.bf16.vlgmr.msra.gmra.mxu3 %vm59_vm10, %v3486_v44  ;;  %v6570_v44 = vld [vmem:[%s8540_s9 + $0x10] sm:$0xff] }
 0x448   :  { %3706 = vmatpush.bf16.msrb.mxu2 %v6563_v46  ;;  %v6582_v46 = vld [vmem:[%s8540_s9 + $0x70] sm:$0xff] }
 0x449   :  { %3829 = vmatpush.bf16.msrb.mxu3 %v6576_v38  ;;  %3953 = vmatpush.bf16.msrb.mxu1 %v6582_v46 }
 0x44a   :  { %3884 = vmatpush.bf16.msra.mxu0 %v6570_v44 }
 0x44b   :  { %5868 = vmatmul.msk.bf16.vlgmr.msra.gmra.mxu2 %vm59_vm10, %v3346_v51 }
 0x44c   :  { %5978 = vmatmul.msk.bf16.vlgmr.msra.gmra.mxu1 %vm59_vm10, %v3626_v52  ;;  %3707 = vmatpush.bf16.msrb.mxu2 %v6562_v53 }
 0x44d   :  { %3830 = vmatpush.bf16.msrb.mxu3 %v6575_v50  ;;  %3954 = vmatpush.bf16.msrb.mxu1 %v6581_v55 }
 0x450   :  { %3708 = vmatpush.bf16.msrb.mxu2 %v6561_v54  ;;  %v6569_v54 = vld [vmem:[%s8540_s9 + $0x8] sm:$0xff] }
 0x451   :  { %3885 = vmatpush.bf16.msra.mxu0 %v6569_v54  ;;  %3831 = vmatpush.bf16.msrb.mxu3 %v6574_v58 }
 0x452   :  { %3955 = vmatpush.bf16.msrb.mxu1 %v6580_v63 }
 0x454   :  { %3709 = vmatpush.bf16.msrb.mxu2 %v6560_v57 }
 0x455   :  { %4090 = vmatpush.bf16.msra.mxu3 %v6597_v59 }
 0x458   :  { %3710 = vmatpush.bf16.msrb.mxu2 %v6559_v62  ;;  %v6568_v62 = vld [vmem:[%s8540_s9] sm:$0xff] }
 0x459   :  { %3886 = vmatpush.bf16.msra.mxu0 %v6568_v62 }
 0x45b   :  { %3711 = vmatmul.bf16.vlgmr.msrb.gmra.mxu2 %v3625_v19  ;;  %v6603_v19 = vld [vmem:[%s8540_s9 + $0x118] sm:$0xff] }
 0x45c   :  { %4020 = vmatpush.bf16.msra.mxu2 %v6591_v17 }
 0x45d   :  { %4160 = vmatpush.bf16.msrb.mxu0 %v6603_v19 }
 0x460   :  { %4021 = vmatpush.bf16.msra.mxu2 %v6590_v25  ;;  %v6612_v25 = vld [vmem:[%s8540_s9 + $0x160] sm:$0xff] }
 0x464   :  { %4022 = vmatpush.bf16.msra.mxu2 %v6589_v34  ;;  %v6598_v34 = vld [vmem:[%s8540_s9 + $0xf0] sm:$0xff] }
 0x468   :  { %4023 = vmatpush.bf16.msra.mxu2 %v6588_v47 }
 0x46c   :  { %4024 = vmatpush.bf16.msra.mxu2 %v6587_v56 }
 0x470   :  { %4025 = vmatpush.bf16.msra.mxu2 %v6586_v2 }
 0x4b9   :  { %v3432_v9 = vpop.f32.mrf.mxu1 }
 0x4ba   :  { %v3294_v6 = vpop.f32.mrf.mxu3  ;;  %v3572_v29 = vpop.f32.mrf.mxu0 }
 0x4be   :  { %v3209_v4 = vpop.f32.mrf.mxu2 }
 0x4bf   :  { %v3224_v13 = vadd.f32 %v3223_v3, %v3209_v4 }
 0x4c1   :  { %v3434_v18 = vpop.f32.mrf.mxu1  ;;  %v3295_v20 = vadd.f32 %v3294_v6, %v3224_v13  ;;  %v6609_v6 = vld [vmem:[%s8540_s9 + $0x148] sm:$0xff]  ;;  %v6614_v13 = vld [vmem:[%s8540_s9 + $0x170] sm:$0xff] }
 0x4c2   :  { %v3296_v10 = vpop.f32.mrf.mxu3  ;;  %v3574_v57 = vpop.f32.mrf.mxu0  ;;  %4230 = vmatpush.bf16.msra.mxu1 %v6609_v6 }
 0x4c3   :  { %v3309_v28 = vadd.f32 %v3308_v7, %v3295_v20  ;;  %v6615_v7 = vld [vmem:[%s8540_s9 + $0x178] sm:$0xff] }
 0x4c4   :  { %4300 = vmatpush.bf16.msrb.mxu2 %v6615_v7  ;;  %v6607_v20 = vld [vmem:[%s8540_s9 + $0x138] sm:$0xff] }
 0x4c6   :  { %v3211_v8 = vpop.f32.mrf.mxu2 }
 0x4c7   :  { %v3226_v27 = vadd.f32 %v3225_v5, %v3211_v8  ;;  %v6596_v8 = vld [vmem:[%s8540_s9 + $0xe0] sm:$0xff] }
 0x4c8   :  { %4091 = vmatpush.bf16.msra.mxu3 %v6596_v8  ;;  %4301 = vmatpush.bf16.msrb.mxu2 %v6614_v13 }
 0x4c9   :  { %v3726_v35 = vpop.f32.mrf.mxu1  ;;  %v3297_v36 = vadd.f32 %v3296_v10, %v3226_v27  ;;  %v6602_v10 = vld [vmem:[%s8540_s9 + $0x110] sm:$0xff]  ;;  %v6599_v27 = vld [vmem:[%s8540_s9 + $0xf8] sm:$0xff] }
 0x4ca   :  { %v3586_v26 = vpop.f32.mrf.mxu3  ;;  %4161 = vmatpush.bf16.msrb.mxu0 %v6602_v10 }
 0x4cb   :  { %v3587_v37 = vadd.f32 %v3586_v26, %v3572_v29  ;;  %v3311_v48 = vadd.f32 %v3310_v12, %v3297_v36  ;;  %v6608_v12 = vld [vmem:[%s8540_s9 + $0x140] sm:$0xff]  ;;  %v6593_v26 = vld [vmem:[%s8540_s9 + $0xc8] sm:$0xff]  ;;  %v6611_v29 = vld [vmem:[%s8540_s9 + $0x158] sm:$0xff] }
 0x4cc   :  { %4231 = vmatpush.bf16.msra.mxu1 %v6608_v12  ;;  %4092 = vmatpush.bf16.msra.mxu3 %v6595_v14  ;;  %v6604_v36 = vld [vmem:[%s8540_s9 + $0x120] sm:$0xff] }
 0x4cd   :  { %4302 = vmatpush.bf16.msrb.mxu2 %v6613_v21 }
 0x4ce   :  { %v3446_v11 = vpop.f32.mrf.mxu2  ;;  %4162 = vmatpush.bf16.msrb.mxu0 %v6601_v16 }
 0x4cf   :  { %v3447_v23 = vadd.f32 %v3446_v11, %v3432_v9 }
 0x4d0   :  { %4232 = vmatpush.bf16.msra.mxu1 %v6607_v20 }
 0x4d1   :  { %v3451_v30 = vadd.f32 %v3447_v23, %v3309_v28  ;;  %v3728_v0 = vpop.f32.mrf.mxu1  ;;  %v6594_v23 = vld [vmem:[%s8540_s9 + $0xd0] sm:$0xff]  ;;  %4303 = vmatpush.bf16.msrb.mxu2 %v6612_v25 }
 0x4d2   :  { %v3588_v51 = vpop.f32.mrf.mxu3  ;;  %4093 = vmatpush.bf16.msra.mxu3 %v6594_v23  ;;  %4163 = vmatpush.bf16.msrb.mxu0 %v6600_v15 }
 0x4d3   :  { %v3591_v42 = vadd.f32 %v3587_v37, %v3451_v30  ;;  %v3589_v60 = vadd.f32 %v3588_v51, %v3574_v57  ;;  %v6610_v37 = vld [vmem:[%s8540_s9 + $0x150] sm:$0xff] }
 0x4d4   :  { %4233 = vmatpush.bf16.msra.mxu1 %v6606_v24 }
 0x4d5   :  { %4304 = vmatpush.bf16.msrb.mxu2 %v6611_v29 }
 0x4d6   :  { %v3448_v22 = vpop.f32.mrf.mxu2  ;;  %4094 = vmatpush.bf16.msra.mxu3 %v6593_v26  ;;  %4164 = vmatpush.bf16.msrb.mxu0 %v6599_v27 }
 0x4d7   :  { %v3449_v41 = vadd.f32 %v3448_v22, %v3434_v18 }
 0x4d8   :  { %4234 = vmatpush.bf16.msra.mxu1 %v6605_v45 }
 0x4d9   :  { %v3452_v52 = vadd.f32 %v3449_v41, %v3311_v48  ;;  %4305 = vmatpush.bf16.msrb.mxu2 %v6610_v37 }
 0x4da   :  { %4095 = vmatpush.bf16.msra.mxu3 %v6592_v33  ;;  %4165 = vmatpush.bf16.msrb.mxu0 %v6598_v34 }
 0x4db   :  { %v3592_v4 = vadd.f32 %v3589_v60, %v3452_v52 }
 0x4dc   :  { %4235 = vmatpush.bf16.msra.mxu1 %v6604_v36 }
 0x4de   :  { %v3712_v39 = vpop.f32.mrf.mxu2 }
 0x4df   :  { %v3727_v43 = vadd.f32 %v3726_v35, %v3712_v39 }
 0x4e1   :  { %v3731_v49 = vadd.f32 %v3727_v43, %v3591_v42 }
 0x4e3   :  { %v3737_v53 = vadd.f32 %v6621_v40, %v3731_v49 }
 0x4e5   :  { %v3739_v61 = vsub.f32 0.0, %v3737_v53 }
 0x4e6   :  { %v3714_v1 = vpop.f32.mrf.mxu2 }
 0x4e7   :  { %v3741_v3 = vmul.f32 1.442695, %v3739_v61  ;;  %v3729_v5 = vadd.f32 %v3728_v0, %v3714_v1 }
 0x4e9   :  { %6671 = vpow2.f32 %v3741_v3  ;;  %v3732_v9 = vadd.f32 %v3729_v5, %v3592_v4 }
 0x4eb   :  { %v3738_v11 = vadd.f32 %v6621_v40, %v3732_v9 }
 0x4ed   :  { %v3740_v32 = vsub.f32 0.0, %v3738_v11 }
 0x4ef   :  { %v6672_v17 = vpop.eup %6671  ;;  %v3743_v18 = vmul.f32 1.442695, %v3740_v32 }
 0x4f0   :  { %v3745_v22 = vadd.f32 1.0, %v6672_v17 }
 0x4f1   :  { %6673 = vpow2.f32 %v3743_v18 }
 0x4f2   :  { %6675 = vrcp.f32 %v3745_v22 }
 0x4f7   :  { %v6674_v28 = vpop.eup %6673 }
 0x4f8   :  { %v6676_v30 = vpop.eup %6675  ;;  %v3746_v31 = vadd.f32 1.0, %v6674_v28  ;;  %v6622_v28 = vld [vmem:[%s8541_s10] ss:$0 sm:$0xff] }
 0x4f9   :  { %v3749_v35 = vpack.c.bf16 %v6676_v30, %v6676_v30 }
 0x4fa   :  { %6677 = vrcp.f32 %v3746_v31 }
 0x4fb   :  { %v3778_v38 = vunpack.c.l.b16 %v3749_v35 }
 0x4fd   :  { %v3780_v42 = vrot.slane %v3778_v38, 1  ;;  %v3905_v43 = vrot.slane %v3778_v38, 2  ;;  %v3975_v44 = vrot.slane %v3778_v38, 3  ;;  %v4045_v58 = vrot.slane %v3778_v38, 4 }
 0x4fe   :  { %v4115_v63 = vrot.slane %v3778_v38, 5  ;;  %v4185_v0 = vrot.slane %v3778_v38, 6  ;;  %v4255_v1 = vrot.slane %v3778_v38, 7 }
 0x500   :  { %v6678_v39 = vpop.eup %6677 }
 0x501   :  { %v3750_v40 = vpack.c.bf16 %v6678_v39, %v6678_v39 }
 0x503   :  { %v3779_v41 = vunpack.c.l.b16 %v3750_v40 }
 0x505   :  { %v3782_v46 = vsel %vm3781_vm0, %v3779_v41, %v3780_v42  ;;  %v3837_v47 = vrot.slane %v3779_v41, 7  ;;  %v3906_v48 = vrot.slane %v3779_v41, 1  ;;  %v3976_v49 = vrot.slane %v3779_v41, 2 }
 0x506   :  { %v3783_v50 = vpack.c.b16 %v3782_v46, %v3782_v46  ;;  %v4046_v57 = vrot.slane %v3779_v41, 3  ;;  %v4116_v59 = vrot.slane %v3779_v41, 4  ;;  %v4186_v60 = vrot.slane %v3779_v41, 5 }
 0x507   :  { %v3838_v51 = vsel %vm3781_vm0, %v3837_v47, %v3778_v38  ;;  %v3907_v52 = vsel %vm3781_vm0, %v3906_v48, %v3905_v43  ;;  %v3977_v53 = vsel %vm3781_vm0, %v3976_v49, %v3975_v44  ;;  %v4256_v61 = vrot.slane %v3779_v41, 6 }
 0x508   :  { %6015 = vmatmul.msk.bf16.vlgmr.msrb.gmra.mxu3 %vm3820_vm1, %v3783_v50  ;;  %v3839_v54 = vpack.c.b16 %v3838_v51, %v3838_v51  ;;  %v3908_v55 = vpack.c.b16 %v3907_v52, %v3907_v52  ;;  %v3978_v56 = vpack.c.b16 %v3977_v53, %v3977_v53  ;;  %v4047_v62 = vsel %vm3781_vm0, %v4046_v57, %v4045_v58 }
 0x509   :  { %v4117_v2 = vsel %vm3781_vm0, %v4116_v59, %v4115_v63  ;;  %v4187_v19 = vsel %vm3781_vm0, %v4186_v60, %v4185_v0  ;;  %v4048_v3 = vpack.c.b16 %v4047_v62, %v4047_v62  ;;  %v4257_v4 = vsel %vm3781_vm0, %v4256_v61, %v4255_v1 }
 0x50a   :  { %6040 = vmatmul.msk.bf16.vlgmr.msra.gmra.mxu0 %vm3820_vm1, %v3839_v54  ;;  %6077 = vmatmul.msk.bf16.vlgmr.msrb.gmra.mxu1 %vm3820_vm1, %v3908_v55  ;;  %v4118_v5 = vpack.c.b16 %v4117_v2, %v4117_v2  ;;  %v4188_v6 = vpack.c.b16 %v4187_v19, %v4187_v19  ;;  %v4258_v7 = vpack.c.b16 %v4257_v4, %v4257_v4 }
 0x50b   :  { %6114 = vmatmul.msk.bf16.vlgmr.msra.gmra.mxu2 %vm3820_vm1, %v3978_v56 }
 0x518   :  { %6151 = vmatmul.msk.bf16.vlgmr.msra.gmra.mxu3 %vm3820_vm1, %v4048_v3 }
 0x51a   :  { %6188 = vmatmul.msk.bf16.vlgmr.msrb.gmra.mxu0 %vm3820_vm1, %v4118_v5  ;;  %6225 = vmatmul.msk.bf16.vlgmr.msra.gmra.mxu1 %vm3820_vm1, %v4188_v6 }
 0x51b   :  { %6262 = vmatmul.msk.bf16.vlgmr.msrb.gmra.mxu2 %vm3820_vm1, %v4258_v7 }
 0x587   :  { %v3888_v8 = vpop.f32.mrf.mxu0  ;;  %v3957_v9 = vpop.f32.mrf.mxu1 }
 0x58b   :  { %v3833_v10 = vpop.f32.mrf.mxu3 }
 0x58c   :  { %v3889_v14 = vadd.f32 %v3888_v8, %v3833_v10 }
 0x58e   :  { %v4027_v11 = vpop.f32.mrf.mxu2  ;;  %v3961_v16 = vadd.f32 %v3957_v9, %v3889_v14 }
 0x58f   :  { %v3890_v12 = vpop.f32.mrf.mxu0  ;;  %v3959_v13 = vpop.f32.mrf.mxu1 }
 0x590   :  { %v4031_v21 = vadd.f32 %v4027_v11, %v3961_v16 }
 0x593   :  { %v3835_v32 = vpop.f32.mrf.mxu3 }
 0x596   :  { %v4029_v17 = vpop.f32.mrf.mxu2 }
 0x597   :  { %v4167_v18 = vpop.f32.mrf.mxu0  ;;  %v4237_v20 = vpop.f32.mrf.mxu1 }
 0x59b   :  { %v4097_v22 = vpop.f32.mrf.mxu3 }
 0x59c   :  { %v4101_v23 = vadd.f32 %v4097_v22, %v4031_v21 }
 0x59e   :  { %v4171_v15 = vadd.f32 %v4167_v18, %v4101_v23  ;;  %v4307_v24 = vpop.f32.mrf.mxu2 }
 0x59f   :  { %v4169_v25 = vpop.f32.mrf.mxu0  ;;  %v4239_v26 = vpop.f32.mrf.mxu1 }
 0x5a0   :  { %v4241_v27 = vadd.f32 %v4237_v20, %v4171_v15 }
 0x5a2   :  { %v4311_v45 = vadd.f32 %v4307_v24, %v4241_v27 }
 0x5a3   :  { %v4099_v29 = vpop.f32.mrf.mxu3 }
 0x5a4   :  { %v4316_v30 = vadd.f32 %v6622_v28, %v4311_v45 }
 0x5a6   :  { %4317 = vst [vmem:[#allocation5] sm:$0x3] %v4316_v30  ;;  %v4309_v31 = vpop.f32.mrf.mxu2 }
 0x5a7   :  { %4328 = dma.vmem_to_hbm [thread:$0]  %s4324_s22, 32, %s4326_s25, [#allocation6]  }
 0x5a8   :  { %6703 = dma.done.wait [#allocation6], 32  }
 0x5a9   :  { %6704 = vsyncadd [#allocation6], 4294967264 }
 0x5aa   :  { %4333 = vsyncpa [#allocation6], 1 }

</bundles_post_ra>
